<compile_context>
chip_gen: v7x
topology: tpu7x:2x2x1
jax: 0.10.0
libtpu: 0.0.40
codegen_flags: <defaults>
</compile_context>

<pallas_src>
import functools

import jax
import jax.numpy as jnp
from jax.experimental import pallas as pl
from jax.experimental.pallas import tpu as pltpu

LANES = 128
VMEM_LIMIT = 32 * 1024 * 1024  # explicit scoped-VMEM budget (safe on v5e/v6e/v7x)

C1_OUT, C2_OUT, HIDDEN, NUM_CLASSES = 40, 60, 500, 10


def _round_up(x, m):
    return ((x + m - 1) // m) * m


def _compiler_params():
    return pltpu.CompilerParams(
        dimension_semantics=("parallel",),
        vmem_limit_bytes=VMEM_LIMIT,
    )


# ----------------------------- Pallas kernels ------------------------------

def _matmul_bias_relu_kernel(x_ref, w_ref, b_ref, o_ref):
    # o = relu(x @ w + b); bf16 operands, f32 accumulation, bf16 store.
    acc = jnp.dot(x_ref[...], w_ref[...], preferred_element_type=jnp.float32)
    acc = acc + b_ref[...]
    o_ref[...] = jnp.maximum(acc, 0.0).astype(o_ref.dtype)


def _fc_head_kernel(x_ref, w1_ref, b1_ref, w2_ref, b2_ref, o_ref, *, num_classes):
    # h = relu(x @ w1 + b1) stays on-chip; z = h @ w2 + b2; log_softmax with
    # padded class lanes masked out; normalization in f32.
    h = jnp.dot(x_ref[...], w1_ref[...], preferred_element_type=jnp.float32)
    h = jnp.maximum(h + b1_ref[...], 0.0).astype(jnp.bfloat16)
    z = jnp.dot(h, w2_ref[...], preferred_element_type=jnp.float32)
    z = z + b2_ref[...]
    col = jax.lax.broadcasted_iota(jnp.int32, z.shape, 1)
    z = jnp.where(col < num_classes, z, -1e30)          # mask padded classes
    m = jnp.max(z, axis=1, keepdims=True)
    lse = jnp.log(jnp.sum(jnp.exp(z - m), axis=1, keepdims=True)) + m
    o_ref[...] = (z - lse).astype(o_ref.dtype)


def _maxpool2x2_kernel(x_ref, o_ref):
    # Block layout: (1, H/2, 2, W/2, 2*C) -> (1, H/2, W/2, C).
    # H-direction max: static index on a leading dim; W-direction max:
    # lane-aligned 128-wide slice max.  No in-kernel reshapes.
    x = x_ref[...]                                      # (1, H/2, 2, Wp, 2C)
    C = o_ref.shape[-1]
    m = jnp.maximum(x[:, :, 0, :, :], x[:, :, 1, :, :])  # (1, H/2, Wp, 2C)
    o_ref[...] = jnp.maximum(m[..., :C], m[..., C:])     # (1, H/2, Wp, C)


# ------------------------------- wrappers ----------------------------------

def matmul_bias_relu(x, w, b, *, tile_m=256):
    """relu(x @ w + b): M-tiled, VMEM-resident weight/bias, bf16 -> bf16."""
    M, K = x.shape
    K2, N = w.shape
    assert K == K2 and N % LANES == 0
    tm = min(tile_m, M)
    return pl.pallas_call(
        _matmul_bias_relu_kernel,
        out_shape=jax.ShapeDtypeStruct((M, N), jnp.bfloat16),
        grid=(pl.cdiv(M, tm),),
        in_specs=[
            pl.BlockSpec((tm, K), lambda i: (i, 0)),
            pl.BlockSpec((K, N), lambda i: (0, 0)),     # VMEM-resident weight
            pl.BlockSpec((1, N), lambda i: (0, 0)),     # VMEM-resident bias
        ],
        out_specs=pl.BlockSpec((tm, N), lambda i: (i, 0)),
        compiler_params=_compiler_params(),
    )(x, w, b)


def fc_head(x, w1, b1, w2, b2, num_classes, *, tile_m=256):
    """log_softmax(relu(x @ w1 + b1) @ w2 + b2) in a single fused kernel."""
    M, K = x.shape
    Hp = w1.shape[1]
    Np = w2.shape[1]
    tm = min(tile_m, M)
    kernel = functools.partial(_fc_head_kernel, num_classes=num_classes)
    out = pl.pallas_call(
        kernel,
        out_shape=jax.ShapeDtypeStruct((M, Np), jnp.float32),
        grid=(pl.cdiv(M, tm),),
        in_specs=[
            pl.BlockSpec((tm, K), lambda i: (i, 0)),
            pl.BlockSpec((K, Hp), lambda i: (0, 0)),
            pl.BlockSpec((1, Hp), lambda i: (0, 0)),
            pl.BlockSpec((Hp, Np), lambda i: (0, 0)),
            pl.BlockSpec((1, Np), lambda i: (0, 0)),
        ],
        out_specs=pl.BlockSpec((tm, Np), lambda i: (i, 0)),
        compiler_params=_compiler_params(),
    )(x, w1, b1, w2, b2)
    return out[:, :num_classes]


def maxpool2x2_nhwc(x):
    """2x2/stride-2 max pool on (N, H, W, C) with C a multiple of 128."""
    N, H, W, C = x.shape
    assert H % 2 == 0 and W % 2 == 0 and C % LANES == 0
    H2, W2 = H // 2, W // 2
    # Free row-major re-views: pair adjacent H rows on a leading dim and
    # adjacent W pixels along the lane dim (last two dims unchanged in memory).
    xp = x.reshape(N, H2, 2, W2, 2 * C)
    return pl.pallas_call(
        _maxpool2x2_kernel,
        out_shape=jax.ShapeDtypeStruct((N, H2, W2, C), x.dtype),
        grid=(N,),
        in_specs=[pl.BlockSpec((1, H2, 2, W2, 2 * C),
                               lambda n: (n, 0, 0, 0, 0))],
        out_specs=pl.BlockSpec((1, H2, W2, C), lambda n: (n, 0, 0, 0)),
        compiler_params=_compiler_params(),
    )(xp)


# ------------------------------ conv helpers --------------------------------

def im2col(x_nhwc, k):
    """k x k (stride 1, valid) patches -> ((N*Ho*Wo, k*k*C), (N, Ho, Wo))."""
    Nb, H, W, C = x_nhwc.shape
    Ho, Wo = H - k + 1, W - k + 1
    cols = [x_nhwc[:, dy:dy + Ho, dx:dx + Wo, :]
            for dy in range(k) for dx in range(k)]
    patches = jnp.stack(cols, axis=3)                  # (N, Ho, Wo, k*k, C)
    return patches.reshape(Nb * Ho * Wo, k * k * C), (Nb, Ho, Wo)


def conv_relu_pool(x_nhwc, w_mat, b_row, k=5):
    """conv(k, stride 1) -> relu -> maxpool(2,2); Cout padded to 128 lanes."""
    patches, (Nb, Ho, Wo) = im2col(x_nhwc.astype(jnp.bfloat16), k)
    y = matmul_bias_relu(patches, w_mat, b_row)        # (N*Ho*Wo, Cpad) bf16
    Cpad = w_mat.shape[1]
    y = y.reshape(Nb, Ho, Wo, Cpad)                    # free row-major re-view
    return maxpool2x2_nhwc(y)                          # (N, Ho//2, Wo//2, Cpad)


# ------------------------- params & one-time prep ----------------------------

def init_params(key):
    ks = jax.random.split(key, 8)
    s = 0.05
    return {
        "conv1_w": jax.random.normal(ks[0], (40, 3, 5, 5), jnp.float32) * s,
        "conv1_b": jax.random.normal(ks[1], (40,), jnp.float32) * s,
        "conv2_w": jax.random.normal(ks[2], (60, 40, 5, 5), jnp.float32) * s,
        "conv2_b": jax.random.normal(ks[3], (60,), jnp.float32) * s,
        "fc1_w": jax.random.normal(ks[4], (500, 5 * 5 * 60), jnp.float32) * s,
        "fc1_b": jax.random.normal(ks[5], (500,), jnp.float32) * s,
        "fc2_w": jax.random.normal(ks[6], (10, 500), jnp.float32) * s,
        "fc2_b": jax.random.normal(ks[7], (10,), jnp.float32) * s,
    }


def _pad_axis(a, axis, target):
    pads = [(0, 0)] * a.ndim
    pads[axis] = (0, target - a.shape[axis])
    return jnp.pad(a, pads)


def prepare_params(p):
    """One-time weight re-layout: im2col matrices, lane padding, bf16 cast."""
    def conv_w(w):
        Cout, Cin, KH, KW = w.shape
        m = jnp.transpose(w, (2, 3, 1, 0)).reshape(KH * KW * Cin, Cout)
        return _pad_axis(m, 1, _round_up(Cout, LANES)).astype(jnp.bfloat16)

    def row_bias(b, target):
        return _pad_axis(b.reshape(1, -1), 1, target).astype(jnp.float32)

    h_pad = _round_up(HIDDEN, LANES)       # 512
    c_pad = _round_up(NUM_CLASSES, LANES)  # 128

    w1 = _pad_axis(p["fc1_w"].T, 1, h_pad).astype(jnp.bfloat16)       # (1500,512)
    w2 = _pad_axis(_pad_axis(p["fc2_w"].T, 0, h_pad), 1, c_pad)       # (512,128)
    return {
        "conv1_w": conv_w(p["conv1_w"]),
        "conv1_b": row_bias(p["conv1_b"], _round_up(C1_OUT, LANES)),
        "conv2_w": conv_w(p["conv2_w"]),
        "conv2_b": row_bias(p["conv2_b"], _round_up(C2_OUT, LANES)),
        "fc1_w": w1,
        "fc1_b": row_bias(p["fc1_b"], h_pad),
        "fc2_w": w2.astype(jnp.bfloat16),
        "fc2_b": row_bias(p["fc2_b"], c_pad),
    }


# -------------------------------- model --------------------------------------

def cnn_forward(prep, x_nchw):
    # x_nchw: (N, 3, 32, 32) float32 (PyTorch layout) -> NHWC bf16.
    x = jnp.transpose(x_nchw, (0, 2, 3, 1)).astype(jnp.bfloat16)      # (N,32,32,3)
    x = conv_relu_pool(x, prep["conv1_w"], prep["conv1_b"])           # (N,14,14,128)
    x = x[..., :C1_OUT]                                               # drop lane pad
    x = conv_relu_pool(x, prep["conv2_w"], prep["conv2_b"])           # (N,5,5,128)
    x = x[..., :C2_OUT]                                               # (N,5,5,60)
    # flatten in PyTorch's NCHW order: view(-1, 60*5*5)
    feat = jnp.transpose(x, (0, 3, 1, 2)).reshape(x.shape[0], C2_OUT * 5 * 5)
    return fc_head(feat.astype(jnp.bfloat16),
                   prep["fc1_w"], prep["fc1_b"],
                   prep["fc2_w"], prep["fc2_b"], NUM_CLASSES)         # (N,10)


# --------------------------- pure-JAX reference -------------------------------

def cnn_reference(p, x_nchw):
    y = jax.lax.conv_general_dilated(
        x_nchw, p["conv1_w"], window_strides=(1, 1), padding="VALID",
        dimension_numbers=("NCHW", "OIHW", "NCHW"))
    y = jax.nn.relu(y + p["conv1_b"][None, :, None, None])
    y = jax.lax.reduce_window(y, -jnp.inf, jax.lax.max,
                              (1, 1, 2, 2), (1, 1, 2, 2), "VALID")
    y = jax.lax.conv_general_dilated(
        y, p["conv2_w"], window_strides=(1, 1), padding="VALID",
        dimension_numbers=("NCHW", "OIHW", "NCHW"))
    y = jax.nn.relu(y + p["conv2_b"][None, :, None, None])
    y = jax.lax.reduce_window(y, -jnp.inf, jax.lax.max,
                              (1, 1, 2, 2), (1, 1, 2, 2), "VALID")
    y = y.reshape(y.shape[0], -1)
    y = jax.nn.relu(y @ p["fc1_w"].T + p["fc1_b"])
    y = y @ p["fc2_w"].T + p["fc2_b"]
    return jax.nn.log_softmax(y, axis=1)


# --------------------------------- main ---------------------------------------

if __name__ == "__main__":
    key = jax.random.PRNGKey(0)
    k_params, k_x = jax.random.split(key)
    params = init_params(k_params)
    prep = prepare_params(params)          # weight re-layout done once, not per step
    x = jax.random.normal(k_x, (2, 3, 32, 32), jnp.float32)

    fwd = jax.jit(cnn_forward)
    out = fwd(prep, x)
    jax.block_until_ready(out)

    assert out.shape == (2, NUM_CLASSES), out.shape
    assert bool(jnp.all(jnp.isfinite(out)))
    # log_softmax rows must exp-sum to 1 (normalization done in f32)
    assert jnp.allclose(jnp.sum(jnp.exp(out), axis=1), 1.0, atol=1e-3)

    # loose numeric check vs. pure-JAX f32 reference (bf16 MXU operands)
    ref = jax.jit(cnn_reference)(params, x)
    max_err = float(jnp.max(jnp.abs(out - ref)))
    assert max_err < 0.1, f"max |out - ref| = {max_err}"

    print("KERNEL_OK")
</pallas_src>

<mosaic_0001>
module attributes {stable_mosaic.version = 11 : i64} {
  func.func @_matmul_bias_relu_kernel(%arg0: i32, %arg1: memref<256x75xbf16, #tpu.memory_space<vmem>>, %arg2: memref<75x128xbf16, #tpu.memory_space<vmem>>, %arg3: memref<1x128xf32, #tpu.memory_space<vmem>>, %arg4: memref<256x128xbf16, #tpu.memory_space<vmem>>) attributes {dimension_semantics = [#tpu.dimension_semantics<parallel>], iteration_bounds = array<i64: 7>, scalar_prefetch = 0 : i64, scratch_operands = 0 : i64, tpu.core_type = #tpu.core_type<tc>, window_params = [{transform_indices = @transform_0, window_bounds = array<i64: 256, 75>}, {pipeline_mode = #tpu.pipeline_mode<synchronous>, transform_indices = @transform_1, window_bounds = array<i64: 75, 128>}, {pipeline_mode = #tpu.pipeline_mode<synchronous>, transform_indices = @transform_2, window_bounds = array<i64: 1, 128>}, {transform_indices = @transform_3, window_bounds = array<i64: 256, 128>}]} {
    %c0 = arith.constant 0 : index
    %c0_0 = arith.constant 0 : index
    %0 = vector.load %arg1[%c0, %c0_0] : memref<256x75xbf16, #tpu.memory_space<vmem>>, vector<256x75xbf16>
    %c0_1 = arith.constant 0 : index
    %c0_2 = arith.constant 0 : index
    %1 = vector.load %arg2[%c0_1, %c0_2] : memref<75x128xbf16, #tpu.memory_space<vmem>>, vector<75x128xbf16>
    %cst = arith.constant dense<0.000000e+00> : vector<256x128xf32>
    %2 = tpu.matmul %0, %1, %cst {dimension_numbers = #tpu.dot_dimension_numbers<[1], [0], [0], [1], [0, 0, 1, 1], [], []>} : vector<256x75xbf16>, vector<75x128xbf16>, vector<256x128xf32> -> vector<256x128xf32>
    %c0_3 = arith.constant 0 : index
    %c0_4 = arith.constant 0 : index
    %3 = vector.load %arg3[%c0_3, %c0_4] : memref<1x128xf32, #tpu.memory_space<vmem>>, vector<1x128xf32>
    %4 = vector.broadcast %3 : vector<1x128xf32> to vector<256x128xf32>
    %5 = arith.addf %2, %4 : vector<256x128xf32>
    %cst_5 = arith.constant 0.000000e+00 : f32
    %6 = vector.broadcast %cst_5 : f32 to vector<256x128xf32>
    %7 = arith.maximumf %5, %6 : vector<256x128xf32>
    %8 = arith.truncf %7 : vector<256x128xf32> to vector<256x128xbf16>
    %c0_6 = arith.constant 0 : index
    %c0_7 = arith.constant 0 : index
    %9 = vector.load %arg4[%c0_6, %c0_7] : memref<256x128xbf16, #tpu.memory_space<vmem>>, vector<256x128xbf16>
    tpu.vector_store %arg4[%c0_6, %c0_7], %8 {strides = array<i32>} : memref<256x128xbf16, #tpu.memory_space<vmem>>, vector<256x128xbf16>,
    return
  }
  func.func @transform_0(%arg0: i32) -> (i32, i32) {
    %c0_i32 = arith.constant 0 : i32
    %c0_i32_0 = arith.constant 0 : i32
    return %arg0, %c0_i32 : i32, i32
  }
  func.func @transform_1(%arg0: i32) -> (i32, i32) {
    %c0_i32 = arith.constant 0 : i32
    %c0_i32_0 = arith.constant 0 : i32
    %c0_i32_1 = arith.constant 0 : i32
    return %c0_i32, %c0_i32_0 : i32, i32
  }
  func.func @transform_2(%arg0: i32) -> (i32, i32) {
    %c0_i32 = arith.constant 0 : i32
    %c0_i32_0 = arith.constant 0 : i32
    %c0_i32_1 = arith.constant 0 : i32
    return %c0_i32, %c0_i32_0 : i32, i32
  }
  func.func @transform_3(%arg0: i32) -> (i32, i32) {
    %c0_i32 = arith.constant 0 : i32
    %c0_i32_0 = arith.constant 0 : i32
    return %arg0, %c0_i32 : i32, i32
  }
}

module attributes {stable_mosaic.version = 11 : i64} {
  func.func @_maxpool2x2_kernel(%arg0: i32, %arg1: memref<1x14x2x14x256xbf16, #tpu.memory_space<vmem>>, %arg2: memref<1x14x14x128xbf16, #tpu.memory_space<vmem>>) attributes {dimension_semantics = [#tpu.dimension_semantics<parallel>], iteration_bounds = array<i64: 2>, scalar_prefetch = 0 : i64, scratch_operands = 0 : i64, tpu.core_type = #tpu.core_type<tc>, window_params = [{transform_indices = @transform_0, window_bounds = array<i64: 1, 14, 2, 14, 256>}, {transform_indices = @transform_1, window_bounds = array<i64: 1, 14, 14, 128>}]} {
    %c0 = arith.constant 0 : index
    %c0_0 = arith.constant 0 : index
    %c0_1 = arith.constant 0 : index
    %c0_2 = arith.constant 0 : index
    %c0_3 = arith.constant 0 : index
    %0 = vector.load %arg1[%c0, %c0_0, %c0_1, %c0_2, %c0_3] : memref<1x14x2x14x256xbf16, #tpu.memory_space<vmem>>, vector<1x14x2x14x256xbf16>
    %1 = vector.extract_strided_slice %0 {offsets = [0, 0, 0, 0, 0], sizes = [1, 14, 1, 14, 256], strides = [1, 1, 1, 1, 1]} : vector<1x14x2x14x256xbf16> to vector<1x14x1x14x256xbf16>
    %2 = vector.shape_cast %1 : vector<1x14x1x14x256xbf16> to vector<1x14x14x256xbf16>
    %3 = vector.extract_strided_slice %0 {offsets = [0, 0, 1, 0, 0], sizes = [1, 14, 1, 14, 256], strides = [1, 1, 1, 1, 1]} : vector<1x14x2x14x256xbf16> to vector<1x14x1x14x256xbf16>
    %4 = vector.shape_cast %3 : vector<1x14x1x14x256xbf16> to vector<1x14x14x256xbf16>
    %5 = arith.maximumf %2, %4 : vector<1x14x14x256xbf16>
    %6 = vector.extract_strided_slice %5 {offsets = [0, 0, 0, 0], sizes = [1, 14, 14, 128], strides = [1, 1, 1, 1]} : vector<1x14x14x256xbf16> to vector<1x14x14x128xbf16>
    %7 = vector.extract_strided_slice %5 {offsets = [0, 0, 0, 128], sizes = [1, 14, 14, 128], strides = [1, 1, 1, 1]} : vector<1x14x14x256xbf16> to vector<1x14x14x128xbf16>
    %8 = arith.maximumf %6, %7 : vector<1x14x14x128xbf16>
    %c0_4 = arith.constant 0 : index
    %c0_5 = arith.constant 0 : index
    %c0_6 = arith.constant 0 : index
    %c0_7 = arith.constant 0 : index
    %9 = vector.load %arg2[%c0_4, %c0_5, %c0_6, %c0_7] : memref<1x14x14x128xbf16, #tpu.memory_space<vmem>>, vector<1x14x14x128xbf16>
    tpu.vector_store %arg2[%c0_4, %c0_5, %c0_6, %c0_7], %8 {strides = array<i32>} : memref<1x14x14x128xbf16, #tpu.memory_space<vmem>>, vector<1x14x14x128xbf16>,
    return
  }
  func.func @transform_0(%arg0: i32) -> (i32, i32, i32, i32, i32) {
    %c0_i32 = arith.constant 0 : i32
    %c0_i32_0 = arith.constant 0 : i32
    %c0_i32_1 = arith.constant 0 : i32
    %c0_i32_2 = arith.constant 0 : i32
    %c0_i32_3 = arith.constant 0 : i32
    return %arg0, %c0_i32, %c0_i32_0, %c0_i32_1, %c0_i32_2 : i32, i32, i32, i32, i32
  }
  func.func @transform_1(%arg0: i32) -> (i32, i32, i32, i32) {
    %c0_i32 = arith.constant 0 : i32
    %c0_i32_0 = arith.constant 0 : i32
    %c0_i32_1 = arith.constant 0 : i32
    %c0_i32_2 = arith.constant 0 : i32
    return %arg0, %c0_i32, %c0_i32_0, %c0_i32_1 : i32, i32, i32, i32
  }
}

module attributes {stable_mosaic.version = 11 : i64} {
  func.func @_matmul_bias_relu_kernel(%arg0: i32, %arg1: memref<200x1000xbf16, #tpu.memory_space<vmem>>, %arg2: memref<1000x128xbf16, #tpu.memory_space<vmem>>, %arg3: memref<1x128xf32, #tpu.memory_space<vmem>>, %arg4: memref<200x128xbf16, #tpu.memory_space<vmem>>) attributes {dimension_semantics = [#tpu.dimension_semantics<parallel>], iteration_bounds = array<i64: 1>, scalar_prefetch = 0 : i64, scratch_operands = 0 : i64, tpu.core_type = #tpu.core_type<tc>, window_params = [{transform_indices = @transform_0, window_bounds = array<i64: 200, 1000>}, {pipeline_mode = #tpu.pipeline_mode<synchronous>, transform_indices = @transform_1, window_bounds = array<i64: 1000, 128>}, {pipeline_mode = #tpu.pipeline_mode<synchronous>, transform_indices = @transform_2, window_bounds = array<i64: 1, 128>}, {transform_indices = @transform_3, window_bounds = array<i64: 200, 128>}]} {
    %c0 = arith.constant 0 : index
    %c0_0 = arith.constant 0 : index
    %0 = vector.load %arg1[%c0, %c0_0] : memref<200x1000xbf16, #tpu.memory_space<vmem>>, vector<200x1000xbf16>
    %c0_1 = arith.constant 0 : index
    %c0_2 = arith.constant 0 : index
    %1 = vector.load %arg2[%c0_1, %c0_2] : memref<1000x128xbf16, #tpu.memory_space<vmem>>, vector<1000x128xbf16>
    %cst = arith.constant dense<0.000000e+00> : vector<200x128xf32>
    %2 = tpu.matmul %0, %1, %cst {dimension_numbers = #tpu.dot_dimension_numbers<[1], [0], [0], [1], [0, 0, 1, 1], [], []>} : vector<200x1000xbf16>, vector<1000x128xbf16>, vector<200x128xf32> -> vector<200x128xf32>
    %c0_3 = arith.constant 0 : index
    %c0_4 = arith.constant 0 : index
    %3 = vector.load %arg3[%c0_3, %c0_4] : memref<1x128xf32, #tpu.memory_space<vmem>>, vector<1x128xf32>
    %4 = vector.broadcast %3 : vector<1x128xf32> to vector<200x128xf32>
    %5 = arith.addf %2, %4 : vector<200x128xf32>
    %cst_5 = arith.constant 0.000000e+00 : f32
    %6 = vector.broadcast %cst_5 : f32 to vector<200x128xf32>
    %7 = arith.maximumf %5, %6 : vector<200x128xf32>
    %8 = arith.truncf %7 : vector<200x128xf32> to vector<200x128xbf16>
    %c0_6 = arith.constant 0 : index
    %c0_7 = arith.constant 0 : index
    %9 = vector.load %arg4[%c0_6, %c0_7] : memref<200x128xbf16, #tpu.memory_space<vmem>>, vector<200x128xbf16>
    tpu.vector_store %arg4[%c0_6, %c0_7], %8 {strides = array<i32>} : memref<200x128xbf16, #tpu.memory_space<vmem>>, vector<200x128xbf16>,
    return
  }
  func.func @transform_0(%arg0: i32) -> (i32, i32) {
    %c0_i32 = arith.constant 0 : i32
    %c0_i32_0 = arith.constant 0 : i32
    return %arg0, %c0_i32 : i32, i32
  }
  func.func @transform_1(%arg0: i32) -> (i32, i32) {
    %c0_i32 = arith.constant 0 : i32
    %c0_i32_0 = arith.constant 0 : i32
    %c0_i32_1 = arith.constant 0 : i32
    return %c0_i32, %c0_i32_0 : i32, i32
  }
  func.func @transform_2(%arg0: i32) -> (i32, i32) {
    %c0_i32 = arith.constant 0 : i32
    %c0_i32_0 = arith.constant 0 : i32
    %c0_i32_1 = arith.constant 0 : i32
    return %c0_i32, %c0_i32_0 : i32, i32
  }
  func.func @transform_3(%arg0: i32) -> (i32, i32) {
    %c0_i32 = arith.constant 0 : i32
    %c0_i32_0 = arith.constant 0 : i32
    return %arg0, %c0_i32 : i32, i32
  }
}

module attributes {stable_mosaic.version = 11 : i64} {
  func.func @_maxpool2x2_kernel(%arg0: i32, %arg1: memref<1x5x2x5x256xbf16, #tpu.memory_space<vmem>>, %arg2: memref<1x5x5x128xbf16, #tpu.memory_space<vmem>>) attributes {dimension_semantics = [#tpu.dimension_semantics<parallel>], iteration_bounds = array<i64: 2>, scalar_prefetch = 0 : i64, scratch_operands = 0 : i64, tpu.core_type = #tpu.core_type<tc>, window_params = [{transform_indices = @transform_0, window_bounds = array<i64: 1, 5, 2, 5, 256>}, {transform_indices = @transform_1, window_bounds = array<i64: 1, 5, 5, 128>}]} {
    %c0 = arith.constant 0 : index
    %c0_0 = arith.constant 0 : index
    %c0_1 = arith.constant 0 : index
    %c0_2 = arith.constant 0 : index
    %c0_3 = arith.constant 0 : index
    %0 = vector.load %arg1[%c0, %c0_0, %c0_1, %c0_2, %c0_3] : memref<1x5x2x5x256xbf16, #tpu.memory_space<vmem>>, vector<1x5x2x5x256xbf16>
    %1 = vector.extract_strided_slice %0 {offsets = [0, 0, 0, 0, 0], sizes = [1, 5, 1, 5, 256], strides = [1, 1, 1, 1, 1]} : vector<1x5x2x5x256xbf16> to vector<1x5x1x5x256xbf16>
    %2 = vector.shape_cast %1 : vector<1x5x1x5x256xbf16> to vector<1x5x5x256xbf16>
    %3 = vector.extract_strided_slice %0 {offsets = [0, 0, 1, 0, 0], sizes = [1, 5, 1, 5, 256], strides = [1, 1, 1, 1, 1]} : vector<1x5x2x5x256xbf16> to vector<1x5x1x5x256xbf16>
    %4 = vector.shape_cast %3 : vector<1x5x1x5x256xbf16> to vector<1x5x5x256xbf16>
    %5 = arith.maximumf %2, %4 : vector<1x5x5x256xbf16>
    %6 = vector.extract_strided_slice %5 {offsets = [0, 0, 0, 0], sizes = [1, 5, 5, 128], strides = [1, 1, 1, 1]} : vector<1x5x5x256xbf16> to vector<1x5x5x128xbf16>
    %7 = vector.extract_strided_slice %5 {offsets = [0, 0, 0, 128], sizes = [1, 5, 5, 128], strides = [1, 1, 1, 1]} : vector<1x5x5x256xbf16> to vector<1x5x5x128xbf16>
    %8 = arith.maximumf %6, %7 : vector<1x5x5x128xbf16>
    %c0_4 = arith.constant 0 : index
    %c0_5 = arith.constant 0 : index
    %c0_6 = arith.constant 0 : index
    %c0_7 = arith.constant 0 : index
    %9 = vector.load %arg2[%c0_4, %c0_5, %c0_6, %c0_7] : memref<1x5x5x128xbf16, #tpu.memory_space<vmem>>, vector<1x5x5x128xbf16>
    tpu.vector_store %arg2[%c0_4, %c0_5, %c0_6, %c0_7], %8 {strides = array<i32>} : memref<1x5x5x128xbf16, #tpu.memory_space<vmem>>, vector<1x5x5x128xbf16>,
    return
  }
  func.func @transform_0(%arg0: i32) -> (i32, i32, i32, i32, i32) {
    %c0_i32 = arith.constant 0 : i32
    %c0_i32_0 = arith.constant 0 : i32
    %c0_i32_1 = arith.constant 0 : i32
    %c0_i32_2 = arith.constant 0 : i32
    %c0_i32_3 = arith.constant 0 : i32
    return %arg0, %c0_i32, %c0_i32_0, %c0_i32_1, %c0_i32_2 : i32, i32, i32, i32, i32
  }
  func.func @transform_1(%arg0: i32) -> (i32, i32, i32, i32) {
    %c0_i32 = arith.constant 0 : i32
    %c0_i32_0 = arith.constant 0 : i32
    %c0_i32_1 = arith.constant 0 : i32
    %c0_i32_2 = arith.constant 0 : i32
    return %arg0, %c0_i32, %c0_i32_0, %c0_i32_1 : i32, i32, i32, i32
  }
}

module attributes {stable_mosaic.version = 11 : i64} {
  func.func @_fc_head_kernel(%arg0: i32, %arg1: memref<2x1500xbf16, #tpu.memory_space<vmem>>, %arg2: memref<1500x512xbf16, #tpu.memory_space<vmem>>, %arg3: memref<1x512xf32, #tpu.memory_space<vmem>>, %arg4: memref<512x128xbf16, #tpu.memory_space<vmem>>, %arg5: memref<1x128xf32, #tpu.memory_space<vmem>>, %arg6: memref<2x128xf32, #tpu.memory_space<vmem>>) attributes {dimension_semantics = [#tpu.dimension_semantics<parallel>], iteration_bounds = array<i64: 1>, scalar_prefetch = 0 : i64, scratch_operands = 0 : i64, tpu.core_type = #tpu.core_type<tc>, window_params = [{transform_indices = @transform_0, window_bounds = array<i64: 2, 1500>}, {pipeline_mode = #tpu.pipeline_mode<synchronous>, transform_indices = @transform_1, window_bounds = array<i64: 1500, 512>}, {pipeline_mode = #tpu.pipeline_mode<synchronous>, transform_indices = @transform_2, window_bounds = array<i64: 1, 512>}, {pipeline_mode = #tpu.pipeline_mode<synchronous>, transform_indices = @transform_3, window_bounds = array<i64: 512, 128>}, {pipeline_mode = #tpu.pipeline_mode<synchronous>, transform_indices = @transform_4, window_bounds = array<i64: 1, 128>}, {transform_indices = @transform_5, window_bounds = array<i64: 2, 128>}]} {
    %c0 = arith.constant 0 : index
    %c0_0 = arith.constant 0 : index
    %0 = vector.load %arg1[%c0, %c0_0] : memref<2x1500xbf16, #tpu.memory_space<vmem>>, vector<2x1500xbf16>
    %c0_1 = arith.constant 0 : index
    %c0_2 = arith.constant 0 : index
    %1 = vector.load %arg2[%c0_1, %c0_2] : memref<1500x512xbf16, #tpu.memory_space<vmem>>, vector<1500x512xbf16>
    %cst = arith.constant dense<0.000000e+00> : vector<2x512xf32>
    %2 = tpu.matmul %0, %1, %cst {dimension_numbers = #tpu.dot_dimension_numbers<[1], [0], [0], [1], [0, 0, 1, 1], [], []>} : vector<2x1500xbf16>, vector<1500x512xbf16>, vector<2x512xf32> -> vector<2x512xf32>
    %c0_3 = arith.constant 0 : index
    %c0_4 = arith.constant 0 : index
    %3 = vector.load %arg3[%c0_3, %c0_4] : memref<1x512xf32, #tpu.memory_space<vmem>>, vector<1x512xf32>
    %4 = vector.broadcast %3 : vector<1x512xf32> to vector<2x512xf32>
    %5 = arith.addf %2, %4 : vector<2x512xf32>
    %cst_5 = arith.constant 0.000000e+00 : f32
    %6 = vector.broadcast %cst_5 : f32 to vector<2x512xf32>
    %7 = arith.maximumf %5, %6 : vector<2x512xf32>
    %8 = arith.truncf %7 : vector<2x512xf32> to vector<2x512xbf16>
    %c0_6 = arith.constant 0 : index
    %c0_7 = arith.constant 0 : index
    %9 = vector.load %arg4[%c0_6, %c0_7] : memref<512x128xbf16, #tpu.memory_space<vmem>>, vector<512x128xbf16>
    %cst_8 = arith.constant dense<0.000000e+00> : vector<2x128xf32>
    %10 = tpu.matmul %8, %9, %cst_8 {dimension_numbers = #tpu.dot_dimension_numbers<[1], [0], [0], [1], [0, 0, 1, 1], [], []>} : vector<2x512xbf16>, vector<512x128xbf16>, vector<2x128xf32> -> vector<2x128xf32>
    %c0_9 = arith.constant 0 : index
    %c0_10 = arith.constant 0 : index
    %11 = vector.load %arg5[%c0_9, %c0_10] : memref<1x128xf32, #tpu.memory_space<vmem>>, vector<1x128xf32>
    %12 = vector.broadcast %11 : vector<1x128xf32> to vector<2x128xf32>
    %13 = arith.addf %10, %12 : vector<2x128xf32>
    %14 = tpu.iota {dimensions = array<i32: 1>} : vector<2x128xi32>
    %c10_i32 = arith.constant 10 : i32
    %15 = vector.broadcast %c10_i32 : i32 to vector<2x128xi32>
    %16 = arith.cmpi slt, %14, %15 : vector<2x128xi32>
    %cst_11 = arith.constant -1.000000e+30 : f32
    %17 = vector.broadcast %cst_11 : f32 to vector<2x128xf32>
    %18 = arith.select %16, %13, %17 : vector<2x128xi1>, vector<2x128xf32>
    %cst_12 = arith.constant dense<0xFF800000> : vector<2xf32>
    %19 = vector.multi_reduction <maximumf>, %18, %cst_12 [1] : vector<2x128xf32> to vector<2xf32>
    %20 = vector.shape_cast %19 : vector<2xf32> to vector<2x1xf32>
    %21 = vector.broadcast %20 : vector<2x1xf32> to vector<2x128xf32>
    %22 = arith.subf %18, %21 : vector<2x128xf32>
    %23 = math.exp %22 : vector<2x128xf32>
    %cst_13 = arith.constant dense<0.000000e+00> : vector<2xf32>
    %24 = vector.multi_reduction <add>, %23, %cst_13 [1] : vector<2x128xf32> to vector<2xf32>
    %25 = vector.shape_cast %24 : vector<2xf32> to vector<2x1xf32>
    %26 = math.log %25 : vector<2x1xf32>
    %27 = arith.addf %26, %20 : vector<2x1xf32>
    %28 = vector.broadcast %27 : vector<2x1xf32> to vector<2x128xf32>
    %29 = arith.subf %18, %28 : vector<2x128xf32>
    %c0_14 = arith.constant 0 : index
    %c0_15 = arith.constant 0 : index
    %30 = vector.load %arg6[%c0_14, %c0_15] : memref<2x128xf32, #tpu.memory_space<vmem>>, vector<2x128xf32>
    tpu.vector_store %arg6[%c0_14, %c0_15], %29 {strides = array<i32>} : memref<2x128xf32, #tpu.memory_space<vmem>>, vector<2x128xf32>,
    return
  }
  func.func @transform_0(%arg0: i32) -> (i32, i32) {
    %c0_i32 = arith.constant 0 : i32
    %c0_i32_0 = arith.constant 0 : i32
    return %arg0, %c0_i32 : i32, i32
  }
  func.func @transform_1(%arg0: i32) -> (i32, i32) {
    %c0_i32 = arith.constant 0 : i32
    %c0_i32_0 = arith.constant 0 : i32
    %c0_i32_1 = arith.constant 0 : i32
    return %c0_i32, %c0_i32_0 : i32, i32
  }
  func.func @transform_2(%arg0: i32) -> (i32, i32) {
    %c0_i32 = arith.constant 0 : i32
    %c0_i32_0 = arith.constant 0 : i32
    %c0_i32_1 = arith.constant 0 : i32
    return %c0_i32, %c0_i32_0 : i32, i32
  }
  func.func @transform_3(%arg0: i32) -> (i32, i32) {
    %c0_i32 = arith.constant 0 : i32
    %c0_i32_0 = arith.constant 0 : i32
    %c0_i32_1 = arith.constant 0 : i32
    return %c0_i32, %c0_i32_0 : i32, i32
  }
  func.func @transform_4(%arg0: i32) -> (i32, i32) {
    %c0_i32 = arith.constant 0 : i32
    %c0_i32_0 = arith.constant 0 : i32
    %c0_i32_1 = arith.constant 0 : i32
    return %c0_i32, %c0_i32_0 : i32, i32
  }
  func.func @transform_5(%arg0: i32) -> (i32, i32) {
    %c0_i32 = arith.constant 0 : i32
    %c0_i32_0 = arith.constant 0 : i32
    return %arg0, %c0_i32 : i32, i32
  }
}

</mosaic_0001>

<bundles_post_ra>
// kernel: cnn_forward.5
= control target key start
LH: loop header
LB: loop body
LE: loop exit
PB: predicated region body
PF: predicated region fallthrough
CT: control target
= control target key end

     0   :  { %s1614_s12 = smov 0   ;;  %s1616_s13 = smov 0   ;;  %s1891_s0 = inlined_call_operand.vmem [shape: bf16[1568,75], index: 0, kind: input, shape index: {}]   ;;  %s1892_s1 = inlined_call_operand.vmem [shape: bf16[75,128], index: 1, kind: input, shape index: {}]   ;;  %s1893_s2 = inlined_call_operand.vmem [shape: f32[1,128], index: 2, kind: input, shape index: {}]   ;;  %s1894_s3 = inlined_call_operand.vmem [shape: bf16[1568,128], index: 3, kind: output, shape index: {}]  }
   0x1   :  { %s1618_s14 = smov 0  }
   0x2 LB: > { %s1627_s15 = sadd.s32 4294967295, %s1559_s14   ;;  %s1629_s16 = sadd.s32 1, %s1559_s14   ;;  %s1559_s14 = sphi %s1618_s14, %s1901_s14   ;;  %s1555_s13 = sphi %s1616_s13, %s1900_s13   ;;  %s1551_s12 = sphi %s1614_s12, %s1899_s12  }
   0x3   : > { %s85_s17 = ssub.s32 %s1559_s14, %s1629_s16  ;;  %s88_s18 = sadd.s32 1, %s1555_s13 }
   0x4   : > { %p86_p0 = scmp.eq.s32.totalorder %s85_s17, 0  ;;  %p98_p1 = scmp.ne.s32.totalorder %s1555_s13, %s1551_s12 }
   0x5   : > { %p99_p2 = scmp.eq.s32.totalorder %s1627_s15, 6  ;;  %p1101_p3 = scmp.ge.s32.totalorder %s1559_s14, 1 }
   0x6   : > { %s1637_s19 = scalar_select %p86_p0, %s1555_s13, %s88_s18  }
   0x7   : > { %p1639_p4 = por %p99_p2, %p98_p1  ;;  %p146_p5 = scmp.lt.s32.totalorder %s1559_s14, 8 }
   0x9   : > { %p147_p6 = pnand %p1101_p3, %p146_p5 }
   0xa   : > { %v1484_v0 = vld [vmem:[%s1892_s1] sm:$0xff] (!%p147_p6)   ;;  %v1485_v1 = vld [vmem:[%s1892_s1 + $0x8] sm:$0xff] (!%p147_p6)   ;;  %vm400_vm0 = vcmask (!%p147_p6), 1044480   ;;  %v1486_v2 = vld [vmem:[%s1892_s1 + $0x10] sm:$0xff] (!%p147_p6)   ;;  %s1653_s27 = sshll.u32 (!%p147_p6), %s1627_s15, 5  ;;  %vm401_vm1 = vcmask (!%p147_p6), 1045504  }
   0xb   : > { %150 = sbr.rel (%p147_p6) target bundleno = 347 (0x15b), region = 32  ;;  %1343 = vmatprep.subr.bf16.mxu0 (!%p147_p6), %v1484_v0  ;;  %1385 = vmatprep.subr.bf16.mxu1 (!%p147_p6), %v1484_v0  ;;  %v1593_v3 = vmov (!%p147_p6), 65535   ;;  %p178_p7 = scmp.lt.s32.totalorder (!%p147_p6), %s1653_s27, 195  ;;  %v1487_v5 = vld [vmem:[%s1892_s1 + $0x18] sm:$0xff] (!%p147_p6)   ;;  %v1488_v6 = vld [vmem:[%s1892_s1 + $0x20] sm:$0x3f] (!%p147_p6)  }
   0xc   : > { %1344 = vmatpush3.bf16.msra.mxu0 (!%p147_p6), %v1484_v0  ;;  %1390 = vmatpush3.bf16.msra.mxu1 (!%p147_p6), %v1484_v0  ;;  %v402_v4 = vsel (!%p147_p6), %vm400_vm0, 4294967295, %v1593_v3  ;;  %vm351_vm2 = vcmask (!%p147_p6), 613376   ;;  %v1703_v25 = vld [vmem:[%s1893_s2] ss:$0 sm:$0xff] (!%p147_p6)  ;;  %s170_s14 = sand.u32 (!%p147_p6), 1, %s1551_s12  }
   0xd   : > { %1345 = vmatprep.subr.bf16.mxu0 (!%p147_p6), %v1485_v1  ;;  %1386 = vmatprep.subr.bf16.mxu1 (!%p147_p6), %v1485_v1  ;;  %v403_v7 = vsel (!%p147_p6), %vm401_vm1, %v402_v4, 0  ;;  %s1102_s17 = sshll.u32 (!%p147_p6), %s170_s14, 7 }
   0xe   : > { %v405_v8 = vand.u32 (!%p147_p6), %v1488_v6, %v403_v7  ;;  %s1714_s12 = scalar_lea.vmem (!%p147_p6), [#allocation2], %s1102_s17  }
  0x10   : > { %1346 = vmatpush3.bf16.msra.mxu0 (!%p147_p6), %v1485_v1  ;;  %1391 = vmatpush3.bf16.msra.mxu1 (!%p147_p6), %v1485_v1 }
  0x11   : > { %1347 = vmatprep.subr.bf16.mxu0 (!%p147_p6), %v1486_v2  ;;  %1387 = vmatprep.subr.bf16.mxu1 (!%p147_p6), %v1486_v2 }
  0x12   : > { %s179_s5 = scalar_select %p178_p7, %s1653_s27, 195 }
  0x13   : > { %s768_s18 = ssub.s32 (%p1639_p4), 196, %s1653_s27  ;;  %s1224_s21 = sshll.u32 (%p1639_p4), %s1627_s15, 7 }
  0x14   : > { %s1104_s6 = sshll.u32 %s179_s5, 2  ;;  %1348 = vmatpush3.bf16.msra.mxu0 %v1486_v2  ;;  %1392 = vmatpush3.bf16.msra.mxu1 %v1486_v2  ;;  %p769_p8 = scmp.lt.s32.totalorder (%p1639_p4), %s768_s18, 32 }
  0x15   : > { %s1666_s9 = scalar_lea.vmem %s1891_s0, %s1104_s6  ;;  %1349 = vmatprep.subr.bf16.mxu0 %v1487_v5  ;;  %1388 = vmatprep.subr.bf16.mxu1 %v1487_v5  ;;  %s1763_s24 = scalar_lea.vmem (%p1639_p4), %s1894_s3, %s1224_s21  }
  0x16   : > { %v1489_v9 = vld [vmem:[%s1666_s9] sm:$0xff]   ;;  %v1491_v11 = vld [vmem:[%s1666_s9 + $0x8] sm:$0xff]   ;;  %v1493_v13 = vld [vmem:[%s1666_s9 + $0x10] sm:$0xff]  }
  0x17   : > { %v1490_v10 = vld [vmem:[%s1666_s9 + $0x40] sm:$0xff]   ;;  %1353 = vmatprep.mubr.msk.bf16.mxu0 %vm351_vm2, %v1489_v9  ;;  %v1492_v12 = vld [vmem:[%s1666_s9 + $0x48] sm:$0xff]   ;;  %v1494_v14 = vld [vmem:[%s1666_s9 + $0x50] sm:$0xff]  }
  0x18   : > { %1350 = vmatpush3.bf16.msra.mxu0 %v1487_v5  ;;  %1393 = vmatpush3.bf16.msra.mxu1 %v1487_v5  ;;  %v1495_v15 = vld [vmem:[%s1666_s9 + $0x18] sm:$0xff]   ;;  %v1497_v17 = vld [vmem:[%s1666_s9 + $0x20] sm:$0xff]   ;;  %v1499_v19 = vld [vmem:[%s1666_s9 + $0x28] sm:$0xff]  }
  0x19   : > { %1351 = vmatprep.subr.bf16.mxu0 %v405_v8  ;;  %1389 = vmatprep.subr.bf16.mxu1 %v405_v8  ;;  %v1496_v16 = vld [vmem:[%s1666_s9 + $0x58] sm:$0xff]   ;;  %v1498_v18 = vld [vmem:[%s1666_s9 + $0x60] sm:$0xff]   ;;  %v1500_v20 = vld [vmem:[%s1666_s9 + $0x68] sm:$0xff]  }
  0x1a   : > { %1369 = vmatprep.mubr.msk.bf16.mxu1 %vm351_vm2, %v1490_v10  ;;  %v1501_v21 = vld [vmem:[%s1666_s9 + $0x30] sm:$0xff]   ;;  %v1503_v23 = vld [vmem:[%s1666_s9 + $0x38] sm:$0xff]  }
  0x1b   : > { %v1502_v22 = vld [vmem:[%s1666_s9 + $0x70] sm:$0xff]   ;;  %v1504_v24 = vld [vmem:[%s1666_s9 + $0x78] sm:$0xff]  }
  0x1c   : > { %1352 = vmatpush3.bf16.msra.mxu0 %v405_v8  ;;  %1394 = vmatpush3.bf16.msra.mxu1 %v405_v8 }
  0x1f   : > { %1354 = vmatmul.mubr.msk.bf16.vlgmr.msra.gmra.mrb[0].mxu0 %vm351_vm2, %v1491_v11  ;;  %1370 = vmatmul.mubr.msk.bf16.vlgmr.msra.gmra.mrb[0].mxu1 %vm351_vm2, %v1492_v12 }
  0x20   : > { %1357 = vmatprep.mubr.msk.bf16.mxu0 %vm351_vm2, %v1493_v13  ;;  %1373 = vmatprep.mubr.msk.bf16.mxu1 %vm351_vm2, %v1494_v14 }
  0x27   : > { %1358 = vmatmul.mubr.msk.bf16.gmra.mrb[4].mxu0 %vm351_vm2, %v1495_v15  ;;  %1374 = vmatmul.mubr.msk.bf16.gmra.mrb[4].mxu1 %vm351_vm2, %v1496_v16 }
  0x28   : > { %1361 = vmatprep.mubr.msk.bf16.mxu0 %vm351_vm2, %v1497_v17  ;;  %1377 = vmatprep.mubr.msk.bf16.mxu1 %vm351_vm2, %v1498_v18 }
  0x2f   : > { %1362 = vmatmul.mubr.msk.bf16.gmra.mrb[8].mxu0 %vm351_vm2, %v1499_v19  ;;  %1378 = vmatmul.mubr.msk.bf16.gmra.mrb[8].mxu1 %vm351_vm2, %v1500_v20 }
  0x30   : > { %1365 = vmatprep.mubr.msk.bf16.mxu0 %vm351_vm2, %v1501_v21  ;;  %1381 = vmatprep.mubr.msk.bf16.mxu1 %vm351_vm2, %v1502_v22 }
  0x37   : > { %1366 = vmatmul.mubr.msk.bf16.gmra.mrb[12].mxu0 %vm351_vm2, %v1503_v23  ;;  %1382 = vmatmul.mubr.msk.bf16.gmra.mrb[12].mxu1 %vm351_vm2, %v1504_v24 }
  0xf2   : > { %v1355_v26 = vpop.f32.mrb[0].mxu0  ;;  %v1371_v27 = vpop.f32.mrb[0].mxu1 }
  0xf3   : > { %v450_v28 = vadd.f32 %v1355_v26, %v1703_v25  ;;  %v514_v29 = vadd.f32 %v1371_v27, %v1703_v25  ;;  %v441_v30 = vpop.f32.mrb[1].mxu0  ;;  %v505_v31 = vpop.f32.mrb[1].mxu1 }
  0xf4   : > { %v442_v32 = vadd.f32 %v1703_v25, %v441_v30  ;;  %v506_v33 = vadd.f32 %v1703_v25, %v505_v31  ;;  %v1356_v34 = vpop.f32.mrb[2].mxu0  ;;  %v1372_v35 = vpop.f32.mrb[2].mxu1 }
  0xf5   : > { %v453_v36 = vadd.f32 %v1356_v34, %v1703_v25  ;;  %v517_v37 = vadd.f32 %v1372_v35, %v1703_v25  ;;  %v444_v38 = vpop.f32.mrb[3].mxu0  ;;  %v508_v39 = vpop.f32.mrb[3].mxu1  ;;  %v570_v42 = vmax.f32 %v450_v28, 0.0  ;;  %v586_v43 = vmax.f32 %v514_v29, 0.0 }
  0xf6   : > { %v445_v40 = vadd.f32 %v1703_v25, %v444_v38  ;;  %v509_v41 = vadd.f32 %v1703_v25, %v508_v39  ;;  %v568_v46 = vmax.f32 %v442_v32, 0.0  ;;  %v584_v47 = vmax.f32 %v506_v33, 0.0 }
  0xf7   : > { %v571_v44 = vmax.f32 %v453_v36, 0.0  ;;  %v587_v45 = vmax.f32 %v517_v37, 0.0 }
  0xf8   : > { %v569_v48 = vmax.f32 %v445_v40, 0.0  ;;  %v585_v49 = vmax.f32 %v509_v41, 0.0 }
  0xf9   : > { %v1235_v50 = vpack.c.bf16 %v571_v44, %v570_v42  ;;  %v1275_v51 = vpack.c.bf16 %v587_v45, %v586_v43 }
  0xfa   : > { %v1230_v52 = vpack.c.bf16 %v569_v48, %v568_v46  ;;  %v1270_v53 = vpack.c.bf16 %v585_v49, %v584_v47  ;;  %v1359_v54 = vpop.f32.mrb[4].mxu0  ;;  %v1375_v55 = vpop.f32.mrb[4].mxu1 }
  0xfb   : > { %1307 = vst [vmem:[%s1714_s12 + $0x8] sm:$0xff] %v1235_v50   ;;  %1315 = vst [vmem:[%s1714_s12 + $0x48] sm:$0xff] %v1275_v51   ;;  %v466_v56 = vadd.f32 %v1359_v54, %v1703_v25  ;;  %v530_v57 = vadd.f32 %v1375_v55, %v1703_v25  ;;  %v457_v58 = vpop.f32.mrb[5].mxu0  ;;  %v521_v59 = vpop.f32.mrb[5].mxu1 }
  0xfc   : > { %1231 = vst [vmem:[%s1714_s12] sm:$0xff] %v1230_v52   ;;  %1314 = vst [vmem:[%s1714_s12 + $0x40] sm:$0xff] %v1270_v53   ;;  %v458_v60 = vadd.f32 %v1703_v25, %v457_v58  ;;  %v522_v61 = vadd.f32 %v1703_v25, %v521_v59  ;;  %v1360_v62 = vpop.f32.mrb[6].mxu0  ;;  %v1376_v63 = vpop.f32.mrb[6].mxu1 }
  0xfd   : > { %v469_v0 = vadd.f32 %v1360_v62, %v1703_v25  ;;  %v533_v1 = vadd.f32 %v1376_v63, %v1703_v25  ;;  %v460_v2 = vpop.f32.mrb[7].mxu0  ;;  %v524_v3 = vpop.f32.mrb[7].mxu1  ;;  %v574_v6 = vmax.f32 %v466_v56, 0.0  ;;  %v590_v7 = vmax.f32 %v530_v57, 0.0 }
  0xfe   : > { %v461_v4 = vadd.f32 %v1703_v25, %v460_v2  ;;  %v525_v5 = vadd.f32 %v1703_v25, %v524_v3  ;;  %v572_v10 = vmax.f32 %v458_v60, 0.0  ;;  %v588_v11 = vmax.f32 %v522_v61, 0.0 }
  0xff   : > { %v575_v8 = vmax.f32 %v469_v0, 0.0  ;;  %v591_v9 = vmax.f32 %v533_v1, 0.0 }
 0x100   : > { %v573_v12 = vmax.f32 %v461_v4, 0.0  ;;  %v589_v13 = vmax.f32 %v525_v5, 0.0 }
 0x101   : > { %v1245_v14 = vpack.c.bf16 %v575_v8, %v574_v6  ;;  %v1285_v15 = vpack.c.bf16 %v591_v9, %v590_v7 }
 0x102   : > { %v1240_v16 = vpack.c.bf16 %v573_v12, %v572_v10  ;;  %v1280_v17 = vpack.c.bf16 %v589_v13, %v588_v11  ;;  %v1363_v18 = vpop.f32.mrb[8].mxu0  ;;  %v1379_v19 = vpop.f32.mrb[8].mxu1 }
 0x103   : > { %1309 = vst [vmem:[%s1714_s12 + $0x18] sm:$0xff] %v1245_v14   ;;  %1317 = vst [vmem:[%s1714_s12 + $0x58] sm:$0xff] %v1285_v15   ;;  %v482_v20 = vadd.f32 %v1363_v18, %v1703_v25  ;;  %v546_v21 = vadd.f32 %v1379_v19, %v1703_v25  ;;  %v473_v22 = vpop.f32.mrb[9].mxu0  ;;  %v537_v23 = vpop.f32.mrb[9].mxu1 }
 0x104   : > { %1308 = vst [vmem:[%s1714_s12 + $0x10] sm:$0xff] %v1240_v16   ;;  %1316 = vst [vmem:[%s1714_s12 + $0x50] sm:$0xff] %v1280_v17   ;;  %v474_v24 = vadd.f32 %v1703_v25, %v473_v22  ;;  %v538_v26 = vadd.f32 %v1703_v25, %v537_v23  ;;  %v1364_v27 = vpop.f32.mrb[10].mxu0  ;;  %v1380_v28 = vpop.f32.mrb[10].mxu1 }
 0x105   : > { %v485_v29 = vadd.f32 %v1364_v27, %v1703_v25  ;;  %v549_v30 = vadd.f32 %v1380_v28, %v1703_v25  ;;  %v476_v31 = vpop.f32.mrb[11].mxu0  ;;  %v540_v32 = vpop.f32.mrb[11].mxu1  ;;  %v578_v35 = vmax.f32 %v482_v20, 0.0  ;;  %v594_v36 = vmax.f32 %v546_v21, 0.0 }
 0x106   : > { %v477_v33 = vadd.f32 %v1703_v25, %v476_v31  ;;  %v541_v34 = vadd.f32 %v1703_v25, %v540_v32  ;;  %v576_v39 = vmax.f32 %v474_v24, 0.0  ;;  %v592_v40 = vmax.f32 %v538_v26, 0.0 }
 0x107   : > { %v579_v37 = vmax.f32 %v485_v29, 0.0  ;;  %v595_v38 = vmax.f32 %v549_v30, 0.0 }
 0x108   : > { %v577_v41 = vmax.f32 %v477_v33, 0.0  ;;  %v593_v42 = vmax.f32 %v541_v34, 0.0 }
 0x109   : > { %v1255_v43 = vpack.c.bf16 %v579_v37, %v578_v35  ;;  %v1295_v44 = vpack.c.bf16 %v595_v38, %v594_v36 }
 0x10a   : > { %v1250_v45 = vpack.c.bf16 %v577_v41, %v576_v39  ;;  %v1290_v46 = vpack.c.bf16 %v593_v42, %v592_v40  ;;  %v1367_v47 = vpop.f32.mrb[12].mxu0  ;;  %v1383_v48 = vpop.f32.mrb[12].mxu1 }
 0x10b   : > { %1311 = vst [vmem:[%s1714_s12 + $0x28] sm:$0xff] %v1255_v43   ;;  %1319 = vst [vmem:[%s1714_s12 + $0x68] sm:$0xff] %v1295_v44   ;;  %v498_v49 = vadd.f32 %v1367_v47, %v1703_v25  ;;  %v562_v50 = vadd.f32 %v1383_v48, %v1703_v25  ;;  %v489_v51 = vpop.f32.mrb[13].mxu0  ;;  %v553_v52 = vpop.f32.mrb[13].mxu1 }
 0x10c   : > { %1310 = vst [vmem:[%s1714_s12 + $0x20] sm:$0xff] %v1250_v45   ;;  %1318 = vst [vmem:[%s1714_s12 + $0x60] sm:$0xff] %v1290_v46   ;;  %v490_v53 = vadd.f32 %v1703_v25, %v489_v51  ;;  %v554_v54 = vadd.f32 %v1703_v25, %v553_v52  ;;  %v1368_v55 = vpop.f32.mrb[14].mxu0  ;;  %v1384_v56 = vpop.f32.mrb[14].mxu1 }
 0x10d   : > { %v501_v57 = vadd.f32 %v1368_v55, %v1703_v25  ;;  %v565_v58 = vadd.f32 %v1384_v56, %v1703_v25  ;;  %v492_v59 = vpop.f32.mrb[15].mxu0  ;;  %v556_v60 = vpop.f32.mrb[15].mxu1  ;;  %v582_v63 = vmax.f32 %v498_v49, 0.0  ;;  %v598_v0 = vmax.f32 %v562_v50, 0.0 }
 0x10e   : > { %v493_v61 = vadd.f32 %v1703_v25, %v492_v59  ;;  %v557_v62 = vadd.f32 %v1703_v25, %v556_v60  ;;  %v580_v3 = vmax.f32 %v490_v53, 0.0  ;;  %v596_v4 = vmax.f32 %v554_v54, 0.0  ;;  %766 = sbr.rel (!%p1639_p4) target bundleno = 347 (0x15b), region = 36 }
 0x10f   : > { %v583_v1 = vmax.f32 %v501_v57, 0.0  ;;  %v599_v2 = vmax.f32 %v565_v58, 0.0 }
 0x110   : > { %v581_v5 = vmax.f32 %v493_v61, 0.0  ;;  %v597_v6 = vmax.f32 %v557_v62, 0.0 }
 0x111   : > { %v1265_v7 = vpack.c.bf16 %v583_v1, %v582_v63  ;;  %v1305_v8 = vpack.c.bf16 %v599_v2, %v598_v0 }
 0x112   : > { %v1260_v9 = vpack.c.bf16 %v581_v5, %v580_v3  ;;  %v1300_v10 = vpack.c.bf16 %v597_v6, %v596_v4 }
 0x113   : > { %1313 = vst [vmem:[%s1714_s12 + $0x38] sm:$0xff] %v1265_v7   ;;  %1321 = vst [vmem:[%s1714_s12 + $0x78] sm:$0xff] %v1305_v8  }
 0x114   : > { %1312 = vst [vmem:[%s1714_s12 + $0x30] sm:$0xff] %v1260_v9   ;;  %1320 = vst [vmem:[%s1714_s12 + $0x70] sm:$0xff] %v1300_v10  }
 0x115   : > { %s1903_s18 = smov (!%p769_p8, %s768_s18), 32 }
 0x116   : > { %s1177_s25 = sshll.u32 %s1903_s18, 6 }
 0x117   : > { %p1180_p9 = scmp.eq.s32.totalorder %s1177_s25, 0 }
 0x118   : > { %s1769_s26 = sshrl.u32 (!%p1180_p9), %s1903_s18, 5 }
 0x119   : > { %777 = sbr.rel (%p1180_p9) target bundleno = 347 (0x15b), region = 40  ;;  %p1181_p10 = scmp.le.s32.totalorder (!%p1180_p9), %s1769_s26, 0 }
 0x120   : > { %1054 = sbr.rel (%p1181_p10) target bundleno = 326 (0x146), region = 112  ;;  %s1896_s15 = smov (!%p1181_p10), %s1763_s24 }
 0x121   : > { %s1897_s20 = smov (!%p1181_p10), %s1714_s12  ;;  %s1778_s27 = smov (!%p1181_p10), 0  }
 0x122   : > { %s1780_s28 = smov (!%p1181_p10), 0  }
 0x127 LB: >> { %v793_v25 = vld [vmem:[%s1567_s20] sm:$0xf]  ;;  %v795_v11 = vld [vmem:[%s1567_s20 + $0x4] sm:$0xf]  ;;  %v797_v12 = vld [vmem:[%s1567_s20 + $0x8] sm:$0xf]  ;;  %s1575_s28 = sphi %s1780_s28, %s787_s28   ;;  %s1571_s27 = sphi %s1778_s27, %s1898_s27   ;;  %s1567_s20 = sphi %s1897_s20, %s862_s20   ;;  %s1563_s15 = sphi %s1896_s15, %s863_s15  }
 0x128   : >> { %794 = vst [vmem:[%s1563_s15] sm:$0xf] %v793_v25  ;;  %796 = vst [vmem:[%s1563_s15 + $0x4] sm:$0xf] %v795_v11  ;;  %v799_v13 = vld [vmem:[%s1567_s20 + $0xc] sm:$0xf]  ;;  %s857_s29 = sadd.s32 1, %s1571_s27 }
 0x129   : >> { %798 = vst [vmem:[%s1563_s15 + $0x8] sm:$0xf] %v797_v12  ;;  %v801_v14 = vld [vmem:[%s1567_s20 + $0x10] sm:$0xf]  ;;  %v803_v15 = vld [vmem:[%s1567_s20 + $0x14] sm:$0xf]  ;;  %p858_p11 = scmp.ge.s32.totalorder %s857_s29, %s1769_s26 }
 0x12a   : >> { %800 = vst [vmem:[%s1563_s15 + $0xc] sm:$0xf] %v799_v13  ;;  %802 = vst [vmem:[%s1563_s15 + $0x10] sm:$0xf] %v801_v14  ;;  %v805_v16 = vld [vmem:[%s1567_s20 + $0x18] sm:$0xf] }
 0x12b   : >> { %804 = vst [vmem:[%s1563_s15 + $0x14] sm:$0xf] %v803_v15  ;;  %v807_v17 = vld [vmem:[%s1567_s20 + $0x1c] sm:$0xf]  ;;  %v809_v18 = vld [vmem:[%s1567_s20 + $0x20] sm:$0xf] }
 0x12c   : >> { %806 = vst [vmem:[%s1563_s15 + $0x18] sm:$0xf] %v805_v16  ;;  %808 = vst [vmem:[%s1563_s15 + $0x1c] sm:$0xf] %v807_v17  ;;  %v811_v19 = vld [vmem:[%s1567_s20 + $0x24] sm:$0xf] }
 0x12d   : >> { %810 = vst [vmem:[%s1563_s15 + $0x20] sm:$0xf] %v809_v18  ;;  %v813_v20 = vld [vmem:[%s1567_s20 + $0x28] sm:$0xf]  ;;  %v815_v21 = vld [vmem:[%s1567_s20 + $0x2c] sm:$0xf] }
 0x12e   : >> { %812 = vst [vmem:[%s1563_s15 + $0x24] sm:$0xf] %v811_v19  ;;  %814 = vst [vmem:[%s1563_s15 + $0x28] sm:$0xf] %v813_v20  ;;  %v817_v22 = vld [vmem:[%s1567_s20 + $0x30] sm:$0xf] }
 0x12f   : >> { %816 = vst [vmem:[%s1563_s15 + $0x2c] sm:$0xf] %v815_v21  ;;  %v819_v23 = vld [vmem:[%s1567_s20 + $0x34] sm:$0xf]  ;;  %v821_v24 = vld [vmem:[%s1567_s20 + $0x38] sm:$0xf] }
 0x130   : >> { %818 = vst [vmem:[%s1563_s15 + $0x30] sm:$0xf] %v817_v22  ;;  %820 = vst [vmem:[%s1563_s15 + $0x34] sm:$0xf] %v819_v23  ;;  %v823_v26 = vld [vmem:[%s1567_s20 + $0x3c] sm:$0xf] }
 0x131   : >> { %822 = vst [vmem:[%s1563_s15 + $0x38] sm:$0xf] %v821_v24  ;;  %v825_v27 = vld [vmem:[%s1567_s20 + $0x40] sm:$0xf]  ;;  %v827_v28 = vld [vmem:[%s1567_s20 + $0x44] sm:$0xf] }
 0x132   : >> { %824 = vst [vmem:[%s1563_s15 + $0x3c] sm:$0xf] %v823_v26  ;;  %826 = vst [vmem:[%s1563_s15 + $0x40] sm:$0xf] %v825_v27  ;;  %v829_v29 = vld [vmem:[%s1567_s20 + $0x48] sm:$0xf] }
 0x133   : >> { %828 = vst [vmem:[%s1563_s15 + $0x44] sm:$0xf] %v827_v28  ;;  %v831_v30 = vld [vmem:[%s1567_s20 + $0x4c] sm:$0xf]  ;;  %v833_v31 = vld [vmem:[%s1567_s20 + $0x50] sm:$0xf] }
 0x134   : >> { %830 = vst [vmem:[%s1563_s15 + $0x48] sm:$0xf] %v829_v29  ;;  %832 = vst [vmem:[%s1563_s15 + $0x4c] sm:$0xf] %v831_v30  ;;  %v835_v32 = vld [vmem:[%s1567_s20 + $0x54] sm:$0xf] }
 0x135   : >> { %834 = vst [vmem:[%s1563_s15 + $0x50] sm:$0xf] %v833_v31  ;;  %v837_v33 = vld [vmem:[%s1567_s20 + $0x58] sm:$0xf]  ;;  %v839_v34 = vld [vmem:[%s1567_s20 + $0x5c] sm:$0xf] }
 0x136   : >> { %836 = vst [vmem:[%s1563_s15 + $0x54] sm:$0xf] %v835_v32  ;;  %838 = vst [vmem:[%s1563_s15 + $0x58] sm:$0xf] %v837_v33  ;;  %v841_v35 = vld [vmem:[%s1567_s20 + $0x60] sm:$0xf] }
 0x137   : >> { %840 = vst [vmem:[%s1563_s15 + $0x5c] sm:$0xf] %v839_v34  ;;  %v843_v36 = vld [vmem:[%s1567_s20 + $0x64] sm:$0xf]  ;;  %v845_v37 = vld [vmem:[%s1567_s20 + $0x68] sm:$0xf] }
 0x138   : >> { %842 = vst [vmem:[%s1563_s15 + $0x60] sm:$0xf] %v841_v35  ;;  %844 = vst [vmem:[%s1563_s15 + $0x64] sm:$0xf] %v843_v36  ;;  %v847_v38 = vld [vmem:[%s1567_s20 + $0x6c] sm:$0xf] }
 0x139   : >> { %846 = vst [vmem:[%s1563_s15 + $0x68] sm:$0xf] %v845_v37  ;;  %v849_v39 = vld [vmem:[%s1567_s20 + $0x70] sm:$0xf]  ;;  %v851_v40 = vld [vmem:[%s1567_s20 + $0x74] sm:$0xf] }
 0x13a   : >> { %848 = vst [vmem:[%s1563_s15 + $0x6c] sm:$0xf] %v847_v38  ;;  %850 = vst [vmem:[%s1563_s15 + $0x70] sm:$0xf] %v849_v39  ;;  %v853_v41 = vld [vmem:[%s1567_s20 + $0x78] sm:$0xf] }
 0x13b   : >> { %852 = vst [vmem:[%s1563_s15 + $0x74] sm:$0xf] %v851_v40  ;;  %v855_v42 = vld [vmem:[%s1567_s20 + $0x7c] sm:$0xf]  ;;  %854 = vst [vmem:[%s1563_s15 + $0x78] sm:$0xf] %v853_v41 }
 0x13c   : >> { %856 = vst [vmem:[%s1563_s15 + $0x7c] sm:$0xf] %v855_v42  ;;  %s1905_s29 = smov (%p858_p11, %s857_s29), 0  ;;  %s787_s28 = sadd.s32 1, %s1575_s28  }
 0x13d   : >> { %s1182_s30 = sshll.u32 %s1905_s29, 7  ;;  %p786_p12 = scmp.ge.s32.totalorder %s787_s28, %s1769_s26 }
 0x13e   : >> { %s862_s20 = scalar_lea.vmem %s1714_s12, %s1182_s30 [#allocation2]   ;;  %s863_s15 = scalar_lea.vmem %s1763_s24, %s1182_s30  }
 0x13f   : >> { %s1898_s27 = smov %s1905_s29  ;;  %789 = sbr.rel (!%p786_p12) target bundleno = 295 (0x127), region = 118 }
 0x146 PF: > { %s1873_s4 = sand.u32 31, %s1903_s18   ;;  %s1225_s5 = sshll.u32 %s1769_s26, 7 }
 0x147   : > { %s868_s6 = scalar_lea.vmem %s1714_s12, %s1225_s5 [#allocation2]   ;;  %s870_s7 = scalar_lea.vmem %s1763_s24, %s1225_s5  }
 0x148   : > { %p1187_p13 = scmp.le.s32.totalorder %s1873_s4, 0 }
 0x149   : > { %s1577_s8 = smov (!%p1187_p13), %s870_s7   ;;  %s1581_s9 = smov (!%p1187_p13), %s868_s6  }
 0x14a   : > { %1068 = sbr.rel (%p1187_p13) target bundleno = 347 (0x15b), region = 123  ;;  %s1585_s10 = smov (!%p1187_p13), 0  }
 0x14b   : > { %s1589_s11 = smov (!%p1187_p13), 0  }
 0x151 LB: >> { %v880_v43 = vld [vmem:[%s1583_s9] sm:$0xf]  ;;  %s882_s14 = sadd.s32 1, %s1587_s10  ;;  %s874_s11 = sadd.s32 1, %s1591_s11   ;;  %s1591_s11 = sphi %s1589_s11, %s874_s11   ;;  %s1587_s10 = sphi %s1585_s10, %s1586_s10   ;;  %s1583_s9 = sphi %s1581_s9, %s887_s9   ;;  %s1579_s8 = sphi %s1577_s8, %s888_s8  }
 0x152   : >> { %881 = vst [vmem:[%s1579_s8] sm:$0xf] %v880_v43  ;;  %p883_p0 = scmp.ge.s32.totalorder %s882_s14, %s1873_s4  ;;  %p873_p1 = scmp.ge.s32.totalorder %s874_s11, %s1873_s4 }
 0x154   : >> { %s1907_s14 = smov (%p883_p0, %s882_s14), 0  ;;  %876 = sbr.rel (!%p873_p1) target bundleno = 337 (0x151), region = 129 }
 0x155   : >> { %s1188_s17 = sshll.u32 %s1907_s14, 2  ;;  %s1586_s10 = smov %s1907_s14  }
 0x156   : >> { %s887_s9 = scalar_lea.vmem %s868_s6, %s1188_s17 [#allocation2]   ;;  %s888_s8 = scalar_lea.vmem %s870_s7, %s1188_s17  }
 0x15b PF: > { %p10_p2 = scmp.ge.s32.totalorder %s1629_s16, 9   ;;  %s1899_s12 = smov %s1555_s13 }
 0x15c   : > { %s1900_s13 = smov %s1637_s19  ;;  %s1901_s14 = smov %s1629_s16 }
 0x15d   :  { %12 = sbr.rel (!%p10_p2) target bundleno = 2 (0x2), region = 140 }

// kernel: cnn_forward.6
= control target key start
LH: loop header
LB: loop body
LE: loop exit
PB: predicated region body
PF: predicated region fallthrough
CT: control target
= control target key end

     0   :  { %s433_s6 = smov 0   ;;  %s538_s0 = inlined_call_operand.vmem [shape: bf16[2,14,2,14,256], index: 0, kind: input, shape index: {}]   ;;  %s539_s1 = inlined_call_operand.vmem [shape: bf16[2,14,14,128], index: 1, kind: output, shape index: {}]  }
   0x1 LB: > { %s396_s7 = sadd.s32 4294967295, %s421_s6   ;;  %p400_p0 = scmp.ge.s32.totalorder %s421_s6, 1  ;;  %s421_s6 = sphi %s433_s6, %s11_s6  }
   0x2   : > { %p87_p1 = scmp.lt.s32.totalorder %s421_s6, 3 }
   0x4   : > { %p88_p2 = pnand %p400_p0, %p87_p1 }
   0x5   : > { %p107_p3 = scmp.lt.s32.totalorder (!%p88_p2), %s396_s7, 1 }
   0x6   : > { %91 = sbr.rel (%p88_p2) target bundleno = 49 (0x31), region = 24 }
   0xd   : > { %s541_s7 = smov (!%p107_p3, %s396_s7), 1 }
   0xe   : > { %s405_s8 = smul.u32 448, %s541_s7 }
   0xf   : > { %s406_s12 = smul.u32 112, %s541_s7 }
  0x10   : > { %s444_s11 = scalar_lea.vmem %s538_s0, %s405_s8 }
  0x11   : > { %v117_v0 = vld [vmem:[%s444_s11] sm:$0xff]  ;;  %v119_v1 = vld [vmem:[%s444_s11 + $0x10] sm:$0xff]  ;;  %v118_v2 = vld [vmem:[%s444_s11 + $0x8] sm:$0x77]  ;;  %s461_s15 = scalar_lea.vmem %s539_s1, %s406_s12 }
  0x12   : > { %v173_v3 = vmax.bf16 %v119_v1, %v117_v0  ;;  %v120_v4 = vld [vmem:[%s444_s11 + $0x18] sm:$0x77]  ;;  %v121_v5 = vld [vmem:[%s444_s11 + $0x20] sm:$0xff]  ;;  %v123_v6 = vld [vmem:[%s444_s11 + $0x30] sm:$0xff] }
  0x13   : > { %v174_v7 = vmax.bf16 %v120_v4, %v118_v2  ;;  %v175_v8 = vmax.bf16 %v123_v6, %v121_v5  ;;  %v122_v9 = vld [vmem:[%s444_s11 + $0x28] sm:$0x77]  ;;  %v124_v10 = vld [vmem:[%s444_s11 + $0x38] sm:$0x77]  ;;  %v125_v11 = vld [vmem:[%s444_s11 + $0x40] sm:$0xff] }
  0x14   : > { %v229_v12 = vrot.slane %v173_v3, 4  ;;  %v176_v13 = vmax.bf16 %v124_v10, %v122_v9  ;;  %v127_v14 = vld [vmem:[%s444_s11 + $0x50] sm:$0xff]  ;;  %v126_v15 = vld [vmem:[%s444_s11 + $0x48] sm:$0x77]  ;;  %v128_v16 = vld [vmem:[%s444_s11 + $0x58] sm:$0x77] }
  0x15   : > { %v230_v17 = vrot.slane %v174_v7, 4  ;;  %v231_v18 = vrot.slane %v175_v8, 4  ;;  %v177_v19 = vmax.bf16 %v127_v14, %v125_v11  ;;  %v178_v20 = vmax.bf16 %v128_v16, %v126_v15  ;;  %v129_v21 = vld [vmem:[%s444_s11 + $0x60] sm:$0xff]  ;;  %v131_v22 = vld [vmem:[%s444_s11 + $0x70] sm:$0xff]  ;;  %v130_v23 = vld [vmem:[%s444_s11 + $0x68] sm:$0x77] }
  0x16   : > { %v285_v24 = vmax.bf16 %v229_v12, %v173_v3  ;;  %v232_v25 = vrot.slane %v176_v13, 4  ;;  %v179_v26 = vmax.bf16 %v131_v22, %v129_v21  ;;  %v132_v27 = vld [vmem:[%s444_s11 + $0x78] sm:$0x77]  ;;  %v133_v28 = vld [vmem:[%s444_s11 + $0x80] sm:$0xff]  ;;  %v135_v29 = vld [vmem:[%s444_s11 + $0x90] sm:$0xff] }
  0x17   : > { %v286_v30 = vmax.bf16 %v230_v17, %v174_v7  ;;  %v287_v31 = vmax.bf16 %v231_v18, %v175_v8  ;;  %v233_v32 = vrot.slane %v177_v19, 4  ;;  %v234_v33 = vrot.slane %v178_v20, 4  ;;  %v134_v34 = vld [vmem:[%s444_s11 + $0x88] sm:$0x77]  ;;  %v136_v35 = vld [vmem:[%s444_s11 + $0x98] sm:$0x77] }
  0x18   : > { %313 = vst [vmem:[%s461_s15] sm:$0xf] %v285_v24  ;;  %v288_v36 = vmax.bf16 %v232_v25, %v176_v13  ;;  %v235_v37 = vrot.slane %v179_v26, 4  ;;  %v180_v38 = vmax.bf16 %v132_v27, %v130_v23  ;;  %v181_v39 = vmax.bf16 %v135_v29, %v133_v28  ;;  %v137_v40 = vld [vmem:[%s444_s11 + $0xa0] sm:$0xff]  ;;  %v139_v41 = vld [vmem:[%s444_s11 + $0xb0] sm:$0xff]  ;;  %v138_v42 = vld [vmem:[%s444_s11 + $0xa8] sm:$0x77] }
  0x19   : > { %314 = vst [vmem:[%s461_s15 + $0x4] sm:$0x7] %v286_v30  ;;  %315 = vst [vmem:[%s461_s15 + $0x8] sm:$0xf] %v287_v31  ;;  %v289_v43 = vmax.bf16 %v233_v32, %v177_v19  ;;  %v290_v44 = vmax.bf16 %v234_v33, %v178_v20  ;;  %v182_v45 = vmax.bf16 %v136_v35, %v134_v34  ;;  %v140_v47 = vld [vmem:[%s444_s11 + $0xb8] sm:$0x77] }
  0x1a   : > { %v183_v46 = vmax.bf16 %v139_v41, %v137_v40  ;;  %v141_v48 = vld [vmem:[%s444_s11 + $0xc0] sm:$0xff]  ;;  %v143_v49 = vld [vmem:[%s444_s11 + $0xd0] sm:$0xff]  ;;  %316 = vst [vmem:[%s461_s15 + $0xc] sm:$0x7] %v288_v36  ;;  %v291_v50 = vmax.bf16 %v235_v37, %v179_v26  ;;  %v236_v51 = vrot.slane %v180_v38, 4  ;;  %v237_v52 = vrot.slane %v181_v39, 4 }
  0x1b   : > { %v184_v53 = vmax.bf16 %v140_v47, %v138_v42  ;;  %v142_v54 = vld [vmem:[%s444_s11 + $0xc8] sm:$0x77]  ;;  %v144_v55 = vld [vmem:[%s444_s11 + $0xd8] sm:$0x77]  ;;  %317 = vst [vmem:[%s461_s15 + $0x10] sm:$0xf] %v289_v43  ;;  %v185_v58 = vmax.bf16 %v143_v49, %v141_v48 }
  0x1c   : > { %318 = vst [vmem:[%s461_s15 + $0x14] sm:$0x7] %v290_v44  ;;  %v238_v56 = vrot.slane %v182_v45, 4  ;;  %v239_v57 = vrot.slane %v183_v46, 4  ;;  %v186_v59 = vmax.bf16 %v144_v55, %v142_v54  ;;  %v145_v60 = vld [vmem:[%s444_s11 + $0xe0] sm:$0xff]  ;;  %v147_v61 = vld [vmem:[%s444_s11 + $0xf0] sm:$0xff]  ;;  %v292_v63 = vmax.bf16 %v236_v51, %v180_v38 }
  0x1d   : > { %v146_v62 = vld [vmem:[%s444_s11 + $0xe8] sm:$0x77]  ;;  %319 = vst [vmem:[%s461_s15 + $0x18] sm:$0xf] %v291_v50  ;;  %v293_v0 = vmax.bf16 %v237_v52, %v181_v39  ;;  %v240_v1 = vrot.slane %v184_v53, 4  ;;  %v187_v2 = vmax.bf16 %v147_v61, %v145_v60  ;;  %v149_v4 = vld [vmem:[%s444_s11 + $0x100] sm:$0xff] }
  0x1e   : > { %v148_v3 = vld [vmem:[%s444_s11 + $0xf8] sm:$0x77]  ;;  %v151_v5 = vld [vmem:[%s444_s11 + $0x110] sm:$0xff]  ;;  %v294_v6 = vmax.bf16 %v238_v56, %v182_v45  ;;  %v295_v7 = vmax.bf16 %v239_v57, %v183_v46  ;;  %v241_v8 = vrot.slane %v185_v58, 4  ;;  %v242_v9 = vrot.slane %v186_v59, 4  ;;  %v153_v16 = vld [vmem:[%s444_s11 + $0x120] sm:$0xff] }
  0x1f   : > { %v150_v10 = vld [vmem:[%s444_s11 + $0x108] sm:$0x77]  ;;  %v152_v11 = vld [vmem:[%s444_s11 + $0x118] sm:$0x77]  ;;  %320 = vst [vmem:[%s461_s15 + $0x1c] sm:$0x7] %v292_v63  ;;  %v296_v12 = vmax.bf16 %v240_v1, %v184_v53  ;;  %v188_v14 = vmax.bf16 %v148_v3, %v146_v62  ;;  %v189_v15 = vmax.bf16 %v151_v5, %v149_v4 }
  0x20   : > { %321 = vst [vmem:[%s461_s15 + $0x20] sm:$0xf] %v293_v0  ;;  %v243_v13 = vrot.slane %v187_v2, 4  ;;  %v155_v17 = vld [vmem:[%s444_s11 + $0x130] sm:$0xff]  ;;  %v154_v18 = vld [vmem:[%s444_s11 + $0x128] sm:$0x77]  ;;  %v297_v19 = vmax.bf16 %v241_v8, %v185_v58  ;;  %v298_v20 = vmax.bf16 %v242_v9, %v186_v59  ;;  %v190_v21 = vmax.bf16 %v152_v11, %v150_v10 }
  0x21   : > { %322 = vst [vmem:[%s461_s15 + $0x24] sm:$0x7] %v294_v6  ;;  %323 = vst [vmem:[%s461_s15 + $0x28] sm:$0xf] %v295_v7  ;;  %v191_v22 = vmax.bf16 %v155_v17, %v153_v16  ;;  %v156_v23 = vld [vmem:[%s444_s11 + $0x138] sm:$0x77] }
  0x22   : > { %v157_v24 = vld [vmem:[%s444_s11 + $0x140] sm:$0xff]  ;;  %v159_v25 = vld [vmem:[%s444_s11 + $0x150] sm:$0xff]  ;;  %324 = vst [vmem:[%s461_s15 + $0x2c] sm:$0x7] %v296_v12  ;;  %v299_v26 = vmax.bf16 %v243_v13, %v187_v2  ;;  %v244_v27 = vrot.slane %v188_v14, 4  ;;  %v245_v28 = vrot.slane %v189_v15, 4  ;;  %v192_v29 = vmax.bf16 %v156_v23, %v154_v18 }
  0x23   : > { %v158_v30 = vld [vmem:[%s444_s11 + $0x148] sm:$0x77]  ;;  %v160_v31 = vld [vmem:[%s444_s11 + $0x158] sm:$0x77]  ;;  %325 = vst [vmem:[%s461_s15 + $0x30] sm:$0xf] %v297_v19  ;;  %v193_v34 = vmax.bf16 %v159_v25, %v157_v24 }
  0x24   : > { %326 = vst [vmem:[%s461_s15 + $0x34] sm:$0x7] %v298_v20  ;;  %v246_v32 = vrot.slane %v190_v21, 4  ;;  %v247_v33 = vrot.slane %v191_v22, 4  ;;  %v194_v35 = vmax.bf16 %v160_v31, %v158_v30  ;;  %v161_v36 = vld [vmem:[%s444_s11 + $0x160] sm:$0xff]  ;;  %v163_v37 = vld [vmem:[%s444_s11 + $0x170] sm:$0xff]  ;;  %v300_v39 = vmax.bf16 %v244_v27, %v188_v14 }
  0x25   : > { %v162_v38 = vld [vmem:[%s444_s11 + $0x168] sm:$0x77]  ;;  %327 = vst [vmem:[%s461_s15 + $0x38] sm:$0xf] %v299_v26  ;;  %v301_v40 = vmax.bf16 %v245_v28, %v189_v15  ;;  %v248_v41 = vrot.slane %v192_v29, 4  ;;  %v195_v42 = vmax.bf16 %v163_v37, %v161_v36  ;;  %v165_v44 = vld [vmem:[%s444_s11 + $0x180] sm:$0xff] }
  0x26   : > { %v164_v43 = vld [vmem:[%s444_s11 + $0x178] sm:$0x77]  ;;  %v167_v45 = vld [vmem:[%s444_s11 + $0x190] sm:$0xff]  ;;  %v302_v46 = vmax.bf16 %v246_v32, %v190_v21  ;;  %v303_v47 = vmax.bf16 %v247_v33, %v191_v22  ;;  %v249_v48 = vrot.slane %v193_v34, 4  ;;  %v250_v49 = vrot.slane %v194_v35, 4  ;;  %v169_v56 = vld [vmem:[%s444_s11 + $0x1a0] sm:$0xff] }
  0x27   : > { %v166_v50 = vld [vmem:[%s444_s11 + $0x188] sm:$0x77]  ;;  %v168_v51 = vld [vmem:[%s444_s11 + $0x198] sm:$0x77]  ;;  %328 = vst [vmem:[%s461_s15 + $0x3c] sm:$0x7] %v300_v39  ;;  %v304_v52 = vmax.bf16 %v248_v41, %v192_v29  ;;  %v196_v54 = vmax.bf16 %v164_v43, %v162_v38  ;;  %v197_v55 = vmax.bf16 %v167_v45, %v165_v44 }
  0x28   : > { %329 = vst [vmem:[%s461_s15 + $0x40] sm:$0xf] %v301_v40  ;;  %v251_v53 = vrot.slane %v195_v42, 4  ;;  %v171_v57 = vld [vmem:[%s444_s11 + $0x1b0] sm:$0xff]  ;;  %v170_v58 = vld [vmem:[%s444_s11 + $0x1a8] sm:$0x77]  ;;  %v305_v59 = vmax.bf16 %v249_v48, %v193_v34  ;;  %v306_v60 = vmax.bf16 %v250_v49, %v194_v35  ;;  %v198_v61 = vmax.bf16 %v168_v51, %v166_v50 }
  0x29   : > { %330 = vst [vmem:[%s461_s15 + $0x44] sm:$0x7] %v302_v46  ;;  %331 = vst [vmem:[%s461_s15 + $0x48] sm:$0xf] %v303_v47  ;;  %v199_v62 = vmax.bf16 %v171_v57, %v169_v56  ;;  %v172_v63 = vld [vmem:[%s444_s11 + $0x1b8] sm:$0x77] }
  0x2a   : > { %332 = vst [vmem:[%s461_s15 + $0x4c] sm:$0x7] %v304_v52  ;;  %v307_v0 = vmax.bf16 %v251_v53, %v195_v42  ;;  %v252_v1 = vrot.slane %v196_v54, 4  ;;  %v253_v2 = vrot.slane %v197_v55, 4  ;;  %v200_v3 = vmax.bf16 %v172_v63, %v170_v58  ;;  %333 = vst [vmem:[%s461_s15 + $0x50] sm:$0xf] %v305_v59 }
  0x2b   : > { %334 = vst [vmem:[%s461_s15 + $0x54] sm:$0x7] %v306_v60  ;;  %v254_v4 = vrot.slane %v198_v61, 4  ;;  %v255_v5 = vrot.slane %v199_v62, 4 }
  0x2c   : > { %335 = vst [vmem:[%s461_s15 + $0x58] sm:$0xf] %v307_v0  ;;  %v308_v6 = vmax.bf16 %v252_v1, %v196_v54  ;;  %v309_v7 = vmax.bf16 %v253_v2, %v197_v55  ;;  %v256_v8 = vrot.slane %v200_v3, 4 }
  0x2d   : > { %v310_v9 = vmax.bf16 %v254_v4, %v198_v61  ;;  %v311_v10 = vmax.bf16 %v255_v5, %v199_v62 }
  0x2e   : > { %336 = vst [vmem:[%s461_s15 + $0x5c] sm:$0x7] %v308_v6  ;;  %337 = vst [vmem:[%s461_s15 + $0x60] sm:$0xf] %v309_v7  ;;  %v312_v11 = vmax.bf16 %v256_v8, %v200_v3 }
  0x2f   : > { %338 = vst [vmem:[%s461_s15 + $0x64] sm:$0x7] %v310_v9  ;;  %339 = vst [vmem:[%s461_s15 + $0x68] sm:$0xf] %v311_v10 }
  0x30   : > { %340 = vst [vmem:[%s461_s15 + $0x6c] sm:$0x7] %v312_v11 }
  0x31 PF: > { %s11_s6 = sadd.s32 1, %s421_s6  }
  0x32   : > { %p8_p4 = scmp.ge.s32.totalorder %s11_s6, 4  }
  0x34   :  { %10 = sbr.rel (!%p8_p4) target bundleno = 1 (0x1), region = 54 }

// kernel: cnn_forward.7
= control target key start
LH: loop header
LB: loop body
LE: loop exit
PB: predicated region body
PF: predicated region fallthrough
CT: control target
= control target key end

     0   :  { %v2516_v42 = vmov 0   ;;  %vm1157_vm0 = vcmask 1043456   ;;  %vm1117_vm1 = vcmask 850944   ;;  %s3198_s1 = inlined_call_operand.vmem [shape: bf16[1000,128], index: 1, kind: input, shape index: {}]   ;;  %s3199_s0 = inlined_call_operand.vmem [shape: bf16[200,1000], index: 0, kind: input, shape index: {}]   ;;  %s3200_s2 = inlined_call_operand.vmem [shape: f32[1,128], index: 2, kind: input, shape index: {}]   ;;  %s3201_s3 = inlined_call_operand.vmem [shape: bf16[200,128], index: 3, kind: output, shape index: {}]  }
   0x1   :  { %v2445_v0 = vld [vmem:[%s3198_s1 + $0x40] sm:$0xff]   ;;  %v2449_v4 = vld [vmem:[%s3198_s1 + $0x48] sm:$0xff]   ;;  %v2453_v8 = vld [vmem:[%s3198_s1 + $0x50] sm:$0xff]  }
   0x2   :  { %v2446_v1 = vld [vmem:[%s3198_s1] sm:$0xff]   ;;  %2162 = vmatprep.subr.bf16.mxu0 %v2445_v0  ;;  %v2450_v5 = vld [vmem:[%s3198_s1 + $0x8] sm:$0xff]   ;;  %v2454_v9 = vld [vmem:[%s3198_s1 + $0x10] sm:$0xff]  }
   0x3   :  { %v2447_v2 = vld [vmem:[%s3198_s1 + $0xc0] sm:$0xff]   ;;  %2163 = vmatpush3.bf16.msra.mxu0 %v2446_v1  ;;  %v2451_v6 = vld [vmem:[%s3198_s1 + $0xc8] sm:$0xff]   ;;  %v2455_v10 = vld [vmem:[%s3198_s1 + $0xd0] sm:$0xff]  }
   0x4   :  { %v2448_v3 = vld [vmem:[%s3198_s1 + $0x80] sm:$0xff]   ;;  %2256 = vmatprep.subr.bf16.mxu1 %v2447_v2  ;;  %2164 = vmatprep.subr.bf16.mxu0 %v2449_v4  ;;  %v2452_v7 = vld [vmem:[%s3198_s1 + $0x88] sm:$0xff]   ;;  %v2456_v11 = vld [vmem:[%s3198_s1 + $0x90] sm:$0xff]  }
   0x5   :  { %2257 = vmatpush3.bf16.msra.mxu1 %v2448_v3  ;;  %v2457_v12 = vld [vmem:[%s3198_s1 + $0x58] sm:$0xff]   ;;  %v2461_v16 = vld [vmem:[%s3198_s1 + $0x60] sm:$0xff]   ;;  %v2465_v20 = vld [vmem:[%s3198_s1 + $0x68] sm:$0xff]  }
   0x6   :  { %2258 = vmatprep.subr.bf16.mxu1 %v2451_v6  ;;  %v2458_v13 = vld [vmem:[%s3198_s1 + $0x18] sm:$0xff]   ;;  %v2462_v17 = vld [vmem:[%s3198_s1 + $0x20] sm:$0xff]   ;;  %v2466_v21 = vld [vmem:[%s3198_s1 + $0x28] sm:$0xff]  }
   0x7   :  { %2165 = vmatpush3.bf16.msra.mxu0 %v2450_v5  ;;  %v2459_v14 = vld [vmem:[%s3198_s1 + $0xd8] sm:$0xff]   ;;  %v2463_v18 = vld [vmem:[%s3198_s1 + $0xe0] sm:$0xff]   ;;  %v2467_v22 = vld [vmem:[%s3198_s1 + $0xe8] sm:$0xff]  }
   0x8   :  { %2166 = vmatprep.subr.bf16.mxu0 %v2453_v8  ;;  %v2460_v15 = vld [vmem:[%s3198_s1 + $0x98] sm:$0xff]   ;;  %v2464_v19 = vld [vmem:[%s3198_s1 + $0xa0] sm:$0xff]   ;;  %v2468_v23 = vld [vmem:[%s3198_s1 + $0xa8] sm:$0xff]  }
   0x9   :  { %2259 = vmatpush3.bf16.msra.mxu1 %v2452_v7  ;;  %v2469_v24 = vld [vmem:[%s3198_s1 + $0x70] sm:$0xff]   ;;  %v2473_v28 = vld [vmem:[%s3198_s1 + $0x78] sm:$0xff]   ;;  %v15_v31 = vld [vmem:[%s3199_s0] sm:$0xff] }
   0xa   :  { %2260 = vmatprep.subr.bf16.mxu1 %v2455_v10  ;;  %v2470_v25 = vld [vmem:[%s3198_s1 + $0x30] sm:$0xff]   ;;  %v2474_v29 = vld [vmem:[%s3198_s1 + $0x38] sm:$0xff]   ;;  %v19_v32 = vld [vmem:[%s3199_s0 + $0x20] sm:$0xff] }
   0xb   :  { %2167 = vmatpush3.bf16.msra.mxu0 %v2454_v9  ;;  %v2471_v26 = vld [vmem:[%s3198_s1 + $0xf0] sm:$0xff]   ;;  %v2475_v30 = vld [vmem:[%s3198_s1 + $0xf8] sm:$0xff]   ;;  %v1861_v33 = vcombine.low %v15_v31, %v19_v32  ;;  %v1862_v34 = vcombine.high %v15_v31, %v19_v32  ;;  %v2477_v36 = vld [vmem:[%s3198_s1 + $0x140] sm:$0xff]  }
   0xc   :  { %2168 = vmatprep.subr.bf16.mxu0 %v2457_v12  ;;  %v2472_v27 = vld [vmem:[%s3198_s1 + $0xb0] sm:$0xff]   ;;  %v2476_v35 = vld [vmem:[%s3198_s1 + $0xb8] sm:$0xff]   ;;  %v16_v37 = vld [vmem:[%s3199_s0 + $0x8] sm:$0xff] }
   0xd   :  { %2261 = vmatpush3.bf16.msra.mxu1 %v2456_v11  ;;  %1193 = vmatprep.mubr.bf16.mxu0 %v1862_v34  ;;  %v20_v38 = vld [vmem:[%s3199_s0 + $0x28] sm:$0xff]  ;;  %v2478_v41 = vld [vmem:[%s3198_s1 + $0x100] sm:$0xff]   ;;  %v2483_v61 = vld [vmem:[%s3198_s1 + $0x190] sm:$0xff]  }
   0xe   :  { %2262 = vmatprep.subr.bf16.mxu1 %v2459_v14  ;;  %v1863_v39 = vcombine.low %v16_v37, %v20_v38  ;;  %v1864_v40 = vcombine.high %v16_v37, %v20_v38  ;;  %v2479_v43 = vld [vmem:[%s3198_s1 + $0x180] sm:$0xff]   ;;  %v24_v47 = vld [vmem:[%s3199_s0 + $0x48] sm:$0xff]  ;;  %v2484_v0 = vld [vmem:[%s3198_s1 + $0x150] sm:$0xff]  }
   0xf   :  { %2169 = vmatpush3.bf16.msra.mxu0 %v2458_v13  ;;  %v23_v44 = vld [vmem:[%s3199_s0 + $0x40] sm:$0xff]  ;;  %v28_v48 = vld [vmem:[%s3199_s0 + $0x68] sm:$0xff]  ;;  %v2485_v1 = vld [vmem:[%s3198_s1 + $0x110] sm:$0xff]  }
  0x10   :  { %2170 = vmatprep.subr.bf16.mxu0 %v2461_v16  ;;  %v27_v45 = vld [vmem:[%s3199_s0 + $0x60] sm:$0xff]  ;;  %1329 = vmatprep.mubr.bf16.mxu1 %v1864_v40  ;;  %v1872_v49 = vcombine.high %v24_v47, %v28_v48  ;;  %v2480_v50 = vld [vmem:[%s3198_s1 + $0x148] sm:$0xff]   ;;  %v1871_v58 = vcombine.low %v24_v47, %v28_v48  ;;  %v2486_v3 = vld [vmem:[%s3198_s1 + $0x198] sm:$0xff]  }
  0x11   :  { %2263 = vmatpush3.bf16.msra.mxu1 %v2460_v15  ;;  %v1870_v46 = vcombine.high %v23_v44, %v27_v45  ;;  %v1869_v51 = vcombine.low %v23_v44, %v27_v45  ;;  %v2481_v52 = vld [vmem:[%s3198_s1 + $0x188] sm:$0xff]   ;;  %v31_v54 = vld [vmem:[%s3199_s0 + $0x80] sm:$0xff]  ;;  %v2488_v10 = vld [vmem:[%s3198_s1 + $0x158] sm:$0xff]  }
  0x12   :  { %2264 = vmatprep.subr.bf16.mxu1 %v2463_v18  ;;  %v2482_v53 = vld [vmem:[%s3198_s1 + $0x108] sm:$0xff]   ;;  %v35_v55 = vld [vmem:[%s3199_s0 + $0xa0] sm:$0xff]  ;;  %v2489_v12 = vld [vmem:[%s3198_s1 + $0x118] sm:$0xff]  }
  0x13   :  { %2171 = vmatpush3.bf16.msra.mxu0 %v2462_v17  ;;  %v32_v56 = vld [vmem:[%s3199_s0 + $0x88] sm:$0xff]  ;;  %v1878_v59 = vcombine.high %v31_v54, %v35_v55  ;;  %v39_v62 = vld [vmem:[%s3199_s0 + $0xc0] sm:$0xff]  ;;  %v1877_v2 = vcombine.low %v31_v54, %v35_v55  ;;  %v2500_v38 = vld [vmem:[%s3198_s1 + $0x170] sm:$0xff]  }
  0x14   :  { %2172 = vmatprep.subr.bf16.mxu0 %v2465_v20  ;;  %v36_v57 = vld [vmem:[%s3199_s0 + $0xa8] sm:$0xff]  ;;  %v43_v63 = vld [vmem:[%s3199_s0 + $0xe0] sm:$0xff]  ;;  %v2499_v47 = vld [vmem:[%s3198_s1 + $0x1d0] sm:$0xff]  }
  0x15   :  { %2265 = vmatpush3.bf16.msra.mxu1 %v2464_v19  ;;  %v1880_v60 = vcombine.high %v32_v56, %v36_v57  ;;  %v1886_v4 = vcombine.high %v39_v62, %v43_v63  ;;  %v40_v5 = vld [vmem:[%s3199_s0 + $0xc8] sm:$0xff]  ;;  %v1879_v7 = vcombine.low %v32_v56, %v36_v57  ;;  %v2487_v8 = vld [vmem:[%s3198_s1 + $0x1a0] sm:$0xff]   ;;  %v1885_v14 = vcombine.low %v39_v62, %v43_v63  ;;  %v2502_v54 = vld [vmem:[%s3198_s1 + $0x1d8] sm:$0xff]  }
  0x16   :  { %2266 = vmatprep.subr.bf16.mxu1 %v2467_v22  ;;  %v44_v6 = vld [vmem:[%s3199_s0 + $0xe8] sm:$0xff]  ;;  %v47_v11 = vld [vmem:[%s3199_s0 + $0x100] sm:$0xff] }
  0x17   :  { %2173 = vmatpush3.bf16.msra.mxu0 %v2466_v21  ;;  %v1888_v9 = vcombine.high %v40_v5, %v44_v6  ;;  %v51_v13 = vld [vmem:[%s3199_s0 + $0x120] sm:$0xff]  ;;  %v48_v15 = vld [vmem:[%s3199_s0 + $0x108] sm:$0xff]  ;;  %v1887_v20 = vcombine.low %v40_v5, %v44_v6 }
  0x18   :  { %2174 = vmatprep.subr.bf16.mxu0 %v2469_v24  ;;  %v2490_v16 = vld [vmem:[%s3198_s1 + $0x1a8] sm:$0xff]   ;;  %v1894_v17 = vcombine.high %v47_v11, %v51_v13  ;;  %v2492_v19 = vld [vmem:[%s3198_s1 + $0x160] sm:$0xff]  }
  0x19   :  { %2267 = vmatpush3.bf16.msra.mxu1 %v2468_v23  ;;  %v52_v18 = vld [vmem:[%s3199_s0 + $0x128] sm:$0xff]  ;;  %v2493_v21 = vld [vmem:[%s3198_s1 + $0x120] sm:$0xff]   ;;  %v2491_v23 = vld [vmem:[%s3198_s1 + $0x1b0] sm:$0xff]  }
  0x1a   :  { %2268 = vmatprep.subr.bf16.mxu1 %v2471_v26  ;;  %v1896_v22 = vcombine.high %v48_v15, %v52_v18  ;;  %v55_v24 = vld [vmem:[%s3199_s0 + $0x140] sm:$0xff]  ;;  %v56_v26 = vld [vmem:[%s3199_s0 + $0x148] sm:$0xff] }
  0x1b   :  { %2175 = vmatpush3.bf16.msra.mxu0 %v2470_v25  ;;  %v59_v25 = vld [vmem:[%s3199_s0 + $0x160] sm:$0xff]  ;;  %v2497_v32 = vld [vmem:[%s3198_s1 + $0x128] sm:$0xff]  }
  0x1c   :  { %2176 = vmatprep.subr.bf16.mxu0 %v2473_v28  ;;  %v2494_v28 = vld [vmem:[%s3198_s1 + $0x1b8] sm:$0xff]   ;;  %v1902_v31 = vcombine.high %v55_v24, %v59_v25  ;;  %v67_v37 = vld [vmem:[%s3199_s0 + $0x1a0] sm:$0xff]  ;;  %v1901_v40 = vcombine.low %v55_v24, %v59_v25  ;;  %v64_v44 = vld [vmem:[%s3199_s0 + $0x188] sm:$0xff] }
  0x1d   :  { %2269 = vmatpush3.bf16.msra.mxu1 %v2472_v27  ;;  %v60_v27 = vld [vmem:[%s3199_s0 + $0x168] sm:$0xff]  ;;  %v83_v62 = vld [vmem:[%s3199_s0 + $0x220] sm:$0xff] }
  0x1e   :  { %2270 = vmatprep.subr.bf16.mxu1 %v2475_v30  ;;  %v2496_v30 = vld [vmem:[%s3198_s1 + $0x168] sm:$0xff]   ;;  %v1904_v34 = vcombine.high %v56_v26, %v60_v27  ;;  %v107_v24 = vld [vmem:[%s3199_s0 + $0x2e0] sm:$0xff] }
  0x1f   :  { %2177 = vmatpush3.bf16.msra.mxu0 %v2474_v29  ;;  %v1893_v29 = vcombine.low %v47_v11, %v51_v13  ;;  %v68_v45 = vld [vmem:[%s3199_s0 + $0x1a8] sm:$0xff] }
  0x20   :  { %2350 = vmatprep.subr.bf16.mxu0 %v2477_v36  ;;  %v63_v36 = vld [vmem:[%s3199_s0 + $0x180] sm:$0xff]  ;;  %v1912_v48 = vcombine.high %v64_v44, %v68_v45  ;;  %v72_v56 = vld [vmem:[%s3199_s0 + $0x1c8] sm:$0xff] }
  0x21   :  { %2271 = vmatpush3.bf16.msra.mxu1 %v2476_v35  ;;  %v2495_v35 = vld [vmem:[%s3198_s1 + $0x1c0] sm:$0xff]   ;;  %v76_v57 = vld [vmem:[%s3199_s0 + $0x1e8] sm:$0xff] }
  0x22   :  { %1194 = vmatmul.mubr.bf16.vlgmr.msra.gmra.mrb[0].mxu0 %v1861_v33  ;;  %1569 = vmatprep.subr.bf16.mxu1 %v2516_v42  ;;  %v1895_v33 = vcombine.low %v48_v15, %v52_v18  ;;  %v1919_v5 = vcombine.low %v72_v56, %v76_v57  ;;  %v95_v15 = vld [vmem:[%s3199_s0 + $0x280] sm:$0xff] }
  0x23   :  { %2351 = vmatpush3.bf16.msra.mxu0 %v2478_v41  ;;  %1201 = vmatprep.mubr.bf16.mxu0 %v1870_v46  ;;  %v2498_v41 = vld [vmem:[%s3198_s1 + $0x1c8] sm:$0xff]   ;;  %v1903_v46 = vcombine.low %v56_v26, %v60_v27 }
  0x24   :  { %1330 = vmatmul.mubr.bf16.vlgmr.msra.gmra.mrb[0].mxu1 %v1863_v39  ;;  %2352 = vmatprep.subr.bf16.mxu0 %v2480_v50  ;;  %v2501_v39 = vld [vmem:[%s3198_s1 + $0x130] sm:$0xff]   ;;  %v2505_v50 = vld [vmem:[%s3198_s1 + $0x138] sm:$0xff]   ;;  %v104_v27 = vld [vmem:[%s3199_s0 + $0x2c8] sm:$0xff] }
  0x25   :  { %1570 = vmatpush1.bf16.msra.mxu1 %v2479_v43  ;;  %1337 = vmatprep.mubr.bf16.mxu1 %v1872_v49  ;;  %v1910_v43 = vcombine.high %v63_v36, %v67_v37  ;;  %v2504_v49 = vld [vmem:[%s3198_s1 + $0x178] sm:$0xff]  }
  0x26   :  { %1571 = vmatprep.subr.bf16.mxu1 %v2516_v42 }
  0x27   :  { %2353 = vmatpush3.bf16.msra.mxu0 %v2482_v53  ;;  %v1909_v53 = vcombine.low %v63_v36, %v67_v37  ;;  %v17_v37 = vld [vmem:[%s3199_s0 + $0x10] sm:$0xff] }
  0x28   :  { %2354 = vmatprep.subr.bf16.mxu0 %v2484_v0  ;;  %v2509_v0 = vld [vmem:[%s3198_s1 + $0x1e8] sm:$0xff]  }
  0x29   :  { %1572 = vmatpush1.bf16.msra.mxu1 %v2481_v52  ;;  %v75_v52 = vld [vmem:[%s3199_s0 + $0x1e0] sm:$0xff] }
  0x2a   :  { %1202 = vmatmul.mubr.bf16.gmra.mrb[4].mxu0 %v1869_v51  ;;  %1573 = vmatprep.subr.bf16.mxu1 %v2516_v42  ;;  %v71_v51 = vld [vmem:[%s3199_s0 + $0x1c0] sm:$0xff] }
  0x2b   :  { %1209 = vmatprep.mubr.bf16.mxu0 %v1878_v59  ;;  %2355 = vmatpush3.bf16.msra.mxu0 %v2485_v1  ;;  %v1918_v55 = vcombine.high %v71_v51, %v75_v52  ;;  %v1920_v59 = vcombine.high %v72_v56, %v76_v57  ;;  %v1917_v63 = vcombine.low %v71_v51, %v75_v52  ;;  %v30_v51 = vld [vmem:[%s3199_s0 + $0x78] sm:$0xff] }
  0x2c   :  { %1338 = vmatmul.mubr.bf16.gmra.mrb[4].mxu1 %v1871_v58  ;;  %2356 = vmatprep.subr.bf16.mxu0 %v2488_v10  ;;  %v1911_v58 = vcombine.low %v64_v44, %v68_v45 }
  0x2d   :  { %1345 = vmatprep.mubr.bf16.mxu1 %v1880_v60  ;;  %1574 = vmatpush1.bf16.msra.mxu1 %v2483_v61  ;;  %v2503_v60 = vld [vmem:[%s3198_s1 + $0x1e0] sm:$0xff]  }
  0x2e   :  { %1575 = vmatprep.subr.bf16.mxu1 %v2516_v42  ;;  %v79_v61 = vld [vmem:[%s3199_s0 + $0x200] sm:$0xff] }
  0x2f   :  { %2357 = vmatpush3.bf16.msra.mxu0 %v2489_v12  ;;  %v1926_v1 = vcombine.high %v79_v61, %v83_v62  ;;  %v1925_v10 = vcombine.low %v79_v61, %v83_v62  ;;  %v88_v12 = vld [vmem:[%s3199_s0 + $0x248] sm:$0xff]  ;;  %v41_v62 = vld [vmem:[%s3199_s0 + $0xd0] sm:$0xff] }
  0x30   :  { %2358 = vmatprep.subr.bf16.mxu0 %v2492_v19  ;;  %v96_v19 = vld [vmem:[%s3199_s0 + $0x288] sm:$0xff] }
  0x31   :  { %1576 = vmatpush1.bf16.msra.mxu1 %v2486_v3  ;;  %v84_v3 = vld [vmem:[%s3199_s0 + $0x228] sm:$0xff] }
  0x32   :  { %1210 = vmatmul.mubr.bf16.gmra.mrb[8].mxu0 %v1877_v2  ;;  %1577 = vmatprep.subr.bf16.mxu1 %v2516_v42  ;;  %v80_v2 = vld [vmem:[%s3199_s0 + $0x208] sm:$0xff] }
  0x33   :  { %1217 = vmatprep.mubr.bf16.mxu0 %v1886_v4  ;;  %2359 = vmatpush3.bf16.msra.mxu0 %v2493_v21  ;;  %v2511_v4 = vld [vmem:[%s3198_s1 + $0x1f0] ss:$0 sps:$4 sm:$0xff]   ;;  %v1928_v6 = vcombine.high %v80_v2, %v84_v3  ;;  %v1927_v13 = vcombine.low %v80_v2, %v84_v3  ;;  %v42_v2 = vld [vmem:[%s3199_s0 + $0xd8] sm:$0xff] }
  0x34   :  { %1346 = vmatmul.mubr.bf16.gmra.mrb[8].mxu1 %v1879_v7  ;;  %2360 = vmatprep.subr.bf16.mxu0 %v2496_v30  ;;  %v1159_v7 = vsel %vm1157_vm0, %v2511_v4, 0  ;;  %v46_v3 = vld [vmem:[%s3199_s0 + $0xf8] sm:$0xff] }
  0x35   :  { %1353 = vmatprep.mubr.bf16.mxu1 %v1888_v9  ;;  %1578 = vmatpush1.bf16.msra.mxu1 %v2487_v8  ;;  %v87_v8 = vld [vmem:[%s3199_s0 + $0x240] sm:$0xff] }
  0x36   :  { %1579 = vmatprep.subr.bf16.mxu1 %v2516_v42  ;;  %v91_v9 = vld [vmem:[%s3199_s0 + $0x260] sm:$0xff] }
  0x37   :  { %2361 = vmatpush3.bf16.msra.mxu0 %v2497_v32  ;;  %v1934_v11 = vcombine.high %v87_v8, %v91_v9 }
  0x38   :  { %2362 = vmatprep.subr.bf16.mxu0 %v2500_v38  ;;  %v21_v38 = vld [vmem:[%s3199_s0 + $0x30] sm:$0xff] }
  0x39   :  { %1580 = vmatpush1.bf16.msra.mxu1 %v2490_v16  ;;  %v99_v16 = vld [vmem:[%s3199_s0 + $0x2a0] sm:$0xff] }
  0x3a   :  { %1218 = vmatmul.mubr.bf16.gmra.mrb[12].mxu0 %v1885_v14  ;;  %1581 = vmatprep.subr.bf16.mxu1 %v2516_v42  ;;  %v1942_v18 = vcombine.high %v95_v15, %v99_v16  ;;  %v1941_v25 = vcombine.low %v95_v15, %v99_v16 }
  0x3b   :  { %1225 = vmatprep.mubr.bf16.mxu0 %v1894_v17  ;;  %2363 = vmatpush3.bf16.msra.mxu0 %v2501_v39  ;;  %v1933_v17 = vcombine.low %v87_v8, %v91_v9 }
  0x3c   :  { %1354 = vmatmul.mubr.bf16.gmra.mrb[12].mxu1 %v1887_v20  ;;  %2364 = vmatprep.subr.bf16.mxu0 %v2504_v49  ;;  %v100_v20 = vld [vmem:[%s3199_s0 + $0x2a8] sm:$0xff] }
  0x3d   :  { %1361 = vmatprep.mubr.bf16.mxu1 %v1896_v22  ;;  %1582 = vmatpush1.bf16.msra.mxu1 %v2491_v23  ;;  %v1944_v22 = vcombine.high %v96_v19, %v100_v20  ;;  %v103_v23 = vld [vmem:[%s3199_s0 + $0x2c0] sm:$0xff] }
  0x3e   :  { %1583 = vmatprep.subr.bf16.mxu1 %v2516_v42  ;;  %v1950_v26 = vcombine.high %v103_v23, %v107_v24  ;;  %v1949_v32 = vcombine.low %v103_v23, %v107_v24 }
  0x3f   :  { %2365 = vmatpush3.bf16.msra.mxu0 %v2505_v50  ;;  %v26_v50 = vld [vmem:[%s3199_s0 + $0x58] sm:$0xff] }
  0x41   :  { %1584 = vmatpush1.bf16.msra.mxu1 %v2494_v28  ;;  %v108_v28 = vld [vmem:[%s3199_s0 + $0x2e8] sm:$0xff] }
  0x42   :  { %1226 = vmatmul.mubr.bf16.gmra.mrb[16].mxu0 %v1893_v29  ;;  %1585 = vmatprep.subr.bf16.mxu1 %v2516_v42  ;;  %v1943_v29 = vcombine.low %v96_v19, %v100_v20  ;;  %v1952_v30 = vcombine.high %v104_v27, %v108_v28 }
  0x43   :  { %1233 = vmatprep.mubr.bf16.mxu0 %v1902_v31  ;;  %v111_v31 = vld [vmem:[%s3199_s0 + $0x300] sm:$0xff] }
  0x44   :  { %1362 = vmatmul.mubr.bf16.gmra.mrb[16].mxu1 %v1895_v33  ;;  %v1958_v33 = vcombine.high %v111_v31, %v111_v31  ;;  %v1957_v39 = vcombine.low %v111_v31, %v111_v31 }
  0x45   :  { %1369 = vmatprep.mubr.bf16.mxu1 %v1904_v34  ;;  %1586 = vmatpush1.bf16.msra.mxu1 %v2495_v35  ;;  %v112_v34 = vld [vmem:[%s3199_s0 + $0x308] sm:$0xff]  ;;  %v1951_v35 = vcombine.low %v104_v27, %v108_v28 }
  0x46   :  { %1587 = vmatprep.subr.bf16.mxu1 %v2516_v42  ;;  %v1960_v36 = vcombine.high %v112_v34, %v112_v34  ;;  %v1959_v44 = vcombine.low %v112_v34, %v112_v34  ;;  %v78_v34 = vld [vmem:[%s3199_s0 + $0x1f8] sm:$0xff] }
  0x49   :  { %1588 = vmatpush1.bf16.msra.mxu1 %v2498_v41  ;;  %v18_v41 = vld [vmem:[%s3199_s0 + $0x18] sm:$0xff] }
  0x4a   :  { %1234 = vmatmul.mubr.bf16.gmra.mrb[20].mxu0 %v1901_v40  ;;  %1589 = vmatprep.subr.bf16.mxu1 %v2516_v42  ;;  %v1866_v40 = vcombine.high %v17_v37, %v21_v38 }
  0x4b   :  { %1241 = vmatprep.mubr.bf16.mxu0 %v1910_v43  ;;  %v22_v43 = vld [vmem:[%s3199_s0 + $0x38] sm:$0xff] }
  0x4c   :  { %1370 = vmatmul.mubr.bf16.gmra.mrb[20].mxu1 %v1903_v46  ;;  %v1868_v45 = vcombine.high %v18_v41, %v22_v43  ;;  %v25_v46 = vld [vmem:[%s3199_s0 + $0x50] sm:$0xff]  ;;  %v1867_v52 = vcombine.low %v18_v41, %v22_v43  ;;  %v82_v41 = vld [vmem:[%s3199_s0 + $0x218] sm:$0xff] }
  0x4d   :  { %1377 = vmatprep.mubr.bf16.mxu1 %v1912_v48  ;;  %1590 = vmatpush1.bf16.msra.mxu1 %v2499_v47  ;;  %v29_v47 = vld [vmem:[%s3199_s0 + $0x70] sm:$0xff]  ;;  %v1865_v48 = vcombine.low %v17_v37, %v21_v38  ;;  %v86_v43 = vld [vmem:[%s3199_s0 + $0x238] sm:$0xff] }
  0x4e   :  { %1591 = vmatprep.subr.bf16.mxu1 %v2516_v42  ;;  %v1874_v49 = vcombine.high %v25_v46, %v29_v47  ;;  %v1873_v56 = vcombine.low %v25_v46, %v29_v47  ;;  %v81_v37 = vld [vmem:[%s3199_s0 + $0x210] sm:$0xff] }
  0x4f   :  { %v85_v38 = vld [vmem:[%s3199_s0 + $0x230] sm:$0xff] }
  0x50   :  { %v89_v46 = vld [vmem:[%s3199_s0 + $0x250] sm:$0xff] }
  0x51   :  { %1592 = vmatpush1.bf16.msra.mxu1 %v2502_v54  ;;  %v33_v54 = vld [vmem:[%s3199_s0 + $0x90] sm:$0xff] }
  0x52   :  { %1242 = vmatmul.mubr.bf16.gmra.mrb[24].mxu0 %v1909_v53  ;;  %1593 = vmatprep.subr.bf16.mxu1 %v2516_v42  ;;  %v1876_v53 = vcombine.high %v26_v50, %v30_v51  ;;  %v93_v47 = vld [vmem:[%s3199_s0 + $0x270] sm:$0xff] }
  0x53   :  { %1249 = vmatprep.mubr.bf16.mxu0 %v1918_v55  ;;  %v37_v55 = vld [vmem:[%s3199_s0 + $0xb0] sm:$0xff] }
  0x54   :  { %1378 = vmatmul.mubr.bf16.gmra.mrb[24].mxu1 %v1911_v58  ;;  %v1882_v57 = vcombine.high %v33_v54, %v37_v55  ;;  %v34_v58 = vld [vmem:[%s3199_s0 + $0x98] sm:$0xff] }
  0x55   :  { %1385 = vmatprep.mubr.bf16.mxu1 %v1920_v59  ;;  %1594 = vmatpush1.bf16.msra.mxu1 %v2503_v60  ;;  %v38_v59 = vld [vmem:[%s3199_s0 + $0xb8] sm:$0xff]  ;;  %v1875_v60 = vcombine.low %v26_v50, %v30_v51 }
  0x56   :  { %1595 = vmatprep.subr.bf16.mxu1 %v2516_v42  ;;  %v1884_v61 = vcombine.high %v34_v58, %v38_v59  ;;  %v1883_v4 = vcombine.low %v34_v58, %v38_v59  ;;  %v90_v50 = vld [vmem:[%s3199_s0 + $0x258] sm:$0xff] }
  0x57   :  { %v94_v51 = vld [vmem:[%s3199_s0 + $0x278] sm:$0xff] }
  0x58   :  { %v98_v58 = vld [vmem:[%s3199_s0 + $0x298] sm:$0xff] }
  0x59   :  { %1596 = vmatpush1.bf16.msra.mxu1 %v2509_v0  ;;  %v1881_v0 = vcombine.low %v33_v54, %v37_v55  ;;  %v97_v54 = vld [vmem:[%s3199_s0 + $0x290] sm:$0xff]  ;;  %v102_v59 = vld [vmem:[%s3199_s0 + $0x2b8] sm:$0xff] }
  0x5a   :  { %1250 = vmatmul.mubr.bf16.gmra.mrb[28].mxu0 %v1917_v63  ;;  %1597 = vmatprep.subr.bf16.mxu1 %v2516_v42  ;;  %v92_v42 = vld [vmem:[%s3199_s0 + $0x268] sm:$0xff]  ;;  %v45_v63 = vld [vmem:[%s3199_s0 + $0xf0] sm:$0xff] }
  0x5b   :  { %1257 = vmatprep.mubr.bf16.mxu0 %v1926_v1  ;;  %v1936_v14 = vcombine.high %v88_v12, %v92_v42  ;;  %v1935_v21 = vcombine.low %v88_v12, %v92_v42  ;;  %v1890_v1 = vcombine.high %v41_v62, %v45_v63  ;;  %v1889_v8 = vcombine.low %v41_v62, %v45_v63  ;;  %v101_v55 = vld [vmem:[%s3199_s0 + $0x2b0] sm:$0xff] }
  0x5c   :  { %1386 = vmatmul.mubr.bf16.gmra.mrb[28].mxu1 %v1919_v5  ;;  %v1892_v5 = vcombine.high %v42_v2, %v46_v3  ;;  %v1891_v12 = vcombine.low %v42_v2, %v46_v3  ;;  %v105_v62 = vld [vmem:[%s3199_s0 + $0x2d0] sm:$0xff]  ;;  %v106_v2 = vld [vmem:[%s3199_s0 + $0x2d8] sm:$0xff] }
  0x5d   :  { %1393 = vmatprep.mubr.bf16.mxu1 %v1928_v6  ;;  %1598 = vmatpush1.bf16.msra.mxu1 %v1159_v7  ;;  %v49_v6 = vld [vmem:[%s3199_s0 + $0x110] sm:$0xff]  ;;  %v110_v3 = vld [vmem:[%s3199_s0 + $0x2f8] sm:$0xff] }
  0x5e   :  { %v53_v7 = vld [vmem:[%s3199_s0 + $0x130] sm:$0xff] }
  0x5f   :  { %v1898_v9 = vcombine.high %v49_v6, %v53_v7  ;;  %v1897_v15 = vcombine.low %v49_v6, %v53_v7  ;;  %v109_v63 = vld [vmem:[%s3199_s0 + $0x2f0] sm:$0xff] }
  0x60   :  { %v113_v6 = vld [vmem:[%s3199_s0 + $0x310] sm:$0xff]  ;;  %v1953_v7 = vcombine.low %v105_v62, %v109_v63 }
  0x62   :  { %1258 = vmatmul.mubr.bf16.gmra.mrb[32].mxu0 %v1925_v10  ;;  %v50_v10 = vld [vmem:[%s3199_s0 + $0x118] sm:$0xff] }
  0x63   :  { %1265 = vmatprep.mubr.bf16.mxu0 %v1934_v11  ;;  %v54_v11 = vld [vmem:[%s3199_s0 + $0x138] sm:$0xff] }
  0x64   :  { %1394 = vmatmul.mubr.bf16.gmra.mrb[32].mxu1 %v1927_v13  ;;  %v1900_v42 = vcombine.high %v50_v10, %v54_v11  ;;  %v57_v13 = vld [vmem:[%s3199_s0 + $0x150] sm:$0xff]  ;;  %v1899_v19 = vcombine.low %v50_v10, %v54_v11  ;;  %v1955_v10 = vcombine.low %v106_v2, %v110_v3 }
  0x65   :  { %1401 = vmatprep.mubr.bf16.mxu1 %v1936_v14  ;;  %v61_v14 = vld [vmem:[%s3199_s0 + $0x170] sm:$0xff] }
  0x66   :  { %v1906_v16 = vcombine.high %v57_v13, %v61_v14  ;;  %v1905_v23 = vcombine.low %v57_v13, %v61_v14  ;;  %v3057_v14 = vld [vmem:[%s3200_s2] ss:$0 sm:$0xff] }
  0x6a   :  { %1266 = vmatmul.mubr.bf16.gmra.mrb[36].mxu0 %v1933_v17  ;;  %v58_v17 = vld [vmem:[%s3199_s0 + $0x158] sm:$0xff] }
  0x6b   :  { %1273 = vmatprep.mubr.bf16.mxu0 %v1942_v18  ;;  %v62_v18 = vld [vmem:[%s3199_s0 + $0x178] sm:$0xff] }
  0x6c   :  { %1402 = vmatmul.mubr.bf16.gmra.mrb[36].mxu1 %v1935_v21  ;;  %v1908_v20 = vcombine.high %v58_v17, %v62_v18  ;;  %v65_v21 = vld [vmem:[%s3199_s0 + $0x190] sm:$0xff]  ;;  %v1907_v27 = vcombine.low %v58_v17, %v62_v18 }
  0x6d   :  { %1409 = vmatprep.mubr.bf16.mxu1 %v1944_v22  ;;  %v69_v22 = vld [vmem:[%s3199_s0 + $0x1b0] sm:$0xff] }
  0x6e   :  { %v1914_v24 = vcombine.high %v65_v21, %v69_v22  ;;  %v1913_v31 = vcombine.low %v65_v21, %v69_v22 }
  0x72   :  { %1274 = vmatmul.mubr.bf16.gmra.mrb[40].mxu0 %v1941_v25  ;;  %v66_v25 = vld [vmem:[%s3199_s0 + $0x198] sm:$0xff] }
  0x73   :  { %1281 = vmatprep.mubr.bf16.mxu0 %v1950_v26  ;;  %v70_v26 = vld [vmem:[%s3199_s0 + $0x1b8] sm:$0xff] }
  0x74   :  { %1410 = vmatmul.mubr.bf16.gmra.mrb[40].mxu1 %v1943_v29  ;;  %v1916_v28 = vcombine.high %v66_v25, %v70_v26  ;;  %v73_v29 = vld [vmem:[%s3199_s0 + $0x1d0] sm:$0xff] }
  0x75   :  { %1417 = vmatprep.mubr.bf16.mxu1 %v1952_v30  ;;  %v77_v30 = vld [vmem:[%s3199_s0 + $0x1f0] sm:$0xff] }
  0x7a   :  { %1282 = vmatmul.mubr.bf16.gmra.mrb[44].mxu0 %v1949_v32  ;;  %v1922_v32 = vcombine.high %v73_v29, %v77_v30 }
  0x7b   :  { %1289 = vmatprep.mubr.bf16.mxu0 %v1958_v33  ;;  %v74_v33 = vld [vmem:[%s3199_s0 + $0x1d8] sm:$0xff] }
  0x7c   :  { %1418 = vmatmul.mubr.bf16.gmra.mrb[44].mxu1 %v1951_v35  ;;  %v1915_v35 = vcombine.low %v66_v25, %v70_v26 }
  0x7d   :  { %1425 = vmatprep.mubr.bf16.mxu1 %v1960_v36  ;;  %v1924_v36 = vcombine.high %v74_v33, %v78_v34 }
  0x82   :  { %1290 = vmatmul.mubr.bf16.gmra.mrb[48].mxu0 %v1957_v39  ;;  %v1921_v39 = vcombine.low %v73_v29, %v77_v30 }
  0x83   :  { %1465 = vmatprep.mubr.bf16.mxu0 %v1866_v40  ;;  %v1930_v40 = vcombine.high %v81_v37, %v85_v38 }
  0x84   :  { %1426 = vmatmul.mubr.bf16.gmra.mrb[48].mxu1 %v1959_v44  ;;  %v1923_v44 = vcombine.low %v74_v33, %v78_v34 }
  0x85   :  { %2028 = vmatprep.mubr.msk.bf16.mxu1 %vm1117_vm1, %v1868_v45  ;;  %v1932_v45 = vcombine.high %v82_v41, %v86_v43 }
  0x8a   :  { %1466 = vmatmul.mubr.bf16.vlgmr.msra.gmra.mrb[52].mxu0 %v1865_v48  ;;  %v1929_v48 = vcombine.low %v81_v37, %v85_v38 }
  0x8b   :  { %1473 = vmatprep.mubr.bf16.mxu0 %v1874_v49  ;;  %v1938_v49 = vcombine.high %v89_v46, %v93_v47 }
  0x8c   :  { %1602 = vmatmul.mubr.bf16.vlgmr.msra.gmra.mrb[52].mxu1 %v1867_v52  ;;  %v1931_v52 = vcombine.low %v82_v41, %v86_v43 }
  0x8d   :  { %2029 = vmatprep.mubr.msk.bf16.mxu1 %vm1117_vm1, %v1876_v53  ;;  %v1940_v53 = vcombine.high %v90_v50, %v94_v51 }
  0x92   :  { %1474 = vmatmul.mubr.bf16.gmra.mrb[56].mxu0 %v1873_v56  ;;  %v1937_v56 = vcombine.low %v89_v46, %v93_v47 }
  0x93   :  { %1481 = vmatprep.mubr.bf16.mxu0 %v1882_v57  ;;  %v1946_v57 = vcombine.high %v97_v54, %v101_v55 }
  0x94   :  { %1610 = vmatmul.mubr.bf16.gmra.mrb[56].mxu1 %v1875_v60  ;;  %v1939_v60 = vcombine.low %v90_v50, %v94_v51 }
  0x95   :  { %2030 = vmatprep.mubr.msk.bf16.mxu1 %vm1117_vm1, %v1884_v61  ;;  %v1948_v61 = vcombine.high %v98_v58, %v102_v59 }
  0x9a   :  { %1482 = vmatmul.mubr.bf16.gmra.mrb[60].mxu0 %v1881_v0  ;;  %v1945_v0 = vcombine.low %v97_v54, %v101_v55 }
  0x9b   :  { %1489 = vmatprep.mubr.bf16.mxu0 %v1890_v1  ;;  %v1954_v1 = vcombine.high %v105_v62, %v109_v63 }
  0x9c   :  { %1618 = vmatmul.mubr.bf16.gmra.mrb[60].mxu1 %v1883_v4  ;;  %v1947_v4 = vcombine.low %v98_v58, %v102_v59 }
  0x9d   :  { %2031 = vmatprep.mubr.msk.bf16.mxu1 %vm1117_vm1, %v1892_v5  ;;  %v1956_v5 = vcombine.high %v106_v2, %v110_v3 }
  0xa2   :  { %1490 = vmatmul.mubr.bf16.gmra.mrb[64].mxu0 %v1889_v8  ;;  %v1962_v8 = vcombine.high %v113_v6, %v113_v6 }
  0xa3   :  { %1497 = vmatprep.mubr.bf16.mxu0 %v1898_v9  ;;  %v114_v9 = vld [vmem:[%s3199_s0 + $0x318] sm:$0xff] }
  0xa4   :  { %1626 = vmatmul.mubr.bf16.gmra.mrb[64].mxu1 %v1891_v12  ;;  %v1964_v11 = vcombine.high %v114_v9, %v114_v9  ;;  %v1961_v12 = vcombine.low %v113_v6, %v113_v6 }
  0xa5   :  { %2032 = vmatprep.mubr.msk.bf16.mxu1 %vm1117_vm1, %v1900_v42  ;;  %v1963_v42 = vcombine.low %v114_v9, %v114_v9 }
  0xaa   :  { %1498 = vmatmul.mubr.bf16.gmra.mrb[68].mxu0 %v1897_v15 }
  0xab   :  { %1505 = vmatprep.mubr.bf16.mxu0 %v1906_v16 }
  0xac   :  { %1634 = vmatmul.mubr.bf16.gmra.mrb[68].mxu1 %v1899_v19 }
  0xad   :  { %2033 = vmatprep.mubr.msk.bf16.mxu1 %vm1117_vm1, %v1908_v20 }
  0xb2   :  { %1506 = vmatmul.mubr.bf16.gmra.mrb[72].mxu0 %v1905_v23 }
  0xb3   :  { %1513 = vmatprep.mubr.bf16.mxu0 %v1914_v24 }
  0xb4   :  { %1642 = vmatmul.mubr.bf16.gmra.mrb[72].mxu1 %v1907_v27 }
  0xb5   :  { %2034 = vmatprep.mubr.msk.bf16.mxu1 %vm1117_vm1, %v1916_v28 }
  0xba   :  { %1514 = vmatmul.mubr.bf16.gmra.mrb[76].mxu0 %v1913_v31 }
  0xbb   :  { %1521 = vmatprep.mubr.bf16.mxu0 %v1922_v32 }
  0xbc   :  { %1650 = vmatmul.mubr.bf16.gmra.mrb[76].mxu1 %v1915_v35 }
  0xbd   :  { %2035 = vmatprep.mubr.msk.bf16.mxu1 %vm1117_vm1, %v1924_v36 }
  0xc2   :  { %1522 = vmatmul.mubr.bf16.gmra.mrb[80].mxu0 %v1921_v39 }
  0xc3   :  { %1529 = vmatprep.mubr.bf16.mxu0 %v1930_v40 }
  0xc4   :  { %1658 = vmatmul.mubr.bf16.gmra.mrb[80].mxu1 %v1923_v44 }
  0xc5   :  { %2036 = vmatprep.mubr.msk.bf16.mxu1 %vm1117_vm1, %v1932_v45 }
  0xca   :  { %1530 = vmatmul.mubr.bf16.gmra.mrb[84].mxu0 %v1929_v48 }
  0xcb   :  { %1537 = vmatprep.mubr.bf16.mxu0 %v1938_v49 }
  0xcc   :  { %1666 = vmatmul.mubr.bf16.gmra.mrb[84].mxu1 %v1931_v52 }
  0xcd   :  { %2037 = vmatprep.mubr.msk.bf16.mxu1 %vm1117_vm1, %v1940_v53 }
  0xd2   :  { %1538 = vmatmul.mubr.bf16.gmra.mrb[88].mxu0 %v1937_v56 }
  0xd3   :  { %1545 = vmatprep.mubr.bf16.mxu0 %v1946_v57 }
  0xd4   :  { %1674 = vmatmul.mubr.bf16.gmra.mrb[88].mxu1 %v1939_v60 }
  0xd5   :  { %2038 = vmatprep.mubr.msk.bf16.mxu1 %vm1117_vm1, %v1948_v61 }
  0xda   :  { %1546 = vmatmul.mubr.bf16.gmra.mrb[92].mxu0 %v1945_v0 }
  0xdb   :  { %1553 = vmatprep.mubr.bf16.mxu0 %v1954_v1 }
  0xdc   :  { %1682 = vmatmul.mubr.bf16.gmra.mrb[92].mxu1 %v1947_v4 }
  0xdd   :  { %2039 = vmatprep.mubr.msk.bf16.mxu1 %vm1117_vm1, %v1956_v5 }
  0xe2   :  { %1554 = vmatmul.mubr.bf16.gmra.mrb[96].mxu0 %v1953_v7 }
  0xe3   :  { %1561 = vmatprep.mubr.bf16.mxu0 %v1962_v8 }
  0xe4   :  { %1690 = vmatmul.mubr.bf16.gmra.mrb[96].mxu1 %v1955_v10 }
  0xe5   :  { %2040 = vmatprep.mubr.msk.bf16.mxu1 %vm1117_vm1, %v1964_v11 }
  0xea   :  { %1562 = vmatmul.mubr.bf16.gmra.mrb[100].mxu0 %v1961_v12 }
  0xec   :  { %1698 = vmatmul.mubr.bf16.gmra.mrb[100].mxu1 %v1963_v42 }
  0xf5   :  { %v2178_v13 = vpop.f32.mrb[0].mxu0 }
  0xf6   :  { %v2179_v15 = vpop.f32.mrb[1].mxu0 }
  0xf7   :  { %v2180_v16 = vadd.f32 %v2179_v15, %v2178_v13  ;;  %v2181_v17 = vpop.f32.mrb[2].mxu0  ;;  %v2272_v18 = vpop.f32.mrb[0].mxu1 }
  0xf8   :  { %v2182_v19 = vpop.f32.mrb[3].mxu0  ;;  %v2273_v22 = vpop.f32.mrb[1].mxu1 }
  0xf9   :  { %v1196_v20 = vadd.f32 %v2180_v16, %v3057_v14  ;;  %v2183_v21 = vadd.f32 %v2182_v19, %v2181_v17  ;;  %v2274_v23 = vadd.f32 %v2273_v22, %v2272_v18  ;;  %v2275_v24 = vpop.f32.mrb[2].mxu1 }
  0xfa   :  { %v2276_v26 = vpop.f32.mrb[3].mxu1 }
  0xfb   :  { %v1199_v25 = vadd.f32 %v2183_v21, %v3057_v14  ;;  %v3061_v27 = vadd.f32 %v2274_v23, %v1196_v20  ;;  %v2277_v28 = vadd.f32 %v2276_v26, %v2275_v24 }
  0xfd   :  { %v2184_v29 = vpop.f32.mrb[4].mxu0  ;;  %v3063_v30 = vadd.f32 %v2277_v28, %v1199_v25 }
  0xfe   :  { %v2185_v31 = vpop.f32.mrb[5].mxu0 }
  0xff   :  { %v2186_v32 = vadd.f32 %v2185_v31, %v2184_v29  ;;  %v2187_v33 = vpop.f32.mrb[6].mxu0  ;;  %v2278_v34 = vpop.f32.mrb[4].mxu1 }
 0x100   :  { %v2188_v35 = vpop.f32.mrb[7].mxu0  ;;  %v2279_v38 = vpop.f32.mrb[5].mxu1 }
 0x101   :  { %v1204_v36 = vadd.f32 %v2186_v32, %v3057_v14  ;;  %v2189_v37 = vadd.f32 %v2188_v35, %v2187_v33  ;;  %v2280_v39 = vadd.f32 %v2279_v38, %v2278_v34  ;;  %v2281_v40 = vpop.f32.mrb[6].mxu1 }
 0x102   :  { %v2282_v43 = vpop.f32.mrb[7].mxu1 }
 0x103   :  { %v1207_v41 = vadd.f32 %v2189_v37, %v3057_v14  ;;  %v3067_v44 = vadd.f32 %v2280_v39, %v1204_v36  ;;  %v2283_v45 = vadd.f32 %v2282_v43, %v2281_v40 }
 0x105   :  { %v2190_v46 = vpop.f32.mrb[8].mxu0  ;;  %v3069_v47 = vadd.f32 %v2283_v45, %v1207_v41 }
 0x106   :  { %v2191_v48 = vpop.f32.mrb[9].mxu0 }
 0x107   :  { %v2192_v49 = vadd.f32 %v2191_v48, %v2190_v46  ;;  %v2193_v50 = vpop.f32.mrb[10].mxu0  ;;  %v2284_v51 = vpop.f32.mrb[8].mxu1 }
 0x108   :  { %v2194_v52 = vpop.f32.mrb[11].mxu0  ;;  %v2285_v55 = vpop.f32.mrb[9].mxu1 }
 0x109   :  { %v1212_v53 = vadd.f32 %v2192_v49, %v3057_v14  ;;  %v2195_v54 = vadd.f32 %v2194_v52, %v2193_v50  ;;  %v2286_v56 = vadd.f32 %v2285_v55, %v2284_v51  ;;  %v2287_v57 = vpop.f32.mrb[10].mxu1 }
 0x10a   :  { %v2288_v59 = vpop.f32.mrb[11].mxu1 }
 0x10b   :  { %v1215_v58 = vadd.f32 %v2195_v54, %v3057_v14  ;;  %v3073_v60 = vadd.f32 %v2286_v56, %v1212_v53  ;;  %v2289_v61 = vadd.f32 %v2288_v59, %v2287_v57 }
 0x10d   :  { %v2196_v62 = vpop.f32.mrb[12].mxu0  ;;  %v3075_v63 = vadd.f32 %v2289_v61, %v1215_v58 }
 0x10e   :  { %v2197_v0 = vpop.f32.mrb[13].mxu0 }
 0x10f   :  { %v2198_v1 = vadd.f32 %v2197_v0, %v2196_v62  ;;  %v2199_v2 = vpop.f32.mrb[14].mxu0  ;;  %v2290_v3 = vpop.f32.mrb[12].mxu1 }
 0x110   :  { %v2200_v4 = vpop.f32.mrb[15].mxu0  ;;  %v2291_v7 = vpop.f32.mrb[13].mxu1 }
 0x111   :  { %v1220_v5 = vadd.f32 %v2198_v1, %v3057_v14  ;;  %v2201_v6 = vadd.f32 %v2200_v4, %v2199_v2  ;;  %v2292_v8 = vadd.f32 %v2291_v7, %v2290_v3  ;;  %v2293_v9 = vpop.f32.mrb[14].mxu1 }
 0x112   :  { %v2294_v11 = vpop.f32.mrb[15].mxu1 }
 0x113   :  { %v1223_v10 = vadd.f32 %v2201_v6, %v3057_v14  ;;  %v3079_v12 = vadd.f32 %v2292_v8, %v1220_v5  ;;  %v2295_v42 = vadd.f32 %v2294_v11, %v2293_v9 }
 0x115   :  { %v2202_v13 = vpop.f32.mrb[16].mxu0  ;;  %v3081_v15 = vadd.f32 %v2295_v42, %v1223_v10 }
 0x116   :  { %v2203_v16 = vpop.f32.mrb[17].mxu0 }
 0x117   :  { %v2204_v17 = vadd.f32 %v2203_v16, %v2202_v13  ;;  %v2205_v18 = vpop.f32.mrb[18].mxu0  ;;  %v2296_v19 = vpop.f32.mrb[16].mxu1 }
 0x118   :  { %v2206_v20 = vpop.f32.mrb[19].mxu0  ;;  %v2297_v23 = vpop.f32.mrb[17].mxu1 }
 0x119   :  { %v1228_v21 = vadd.f32 %v2204_v17, %v3057_v14  ;;  %v2207_v22 = vadd.f32 %v2206_v20, %v2205_v18  ;;  %v2298_v24 = vadd.f32 %v2297_v23, %v2296_v19  ;;  %v2299_v25 = vpop.f32.mrb[18].mxu1 }
 0x11a   :  { %v2300_v28 = vpop.f32.mrb[19].mxu1 }
 0x11b   :  { %v1231_v26 = vadd.f32 %v2207_v22, %v3057_v14  ;;  %v3085_v29 = vadd.f32 %v2298_v24, %v1228_v21  ;;  %v2301_v31 = vadd.f32 %v2300_v28, %v2299_v25 }
 0x11d   :  { %v2208_v32 = vpop.f32.mrb[20].mxu0  ;;  %v3087_v33 = vadd.f32 %v2301_v31, %v1231_v26 }
 0x11e   :  { %v2209_v34 = vpop.f32.mrb[21].mxu0 }
 0x11f   :  { %v2210_v35 = vadd.f32 %v2209_v34, %v2208_v32  ;;  %v2211_v36 = vpop.f32.mrb[22].mxu0  ;;  %v2302_v37 = vpop.f32.mrb[20].mxu1 }
 0x120   :  { %v2212_v38 = vpop.f32.mrb[23].mxu0  ;;  %v2303_v41 = vpop.f32.mrb[21].mxu1 }
 0x121   :  { %v1236_v39 = vadd.f32 %v2210_v35, %v3057_v14  ;;  %v2213_v40 = vadd.f32 %v2212_v38, %v2211_v36  ;;  %v2304_v43 = vadd.f32 %v2303_v41, %v2302_v37  ;;  %v2305_v45 = vpop.f32.mrb[22].mxu1 }
 0x122   :  { %v2306_v48 = vpop.f32.mrb[23].mxu1 }
 0x123   :  { %v1239_v46 = vadd.f32 %v2213_v40, %v3057_v14  ;;  %v3091_v49 = vadd.f32 %v2304_v43, %v1236_v39  ;;  %v2307_v50 = vadd.f32 %v2306_v48, %v2305_v45 }
 0x125   :  { %v2214_v51 = vpop.f32.mrb[24].mxu0  ;;  %v3093_v52 = vadd.f32 %v2307_v50, %v1239_v46 }
 0x126   :  { %v2215_v53 = vpop.f32.mrb[25].mxu0 }
 0x127   :  { %v2216_v54 = vadd.f32 %v2215_v53, %v2214_v51  ;;  %v2217_v55 = vpop.f32.mrb[26].mxu0  ;;  %v2308_v56 = vpop.f32.mrb[24].mxu1 }
 0x128   :  { %v2218_v57 = vpop.f32.mrb[27].mxu0  ;;  %v2309_v61 = vpop.f32.mrb[25].mxu1 }
 0x129   :  { %v1244_v58 = vadd.f32 %v2216_v54, %v3057_v14  ;;  %v2219_v59 = vadd.f32 %v2218_v57, %v2217_v55  ;;  %v2310_v62 = vadd.f32 %v2309_v61, %v2308_v56  ;;  %v2311_v0 = vpop.f32.mrb[26].mxu1 }
 0x12a   :  { %v2312_v2 = vpop.f32.mrb[27].mxu1 }
 0x12b   :  { %v1247_v1 = vadd.f32 %v2219_v59, %v3057_v14  ;;  %v3097_v3 = vadd.f32 %v2310_v62, %v1244_v58  ;;  %v2313_v4 = vadd.f32 %v2312_v2, %v2311_v0 }
 0x12d   :  { %v2220_v5 = vpop.f32.mrb[28].mxu0  ;;  %v3099_v6 = vadd.f32 %v2313_v4, %v1247_v1 }
 0x12e   :  { %v2221_v7 = vpop.f32.mrb[29].mxu0 }
 0x12f   :  { %v2222_v8 = vadd.f32 %v2221_v7, %v2220_v5  ;;  %v2223_v9 = vpop.f32.mrb[30].mxu0  ;;  %v2314_v10 = vpop.f32.mrb[28].mxu1 }
 0x130   :  { %v2224_v11 = vpop.f32.mrb[31].mxu0  ;;  %v2315_v16 = vpop.f32.mrb[29].mxu1 }
 0x131   :  { %v1252_v42 = vadd.f32 %v2222_v8, %v3057_v14  ;;  %v2225_v13 = vadd.f32 %v2224_v11, %v2223_v9  ;;  %v2316_v17 = vadd.f32 %v2315_v16, %v2314_v10  ;;  %v2317_v18 = vpop.f32.mrb[30].mxu1 }
 0x132   :  { %v2318_v20 = vpop.f32.mrb[31].mxu1 }
 0x133   :  { %v1255_v19 = vadd.f32 %v2225_v13, %v3057_v14  ;;  %v3103_v21 = vadd.f32 %v2316_v17, %v1252_v42  ;;  %v2319_v22 = vadd.f32 %v2318_v20, %v2317_v18 }
 0x135   :  { %v2226_v23 = vpop.f32.mrb[32].mxu0  ;;  %v3105_v24 = vadd.f32 %v2319_v22, %v1255_v19 }
 0x136   :  { %v2227_v25 = vpop.f32.mrb[33].mxu0 }
 0x137   :  { %v2228_v26 = vadd.f32 %v2227_v25, %v2226_v23  ;;  %v2229_v28 = vpop.f32.mrb[34].mxu0  ;;  %v2320_v31 = vpop.f32.mrb[32].mxu1 }
 0x138   :  { %v2230_v32 = vpop.f32.mrb[35].mxu0  ;;  %v2321_v36 = vpop.f32.mrb[33].mxu1 }
 0x139   :  { %v1260_v34 = vadd.f32 %v2228_v26, %v3057_v14  ;;  %v2231_v35 = vadd.f32 %v2230_v32, %v2229_v28  ;;  %v2322_v37 = vadd.f32 %v2321_v36, %v2320_v31  ;;  %v2323_v38 = vpop.f32.mrb[34].mxu1 }
 0x13a   :  { %v2324_v40 = vpop.f32.mrb[35].mxu1 }
 0x13b   :  { %v1263_v39 = vadd.f32 %v2231_v35, %v3057_v14  ;;  %v3109_v41 = vadd.f32 %v2322_v37, %v1260_v34  ;;  %v2325_v43 = vadd.f32 %v2324_v40, %v2323_v38 }
 0x13d   :  { %v2232_v45 = vpop.f32.mrb[36].mxu0  ;;  %v3111_v46 = vadd.f32 %v2325_v43, %v1263_v39 }
 0x13e   :  { %v2233_v48 = vpop.f32.mrb[37].mxu0 }
 0x13f   :  { %v2234_v50 = vadd.f32 %v2233_v48, %v2232_v45  ;;  %v2235_v51 = vpop.f32.mrb[38].mxu0  ;;  %v2326_v53 = vpop.f32.mrb[36].mxu1 }
 0x140   :  { %v2236_v54 = vpop.f32.mrb[39].mxu0  ;;  %v2327_v57 = vpop.f32.mrb[37].mxu1 }
 0x141   :  { %v1268_v55 = vadd.f32 %v2234_v50, %v3057_v14  ;;  %v2237_v56 = vadd.f32 %v2236_v54, %v2235_v51  ;;  %v2328_v58 = vadd.f32 %v2327_v57, %v2326_v53  ;;  %v2329_v59 = vpop.f32.mrb[38].mxu1 }
 0x142   :  { %v2330_v62 = vpop.f32.mrb[39].mxu1 }
 0x143   :  { %v1271_v61 = vadd.f32 %v2237_v56, %v3057_v14  ;;  %v3115_v0 = vadd.f32 %v2328_v58, %v1268_v55  ;;  %v2331_v1 = vadd.f32 %v2330_v62, %v2329_v59 }
 0x145   :  { %v2238_v2 = vpop.f32.mrb[40].mxu0  ;;  %v3117_v4 = vadd.f32 %v2331_v1, %v1271_v61 }
 0x146   :  { %v2239_v5 = vpop.f32.mrb[41].mxu0 }
 0x147   :  { %v2240_v7 = vadd.f32 %v2239_v5, %v2238_v2  ;;  %v2241_v8 = vpop.f32.mrb[42].mxu0  ;;  %v2332_v9 = vpop.f32.mrb[40].mxu1 }
 0x148   :  { %v2242_v10 = vpop.f32.mrb[43].mxu0  ;;  %v2333_v13 = vpop.f32.mrb[41].mxu1 }
 0x149   :  { %v1276_v11 = vadd.f32 %v2240_v7, %v3057_v14  ;;  %v2243_v42 = vadd.f32 %v2242_v10, %v2241_v8  ;;  %v2334_v16 = vadd.f32 %v2333_v13, %v2332_v9  ;;  %v2335_v17 = vpop.f32.mrb[42].mxu1 }
 0x14a   :  { %v2336_v19 = vpop.f32.mrb[43].mxu1 }
 0x14b   :  { %v1279_v18 = vadd.f32 %v2243_v42, %v3057_v14  ;;  %v3121_v20 = vadd.f32 %v2334_v16, %v1276_v11  ;;  %v2337_v22 = vadd.f32 %v2336_v19, %v2335_v17 }
 0x14d   :  { %v2244_v23 = vpop.f32.mrb[44].mxu0  ;;  %v3123_v25 = vadd.f32 %v2337_v22, %v1279_v18 }
 0x14e   :  { %v2245_v26 = vpop.f32.mrb[45].mxu0 }
 0x14f   :  { %v2246_v28 = vadd.f32 %v2245_v26, %v2244_v23  ;;  %v2247_v31 = vpop.f32.mrb[46].mxu0  ;;  %v2338_v32 = vpop.f32.mrb[44].mxu1 }
 0x150   :  { %v2248_v34 = vpop.f32.mrb[47].mxu0  ;;  %v2339_v37 = vpop.f32.mrb[45].mxu1 }
 0x151   :  { %v1284_v35 = vadd.f32 %v2246_v28, %v3057_v14  ;;  %v2249_v36 = vadd.f32 %v2248_v34, %v2247_v31  ;;  %v2340_v38 = vadd.f32 %v2339_v37, %v2338_v32  ;;  %v2341_v39 = vpop.f32.mrb[46].mxu1 }
 0x152   :  { %v2342_v43 = vpop.f32.mrb[47].mxu1 }
 0x153   :  { %v1287_v40 = vadd.f32 %v2249_v36, %v3057_v14  ;;  %v3127_v45 = vadd.f32 %v2340_v38, %v1284_v35  ;;  %v2343_v48 = vadd.f32 %v2342_v43, %v2341_v39 }
 0x155   :  { %v2250_v50 = vpop.f32.mrb[48].mxu0  ;;  %v3129_v51 = vadd.f32 %v2343_v48, %v1287_v40 }
 0x156   :  { %v2251_v53 = vpop.f32.mrb[49].mxu0 }
 0x157   :  { %v2252_v54 = vadd.f32 %v2251_v53, %v2250_v50  ;;  %v2253_v55 = vpop.f32.mrb[50].mxu0  ;;  %v2344_v56 = vpop.f32.mrb[48].mxu1 }
 0x158   :  { %v2254_v57 = vpop.f32.mrb[51].mxu0  ;;  %v2345_v59 = vpop.f32.mrb[49].mxu1 }
 0x159   :  { %v1292_v58 = vadd.f32 %v2252_v54, %v3057_v14  ;;  %v2346_v61 = vadd.f32 %v2345_v59, %v2344_v56  ;;  %v2347_v62 = vpop.f32.mrb[50].mxu1 }
 0x15a   :  { %v2348_v1 = vpop.f32.mrb[51].mxu1 }
 0x15b   :  { %v3132_v2 = vadd.f32 %v2346_v61, %v1292_v58 }
 0x15d   :  { %v2366_v5 = vpop.f32.mrb[52].mxu0 }
 0x15e   :  { %v2367_v7 = vpop.f32.mrb[53].mxu0 }
 0x15f   :  { %v2368_v8 = vadd.f32 %v2367_v7, %v2366_v5  ;;  %v2369_v9 = vpop.f32.mrb[54].mxu0  ;;  %v1603_v11 = vpop.f32.mrb[52].mxu1 }
 0x160   :  { %v2370_v10 = vpop.f32.mrb[55].mxu0  ;;  %v1605_v16 = vpop.f32.mrb[53].mxu1 }
 0x161   :  { %v2371_v42 = vadd.f32 %v2370_v10, %v2369_v9  ;;  %v1468_v13 = vadd.f32 %v2368_v8, %v3061_v27  ;;  %v1606_v17 = vpop.f32.mrb[54].mxu1 }
 0x162   :  { %v1608_v19 = vpop.f32.mrb[55].mxu1 }
 0x163   :  { %v1604_v18 = vadd.f32 %v1603_v11, %v1468_v13  ;;  %v1471_v14 = vadd.f32 %v2371_v42, %v3063_v30 }
 0x165   :  { %v1607_v22 = vadd.f32 %v1606_v17, %v1471_v14  ;;  %v2372_v23 = vpop.f32.mrb[56].mxu0  ;;  %v1705_v28 = vmax.f32 %v1604_v18, 0.0 }
 0x166   :  { %v2373_v26 = vpop.f32.mrb[57].mxu0 }
 0x167   :  { %v1706_v31 = vmax.f32 %v1607_v22, 0.0  ;;  %v2374_v32 = vadd.f32 %v2373_v26, %v2372_v23  ;;  %v2375_v34 = vpop.f32.mrb[58].mxu0  ;;  %v1611_v36 = vpop.f32.mrb[56].mxu1 }
 0x168   :  { %v2376_v35 = vpop.f32.mrb[59].mxu0  ;;  %v1613_v27 = vpop.f32.mrb[57].mxu1 }
 0x169   :  { %v2094_v37 = vpack.c.bf16 %v1706_v31, %v1705_v28  ;;  %v2377_v38 = vadd.f32 %v2376_v35, %v2375_v34  ;;  %v1476_v39 = vadd.f32 %v2374_v32, %v3067_v44  ;;  %v1614_v40 = vpop.f32.mrb[58].mxu1 }
 0x16a   :  { %v1616_v48 = vpop.f32.mrb[59].mxu1 }
 0x16b   :  { %2095 = vst [vmem:[%s3201_s3] sm:$0xff] %v2094_v37   ;;  %v1612_v30 = vadd.f32 %v1611_v36, %v1476_v39  ;;  %v1479_v43 = vadd.f32 %v2377_v38, %v3069_v47 }
 0x16d   :  { %v1615_v50 = vadd.f32 %v1614_v40, %v1479_v43  ;;  %v2378_v53 = vpop.f32.mrb[60].mxu0  ;;  %v1707_v55 = vmax.f32 %v1612_v30, 0.0 }
 0x16e   :  { %v2379_v54 = vpop.f32.mrb[61].mxu0 }
 0x16f   :  { %v1708_v56 = vmax.f32 %v1615_v50, 0.0  ;;  %v2380_v57 = vadd.f32 %v2379_v54, %v2378_v53  ;;  %v2381_v58 = vpop.f32.mrb[62].mxu0  ;;  %v1619_v61 = vpop.f32.mrb[60].mxu1 }
 0x170   :  { %v2382_v59 = vpop.f32.mrb[63].mxu0  ;;  %v1621_v5 = vpop.f32.mrb[61].mxu1 }
 0x171   :  { %v2099_v44 = vpack.c.bf16 %v1708_v56, %v1707_v55  ;;  %v2383_v62 = vadd.f32 %v2382_v59, %v2381_v58  ;;  %v1484_v1 = vadd.f32 %v2380_v57, %v3073_v60  ;;  %v1622_v7 = vpop.f32.mrb[62].mxu1 }
 0x172   :  { %v1624_v9 = vpop.f32.mrb[63].mxu1 }
 0x173   :  { %2151 = vst [vmem:[%s3201_s3 + $0x8] sm:$0xff] %v2099_v44   ;;  %v1620_v47 = vadd.f32 %v1619_v61, %v1484_v1  ;;  %v1487_v8 = vadd.f32 %v2383_v62, %v3075_v63 }
 0x175   :  { %v1623_v10 = vadd.f32 %v1622_v7, %v1487_v8  ;;  %v2384_v11 = vpop.f32.mrb[64].mxu0  ;;  %v1709_v13 = vmax.f32 %v1620_v47, 0.0 }
 0x176   :  { %v2385_v42 = vpop.f32.mrb[65].mxu0 }
 0x177   :  { %v1710_v16 = vmax.f32 %v1623_v10, 0.0  ;;  %v2386_v17 = vadd.f32 %v2385_v42, %v2384_v11  ;;  %v2387_v18 = vpop.f32.mrb[66].mxu0  ;;  %v1627_v19 = vpop.f32.mrb[64].mxu1 }
 0x178   :  { %v2388_v14 = vpop.f32.mrb[67].mxu0  ;;  %v1629_v26 = vpop.f32.mrb[65].mxu1 }
 0x179   :  { %v2104_v60 = vpack.c.bf16 %v1710_v16, %v1709_v13  ;;  %v2389_v22 = vadd.f32 %v2388_v14, %v2387_v18  ;;  %v1492_v23 = vadd.f32 %v2386_v17, %v3079_v12  ;;  %v1630_v28 = vpop.f32.mrb[66].mxu1 }
 0x17a   :  { %v1632_v32 = vpop.f32.mrb[67].mxu1 }
 0x17b   :  { %2152 = vst [vmem:[%s3201_s3 + $0x10] sm:$0xff] %v2104_v60   ;;  %v1628_v63 = vadd.f32 %v1627_v19, %v1492_v23  ;;  %v1495_v31 = vadd.f32 %v2389_v22, %v3081_v15 }
 0x17d   :  { %v1631_v34 = vadd.f32 %v1630_v28, %v1495_v31  ;;  %v2390_v35 = vpop.f32.mrb[68].mxu0  ;;  %v1711_v37 = vmax.f32 %v1628_v63, 0.0 }
 0x17e   :  { %v2391_v36 = vpop.f32.mrb[69].mxu0 }
 0x17f   :  { %v1712_v38 = vmax.f32 %v1631_v34, 0.0  ;;  %v2392_v39 = vadd.f32 %v2391_v36, %v2390_v35  ;;  %v2393_v27 = vpop.f32.mrb[70].mxu0  ;;  %v1635_v30 = vpop.f32.mrb[68].mxu1 }
 0x180   :  { %v2394_v40 = vpop.f32.mrb[71].mxu0  ;;  %v1637_v50 = vpop.f32.mrb[69].mxu1 }
 0x181   :  { %v2109_v12 = vpack.c.bf16 %v1712_v38, %v1711_v37  ;;  %v2395_v43 = vadd.f32 %v2394_v40, %v2393_v27  ;;  %v1500_v48 = vadd.f32 %v2392_v39, %v3085_v29  ;;  %v1638_v53 = vpop.f32.mrb[70].mxu1 }
 0x182   :  { %v1640_v55 = vpop.f32.mrb[71].mxu1 }
 0x183   :  { %2153 = vst [vmem:[%s3201_s3 + $0x18] sm:$0xff] %v2109_v12   ;;  %v1636_v15 = vadd.f32 %v1635_v30, %v1500_v48  ;;  %v1503_v54 = vadd.f32 %v2395_v43, %v3087_v33 }
 0x185   :  { %v1639_v56 = vadd.f32 %v1638_v53, %v1503_v54  ;;  %v2396_v57 = vpop.f32.mrb[72].mxu0  ;;  %v1713_v59 = vmax.f32 %v1636_v15, 0.0 }
 0x186   :  { %v2397_v58 = vpop.f32.mrb[73].mxu0 }
 0x187   :  { %v1714_v61 = vmax.f32 %v1639_v56, 0.0  ;;  %v2398_v44 = vadd.f32 %v2397_v58, %v2396_v57  ;;  %v2399_v62 = vpop.f32.mrb[74].mxu0  ;;  %v1643_v5 = vpop.f32.mrb[72].mxu1 }
 0x188   :  { %v2400_v1 = vpop.f32.mrb[75].mxu0  ;;  %v1645_v8 = vpop.f32.mrb[73].mxu1 }
 0x189   :  { %v2114_v29 = vpack.c.bf16 %v1714_v61, %v1713_v59  ;;  %v2401_v7 = vadd.f32 %v2400_v1, %v2399_v62  ;;  %v1508_v47 = vadd.f32 %v2398_v44, %v3091_v49  ;;  %v1646_v9 = vpop.f32.mrb[74].mxu1 }
 0x18a   :  { %v1648_v11 = vpop.f32.mrb[75].mxu1 }
 0x18b   :  { %2154 = vst [vmem:[%s3201_s3 + $0x20] sm:$0xff] %v2114_v29   ;;  %v1644_v33 = vadd.f32 %v1643_v5, %v1508_v47  ;;  %v1511_v10 = vadd.f32 %v2401_v7, %v3093_v52 }
 0x18d   :  { %v1647_v42 = vadd.f32 %v1646_v9, %v1511_v10  ;;  %v2402_v13 = vpop.f32.mrb[76].mxu0  ;;  %v1715_v17 = vmax.f32 %v1644_v33, 0.0 }
 0x18e   :  { %v2403_v16 = vpop.f32.mrb[77].mxu0 }
 0x18f   :  { %v1716_v18 = vmax.f32 %v1647_v42, 0.0  ;;  %v2404_v14 = vadd.f32 %v2403_v16, %v2402_v13  ;;  %v2405_v19 = vpop.f32.mrb[78].mxu0  ;;  %v1651_v22 = vpop.f32.mrb[76].mxu1 }
 0x190   :  { %v2406_v60 = vpop.f32.mrb[79].mxu0  ;;  %v1653_v28 = vpop.f32.mrb[77].mxu1 }
 0x191   :  { %v2119_v49 = vpack.c.bf16 %v1716_v18, %v1715_v17  ;;  %v2407_v23 = vadd.f32 %v2406_v60, %v2405_v19  ;;  %v1516_v26 = vadd.f32 %v2404_v14, %v3097_v3  ;;  %v1654_v63 = vpop.f32.mrb[78].mxu1 }
 0x192   :  { %v1656_v32 = vpop.f32.mrb[79].mxu1 }
 0x193   :  { %2155 = vst [vmem:[%s3201_s3 + $0x28] sm:$0xff] %v2119_v49   ;;  %v1652_v52 = vadd.f32 %v1651_v22, %v1516_v26  ;;  %v1519_v31 = vadd.f32 %v2407_v23, %v3099_v6 }
 0x195   :  { %v1655_v34 = vadd.f32 %v1654_v63, %v1519_v31  ;;  %v2408_v35 = vpop.f32.mrb[80].mxu0  ;;  %v1717_v37 = vmax.f32 %v1652_v52, 0.0 }
 0x196   :  { %v2409_v36 = vpop.f32.mrb[81].mxu0 }
 0x197   :  { %v1718_v38 = vmax.f32 %v1655_v34, 0.0  ;;  %v2410_v39 = vadd.f32 %v2409_v36, %v2408_v35  ;;  %v2411_v27 = vpop.f32.mrb[82].mxu0  ;;  %v1659_v30 = vpop.f32.mrb[80].mxu1 }
 0x198   :  { %v2412_v40 = vpop.f32.mrb[83].mxu0  ;;  %v1661_v48 = vpop.f32.mrb[81].mxu1 }
 0x199   :  { %v2124_v3 = vpack.c.bf16 %v1718_v38, %v1717_v37  ;;  %v2413_v12 = vadd.f32 %v2412_v40, %v2411_v27  ;;  %v1524_v43 = vadd.f32 %v2410_v39, %v3103_v21  ;;  %v1662_v50 = vpop.f32.mrb[82].mxu1 }
 0x19a   :  { %v1664_v15 = vpop.f32.mrb[83].mxu1 }
 0x19b   :  { %2156 = vst [vmem:[%s3201_s3 + $0x30] sm:$0xff] %v2124_v3   ;;  %v1660_v6 = vadd.f32 %v1659_v30, %v1524_v43  ;;  %v1527_v53 = vadd.f32 %v2413_v12, %v3105_v24 }
 0x19d   :  { %v1663_v54 = vadd.f32 %v1662_v50, %v1527_v53  ;;  %v2414_v55 = vpop.f32.mrb[84].mxu0  ;;  %v1719_v57 = vmax.f32 %v1660_v6, 0.0 }
 0x19e   :  { %v2415_v56 = vpop.f32.mrb[85].mxu0 }
 0x19f   :  { %v1720_v58 = vmax.f32 %v1663_v54, 0.0  ;;  %v2416_v59 = vadd.f32 %v2415_v56, %v2414_v55  ;;  %v2417_v61 = vpop.f32.mrb[86].mxu0  ;;  %v1667_v62 = vpop.f32.mrb[84].mxu1 }
 0x1a0   :  { %v2418_v44 = vpop.f32.mrb[87].mxu0  ;;  %v1669_v29 = vpop.f32.mrb[85].mxu1 }
 0x1a1   :  { %v2129_v21 = vpack.c.bf16 %v1720_v58, %v1719_v57  ;;  %v2419_v1 = vadd.f32 %v2418_v44, %v2417_v61  ;;  %v1532_v5 = vadd.f32 %v2416_v59, %v3109_v41  ;;  %v1670_v7 = vpop.f32.mrb[86].mxu1 }
 0x1a2   :  { %v1672_v8 = vpop.f32.mrb[87].mxu1 }
 0x1a3   :  { %2157 = vst [vmem:[%s3201_s3 + $0x38] sm:$0xff] %v2129_v21   ;;  %v1668_v24 = vadd.f32 %v1667_v62, %v1532_v5  ;;  %v1535_v47 = vadd.f32 %v2419_v1, %v3111_v46 }
 0x1a5   :  { %v1671_v9 = vadd.f32 %v1670_v7, %v1535_v47  ;;  %v2420_v33 = vpop.f32.mrb[88].mxu0  ;;  %v1721_v11 = vmax.f32 %v1668_v24, 0.0 }
 0x1a6   :  { %v2421_v10 = vpop.f32.mrb[89].mxu0 }
 0x1a7   :  { %v1722_v42 = vmax.f32 %v1671_v9, 0.0  ;;  %v2422_v13 = vadd.f32 %v2421_v10, %v2420_v33  ;;  %v2423_v16 = vpop.f32.mrb[90].mxu0  ;;  %v1675_v18 = vpop.f32.mrb[88].mxu1 }
 0x1a8   :  { %v2424_v17 = vpop.f32.mrb[91].mxu0  ;;  %v1677_v60 = vpop.f32.mrb[89].mxu1 }
 0x1a9   :  { %v2134_v41 = vpack.c.bf16 %v1722_v42, %v1721_v11  ;;  %v2425_v14 = vadd.f32 %v2424_v17, %v2423_v16  ;;  %v1540_v19 = vadd.f32 %v2422_v13, %v3115_v0  ;;  %v1678_v22 = vpop.f32.mrb[90].mxu1 }
 0x1aa   :  { %v1680_v23 = vpop.f32.mrb[91].mxu1 }
 0x1ab   :  { %2158 = vst [vmem:[%s3201_s3 + $0x40] sm:$0xff] %v2134_v41   ;;  %v1676_v46 = vadd.f32 %v1675_v18, %v1540_v19  ;;  %v1543_v49 = vadd.f32 %v2425_v14, %v3117_v4 }
 0x1ad   :  { %v1679_v26 = vadd.f32 %v1678_v22, %v1543_v49  ;;  %v2426_v28 = vpop.f32.mrb[92].mxu0  ;;  %v1723_v52 = vmax.f32 %v1676_v46, 0.0 }
 0x1ae   :  { %v2427_v63 = vpop.f32.mrb[93].mxu0 }
 0x1af   :  { %v1724_v31 = vmax.f32 %v1679_v26, 0.0  ;;  %v2428_v32 = vadd.f32 %v2427_v63, %v2426_v28  ;;  %v2429_v34 = vpop.f32.mrb[94].mxu0  ;;  %v1683_v36 = vpop.f32.mrb[92].mxu1 }
 0x1b0   :  { %v2430_v35 = vpop.f32.mrb[95].mxu0  ;;  %v1685_v39 = vpop.f32.mrb[93].mxu1 }
 0x1b1   :  { %v2139_v0 = vpack.c.bf16 %v1724_v31, %v1723_v52  ;;  %v2431_v37 = vadd.f32 %v2430_v35, %v2429_v34  ;;  %v1548_v38 = vadd.f32 %v2428_v32, %v3121_v20  ;;  %v1686_v27 = vpop.f32.mrb[94].mxu1 }
 0x1b2   :  { %v1688_v30 = vpop.f32.mrb[95].mxu1 }
 0x1b3   :  { %2159 = vst [vmem:[%s3201_s3 + $0x48] sm:$0xff] %v2139_v0   ;;  %v1684_v4 = vadd.f32 %v1683_v36, %v1548_v38  ;;  %v1551_v40 = vadd.f32 %v2431_v37, %v3123_v25 }
 0x1b5   :  { %v1687_v3 = vadd.f32 %v1686_v27, %v1551_v40  ;;  %v2432_v12 = vpop.f32.mrb[96].mxu0  ;;  %v1725_v48 = vmax.f32 %v1684_v4, 0.0 }
 0x1b6   :  { %v2433_v43 = vpop.f32.mrb[97].mxu0 }
 0x1b7   :  { %v1726_v50 = vmax.f32 %v1687_v3, 0.0  ;;  %v2434_v6 = vadd.f32 %v2433_v43, %v2432_v12  ;;  %v2435_v53 = vpop.f32.mrb[98].mxu0  ;;  %v1691_v54 = vpop.f32.mrb[96].mxu1 }
 0x1b8   :  { %v2436_v15 = vpop.f32.mrb[99].mxu0  ;;  %v1693_v57 = vpop.f32.mrb[97].mxu1 }
 0x1b9   :  { %v2144_v20 = vpack.c.bf16 %v1726_v50, %v1725_v48  ;;  %v2437_v55 = vadd.f32 %v2436_v15, %v2435_v53  ;;  %v1556_v56 = vadd.f32 %v2434_v6, %v3127_v45  ;;  %v1694_v58 = vpop.f32.mrb[98].mxu1 }
 0x1ba   :  { %v1696_v61 = vpop.f32.mrb[99].mxu1 }
 0x1bb   :  { %2160 = vst [vmem:[%s3201_s3 + $0x50] sm:$0xff] %v2144_v20   ;;  %v1692_v25 = vadd.f32 %v1691_v54, %v1556_v56  ;;  %v1559_v59 = vadd.f32 %v2437_v55, %v3129_v51 }
 0x1bd   :  { %v1695_v44 = vadd.f32 %v1694_v58, %v1559_v59  ;;  %v2438_v62 = vpop.f32.mrb[100].mxu0  ;;  %v1727_v1 = vmax.f32 %v1692_v25, 0.0 }
 0x1be   :  { %v2439_v21 = vpop.f32.mrb[101].mxu0 }
 0x1bf   :  { %v1728_v5 = vmax.f32 %v1695_v44, 0.0  ;;  %v2440_v29 = vadd.f32 %v2439_v21, %v2438_v62  ;;  %v2441_v7 = vpop.f32.mrb[102].mxu0  ;;  %v1699_v47 = vpop.f32.mrb[100].mxu1 }
 0x1c0   :  { %v2442_v24 = vpop.f32.mrb[103].mxu0  ;;  %v1701_v9 = vpop.f32.mrb[101].mxu1 }
 0x1c1   :  { %v2149_v45 = vpack.c.bf16 %v1728_v5, %v1727_v1  ;;  %v1564_v8 = vadd.f32 %v2440_v29, %v3132_v2  ;;  %v1702_v33 = vpop.f32.mrb[102].mxu1 }
 0x1c2   :  { %v1703_v10 = vpop.f32.mrb[103].mxu1 }
 0x1c3   :  { %2161 = vst [vmem:[%s3201_s3 + $0x58] sm:$0xff] %v2149_v45   ;;  %v1700_v51 = vadd.f32 %v1699_v47, %v1564_v8 }
 0x1c5   :  { %v1729_v11 = vmax.f32 %v1700_v51, 0.0 }
 0x1c7   :  { %v2090_v42 = vpack.c.bf16 %v1729_v11, %v1729_v11 }
 0x1c9   :  { %1855 = vst [vmem:[%s3201_s3 + $0x60] sm:$0xf] %v2090_v42 }

// kernel: cnn_forward.8
= control target key start
LH: loop header
LB: loop body
LE: loop exit
PB: predicated region body
PF: predicated region fallthrough
CT: control target
= control target key end

     0   :  { %s262_s6 = smov 0   ;;  %s305_s0 = inlined_call_operand.vmem [shape: bf16[2,5,2,5,256], index: 0, kind: input, shape index: {}]   ;;  %s306_s1 = inlined_call_operand.vmem [shape: bf16[2,5,5,128], index: 1, kind: output, shape index: {}]  }
   0x1 LB: > { %s225_s7 = sadd.s32 4294967295, %s250_s6   ;;  %p229_p0 = scmp.ge.s32.totalorder %s250_s6, 1  ;;  %s250_s6 = sphi %s262_s6, %s11_s6  }
   0x2   : > { %p87_p1 = scmp.lt.s32.totalorder %s250_s6, 3 }
   0x4   : > { %p88_p2 = pnand %p229_p0, %p87_p1 }
   0x5   : > { %p107_p3 = scmp.lt.s32.totalorder (!%p88_p2), %s225_s7, 1  ;;  %vm152_vm0 = vcmask (!%p88_p2), 1042432   ;;  %vm153_vm1 = vsmask.f32 (!%p88_p2), 2304 }
   0x6   : > { %91 = sbr.rel (%p88_p2) target bundleno = 29 (0x1d), region = 24  ;;  %vm278_vm2 = vmand (!%p88_p2), %vm152_vm0, %vm153_vm1 }
   0xd   : > { %s310_s7 = smov (!%p107_p3, %s225_s7), 1 }
   0xe   : > { %s234_s8 = smul.u32 80, %s310_s7 }
   0xf   : > { %s235_s9 = smul.u32 20, %s310_s7 }
  0x10   : > { %s111_s12 = scalar_lea.vmem %s305_s0, %s234_s8 }
  0x11   : > { %v117_v0 = vld [vmem:[%s111_s12] sm:$0x77]  ;;  %v118_v1 = vld [vmem:[%s111_s12 + $0x8] sm:$0x77]  ;;  %v119_v2 = vld [vmem:[%s111_s12 + $0x10] sm:$0x77]  ;;  %s276_s15 = scalar_lea.vmem %s306_s1, %s235_s9 }
  0x12   : > { %v127_v3 = vmax.bf16 %v118_v1, %v117_v0  ;;  %v120_v4 = vld [vmem:[%s111_s12 + $0x18] sm:$0x77]  ;;  %v121_v6 = vld [vmem:[%s111_s12 + $0x20] sm:$0x77]  ;;  %v122_v7 = vld [vmem:[%s111_s12 + $0x28] sm:$0x77] }
  0x13   : > { %v128_v5 = vmax.bf16 %v120_v4, %v119_v2  ;;  %v129_v9 = vmax.bf16 %v122_v7, %v121_v6  ;;  %v123_v10 = vld [vmem:[%s111_s12 + $0x30] sm:$0x77]  ;;  %v124_v11 = vld [vmem:[%s111_s12 + $0x38] sm:$0x77]  ;;  %v155_v13 = vld [vmem:[%s276_s15] sm:$0x7] }
  0x14   : > { %v137_v8 = vrot.slane %v127_v3, 4  ;;  %v130_v15 = vmax.bf16 %v124_v11, %v123_v10  ;;  %v125_v16 = vld [vmem:[%s111_s12 + $0x40] sm:$0x77]  ;;  %v126_v20 = vld [vmem:[%s111_s12 + $0x48] sm:$0x77] }
  0x15   : > { %v138_v14 = vrot.slane %v128_v5, 4  ;;  %v158_v18 = vld [vmem:[%s276_s15 + $0x4] sm:$0x7]  ;;  %v139_v19 = vrot.slane %v129_v9, 4  ;;  %v161_v22 = vld [vmem:[%s276_s15 + $0x8] sm:$0x7]  ;;  %v131_v24 = vmax.bf16 %v126_v20, %v125_v16 }
  0x16   : > { %v147_v17 = vmax.bf16 %v137_v8, %v127_v3  ;;  %v140_v23 = vrot.slane %v130_v15, 4  ;;  %v164_v27 = vld [vmem:[%s276_s15 + $0xc] sm:$0x7]  ;;  %v167_v32 = vld [vmem:[%s276_s15 + $0x10] sm:$0x7] }
  0x17   : > { %v148_v21 = vmax.bf16 %v138_v14, %v128_v5  ;;  %v149_v26 = vmax.bf16 %v139_v19, %v129_v9  ;;  %v141_v30 = vrot.slane %v131_v24, 4 }
  0x18   : > { %v156_v25 = vsel %vm278_vm2, %v147_v17, %v155_v13  ;;  %v150_v29 = vmax.bf16 %v140_v23, %v130_v15 }
  0x19   : > { %157 = vst [vmem:[%s276_s15] sm:$0x7] %v156_v25  ;;  %v159_v28 = vsel %vm278_vm2, %v148_v21, %v158_v18  ;;  %v162_v31 = vsel %vm278_vm2, %v149_v26, %v161_v22  ;;  %v151_v34 = vmax.bf16 %v141_v30, %v131_v24 }
  0x1a   : > { %160 = vst [vmem:[%s276_s15 + $0x4] sm:$0x7] %v159_v28  ;;  %163 = vst [vmem:[%s276_s15 + $0x8] sm:$0x7] %v162_v31  ;;  %v165_v33 = vsel %vm278_vm2, %v150_v29, %v164_v27 }
  0x1b   : > { %166 = vst [vmem:[%s276_s15 + $0xc] sm:$0x7] %v165_v33  ;;  %v168_v35 = vsel %vm278_vm2, %v151_v34, %v167_v32 }
  0x1c   : > { %169 = vst [vmem:[%s276_s15 + $0x10] sm:$0x7] %v168_v35 }
  0x1d PF: > { %s11_s6 = sadd.s32 1, %s250_s6  }
  0x1e   : > { %p8_p4 = scmp.ge.s32.totalorder %s11_s6, 4  }
  0x20   :  { %10 = sbr.rel (!%p8_p4) target bundleno = 1 (0x1), region = 54 }

// kernel: cnn_forward.9
= control target key start
LH: loop header
LB: loop body
LE: loop exit
PB: predicated region body
PF: predicated region fallthrough
CT: control target
= control target key end

     0   :  { %v402_v36 = vlaneseq  ;;  %v4406_v37 = vmov 1966171168   ;;  %s5750_s0 = inlined_call_operand.vmem [shape: bf16[2,1500], index: 0, kind: input, shape index: {}]   ;;  %s5751_s1 = inlined_call_operand.vmem [shape: bf16[1500,512], index: 1, kind: input, shape index: {}]   ;;  %s5752_s2 = inlined_call_operand.vmem [shape: f32[1,512], index: 2, kind: input, shape index: {}]   ;;  %s5753_s3 = inlined_call_operand.vmem [shape: bf16[512,128], index: 3, kind: input, shape index: {}]   ;;  %s5754_s4 = inlined_call_operand.vmem [shape: f32[1,128], index: 4, kind: input, shape index: {}]   ;;  %s5755_s5 = inlined_call_operand.hbm [shape: f32[2,128], index: 5, kind: output, shape index: {}]  }
   0x1   :  { %v3781_v0 = vld [vmem:[%s5751_s1 + $0x4] ss:$16 sps:$4 sm:$0xff]   ;;  %v3783_v1 = vld [vmem:[%s5751_s1 + $0xc] ss:$16 sps:$4 sm:$0xff]   ;;  %v3785_v2 = vld [vmem:[%s5751_s1] ss:$16 sps:$4 sm:$0xff]   ;;  %v426_v38 = vunpack.c.l.s4 %v4406_v37 }
   0x2   :  { %2401 = vmatprep.subr.bf16.mxu0 %v3781_v0  ;;  %v3786_v3 = vld [vmem:[%s5751_s1 + $0x8] ss:$16 sps:$4 sm:$0xff]   ;;  %2647 = vmatprep.subr.bf16.mxu1 %v3783_v1  ;;  %v3787_v4 = vld [vmem:[%s5751_s1 + $0x24] ss:$16 sps:$4 sm:$0xff]   ;;  %v3789_v5 = vld [vmem:[%s5751_s1 + $0x2c] ss:$16 sps:$4 sm:$0xff]  }
   0x3   :  { %2402 = vmatpush1.bf16.msra.mxu0 %v3785_v2  ;;  %2648 = vmatpush1.bf16.msra.mxu1 %v3786_v3  ;;  %v3791_v6 = vld [vmem:[%s5751_s1 + $0x20] ss:$16 sps:$4 sm:$0xff]   ;;  %v3792_v7 = vld [vmem:[%s5751_s1 + $0x28] ss:$16 sps:$4 sm:$0xff]   ;;  %v3793_v8 = vld [vmem:[%s5751_s1 + $0x44] ss:$16 sps:$4 sm:$0xff]   ;;  %v427_v43 = vunpack.c.0.s8 %v426_v38 }
   0x4   :  { %2403 = vmatprep.subr.bf16.mxu0 %v3787_v4  ;;  %2649 = vmatprep.subr.bf16.mxu1 %v3789_v5  ;;  %v3795_v9 = vld [vmem:[%s5751_s1 + $0x4c] ss:$16 sps:$4 sm:$0xff]   ;;  %v3797_v10 = vld [vmem:[%s5751_s1 + $0x40] ss:$16 sps:$4 sm:$0xff]   ;;  %v3798_v11 = vld [vmem:[%s5751_s1 + $0x48] ss:$16 sps:$4 sm:$0xff]  }
   0x5   :  { %v3799_v12 = vld [vmem:[%s5751_s1 + $0x64] ss:$16 sps:$4 sm:$0xff]   ;;  %v3801_v13 = vld [vmem:[%s5751_s1 + $0x6c] ss:$16 sps:$4 sm:$0xff]   ;;  %v3803_v14 = vld [vmem:[%s5751_s1 + $0x60] ss:$16 sps:$4 sm:$0xff]  }
   0x6   :  { %v3804_v15 = vld [vmem:[%s5751_s1 + $0x68] ss:$16 sps:$4 sm:$0xff]   ;;  %v3805_v16 = vld [vmem:[%s5751_s1 + $0x84] ss:$16 sps:$4 sm:$0xff]   ;;  %v3807_v17 = vld [vmem:[%s5751_s1 + $0x8c] ss:$16 sps:$4 sm:$0xff]  }
   0x7   :  { %2404 = vmatpush1.bf16.msra.mxu0 %v3791_v6  ;;  %2650 = vmatpush1.bf16.msra.mxu1 %v3792_v7  ;;  %v3809_v18 = vld [vmem:[%s5751_s1 + $0x80] ss:$16 sps:$4 sm:$0xff]   ;;  %v3810_v19 = vld [vmem:[%s5751_s1 + $0x88] ss:$16 sps:$4 sm:$0xff]   ;;  %v3811_v20 = vld [vmem:[%s5751_s1 + $0xa4] ss:$16 sps:$4 sm:$0xff]  }
   0x8   :  { %2405 = vmatprep.subr.bf16.mxu0 %v3793_v8  ;;  %2651 = vmatprep.subr.bf16.mxu1 %v3795_v9  ;;  %v3813_v21 = vld [vmem:[%s5751_s1 + $0xac] ss:$16 sps:$4 sm:$0xff]   ;;  %v3815_v22 = vld [vmem:[%s5751_s1 + $0xa0] ss:$16 sps:$4 sm:$0xff]   ;;  %v3816_v23 = vld [vmem:[%s5751_s1 + $0xa8] ss:$16 sps:$4 sm:$0xff]  }
   0x9   :  { %v3817_v24 = vld [vmem:[%s5751_s1 + $0xc4] ss:$16 sps:$4 sm:$0xff]   ;;  %v3819_v25 = vld [vmem:[%s5751_s1 + $0xcc] ss:$16 sps:$4 sm:$0xff]   ;;  %v3821_v26 = vld [vmem:[%s5751_s1 + $0xc0] ss:$16 sps:$4 sm:$0xff]  }
   0xa   :  { %v3822_v27 = vld [vmem:[%s5751_s1 + $0xc8] ss:$16 sps:$4 sm:$0xff]   ;;  %v3823_v28 = vld [vmem:[%s5751_s1 + $0xe4] ss:$16 sps:$4 sm:$0xff]   ;;  %v3825_v29 = vld [vmem:[%s5751_s1 + $0xec] ss:$16 sps:$4 sm:$0xff]  }
   0xb   :  { %2406 = vmatpush1.bf16.msra.mxu0 %v3797_v10  ;;  %2652 = vmatpush1.bf16.msra.mxu1 %v3798_v11  ;;  %v3827_v30 = vld [vmem:[%s5751_s1 + $0xe0] ss:$16 sps:$4 sm:$0xff]   ;;  %v3828_v31 = vld [vmem:[%s5751_s1 + $0xe8] ss:$16 sps:$4 sm:$0xff]   ;;  %v3829_v32 = vld [vmem:[%s5751_s1 + $0x104] ss:$16 sps:$4 sm:$0xff]  }
   0xc   :  { %2407 = vmatprep.subr.bf16.mxu0 %v3799_v12  ;;  %2653 = vmatprep.subr.bf16.mxu1 %v3801_v13  ;;  %v3831_v33 = vld [vmem:[%s5751_s1 + $0x10c] ss:$16 sps:$4 sm:$0xff]   ;;  %v3833_v34 = vld [vmem:[%s5751_s1 + $0x100] ss:$16 sps:$4 sm:$0xff]   ;;  %v3834_v35 = vld [vmem:[%s5751_s1 + $0x108] ss:$16 sps:$4 sm:$0xff]  }
   0xd   :  { %v3835_v39 = vld [vmem:[%s5751_s1 + $0x124] ss:$16 sps:$4 sm:$0xff]   ;;  %v3837_v40 = vld [vmem:[%s5751_s1 + $0x12c] ss:$16 sps:$4 sm:$0xff]   ;;  %v3839_v41 = vld [vmem:[%s5751_s1 + $0x120] ss:$16 sps:$4 sm:$0xff]  }
   0xe   :  { %v4556_v42 = vshrl.u32 %v402_v36, 7  ;;  %v3840_v44 = vld [vmem:[%s5751_s1 + $0x128] ss:$16 sps:$4 sm:$0xff]   ;;  %v3841_v45 = vld [vmem:[%s5751_s1 + $0x144] ss:$16 sps:$4 sm:$0xff]  }
   0xf   :  { %2408 = vmatpush1.bf16.msra.mxu0 %v3803_v14  ;;  %2654 = vmatpush1.bf16.msra.mxu1 %v3804_v15  ;;  %v3843_v46 = vld [vmem:[%s5751_s1 + $0x14c] ss:$16 sps:$4 sm:$0xff]   ;;  %v3845_v47 = vld [vmem:[%s5751_s1 + $0x140] ss:$16 sps:$4 sm:$0xff]   ;;  %v3846_v48 = vld [vmem:[%s5751_s1 + $0x148] ss:$16 sps:$4 sm:$0xff]  }
  0x10   :  { %2409 = vmatprep.subr.bf16.mxu0 %v3805_v16  ;;  %2655 = vmatprep.subr.bf16.mxu1 %v3807_v17  ;;  %v4574_v49 = vsub.s32 %v427_v43, %v4556_v42  ;;  %v3847_v50 = vld [vmem:[%s5751_s1 + $0x164] ss:$16 sps:$4 sm:$0xff]   ;;  %v3849_v51 = vld [vmem:[%s5751_s1 + $0x16c] ss:$16 sps:$4 sm:$0xff]   ;;  %v3851_v53 = vld [vmem:[%s5751_s1 + $0x160] ss:$16 sps:$4 sm:$0xff]  }
  0x11   :  { %v4585_v52 = vld [vmem:[%s5750_s0] sm:$0xff]  ;;  %v3852_v55 = vld [vmem:[%s5751_s1 + $0x168] ss:$16 sps:$4 sm:$0xff]   ;;  %v3855_v57 = vld [vmem:[%s5751_s1 + $0x18c] ss:$16 sps:$4 sm:$0xff]  }
  0x12   :  { %v431_v54 = vrot.slane %v4585_v52, %v4574_v49  ;;  %v3853_v56 = vld [vmem:[%s5751_s1 + $0x184] ss:$16 sps:$4 sm:$0xff]   ;;  %v3857_v59 = vld [vmem:[%s5751_s1 + $0x180] ss:$16 sps:$4 sm:$0xff]   ;;  %v3858_v61 = vld [vmem:[%s5751_s1 + $0x188] ss:$16 sps:$4 sm:$0xff]  }
  0x13   :  { %2410 = vmatpush1.bf16.msra.mxu0 %v3809_v18  ;;  %2656 = vmatpush1.bf16.msra.mxu1 %v3810_v19  ;;  %v3859_v62 = vld [vmem:[%s5751_s1 + $0x1a4] ss:$16 sps:$4 sm:$0xff]   ;;  %v3861_v63 = vld [vmem:[%s5751_s1 + $0x1ac] ss:$16 sps:$4 sm:$0xff]   ;;  %v3863_v0 = vld [vmem:[%s5751_s1 + $0x1a0] ss:$16 sps:$4 sm:$0xff]  }
  0x14   :  { %2411 = vmatprep.subr.bf16.mxu0 %v3811_v20  ;;  %2657 = vmatprep.subr.bf16.mxu1 %v3813_v21  ;;  %v439_v58 = vcombine.high %v431_v54, %v431_v54  ;;  %v3864_v1 = vld [vmem:[%s5751_s1 + $0x1a8] ss:$16 sps:$4 sm:$0xff]   ;;  %v3865_v2 = vld [vmem:[%s5751_s1 + $0x1c4] ss:$16 sps:$4 sm:$0xff]   ;;  %v3867_v3 = vld [vmem:[%s5751_s1 + $0x1cc] ss:$16 sps:$4 sm:$0xff]   ;;  %v4654_v13 = vrot.slane %v431_v54, %v4574_v49 }
  0x15   :  { %v3869_v4 = vld [vmem:[%s5751_s1 + $0x1c0] ss:$16 sps:$4 sm:$0xff]   ;;  %v3870_v5 = vld [vmem:[%s5751_s1 + $0x1c8] ss:$16 sps:$4 sm:$0xff]   ;;  %v3871_v6 = vld [vmem:[%s5751_s1 + $0x1e4] ss:$16 sps:$4 sm:$0xff]  }
  0x16   :  { %v461_v60 = vrot.slane %v439_v58, %v4574_v49  ;;  %v3873_v7 = vld [vmem:[%s5751_s1 + $0x1ec] ss:$16 sps:$4 sm:$0xff]   ;;  %v3875_v8 = vld [vmem:[%s5751_s1 + $0x1e0] ss:$16 sps:$4 sm:$0xff]   ;;  %v3876_v9 = vld [vmem:[%s5751_s1 + $0x1e8] ss:$16 sps:$4 sm:$0xff]  }
  0x17   :  { %2412 = vmatpush1.bf16.msra.mxu0 %v3815_v22  ;;  %2658 = vmatpush1.bf16.msra.mxu1 %v3816_v23  ;;  %v3879_v10 = vld [vmem:[%s5751_s1 + $0x204] ss:$16 sps:$4 sm:$0xff]   ;;  %v3882_v11 = vld [vmem:[%s5751_s1 + $0x20c] ss:$16 sps:$4 sm:$0xff]   ;;  %v3877_v12 = vld [vmem:[%s5751_s1 + $0x200] ss:$16 sps:$4 sm:$0xff]  }
  0x18   :  { %2413 = vmatprep.subr.bf16.mxu0 %v3817_v24  ;;  %2659 = vmatprep.subr.bf16.mxu1 %v3819_v25  ;;  %v3880_v14 = vld [vmem:[%s5751_s1 + $0x208] ss:$16 sps:$4 sm:$0xff]   ;;  %v3885_v15 = vld [vmem:[%s5751_s1 + $0x224] ss:$16 sps:$4 sm:$0xff]   ;;  %v3888_v16 = vld [vmem:[%s5751_s1 + $0x22c] ss:$16 sps:$4 sm:$0xff]   ;;  %v471_v17 = vcombine.high %v461_v60, %v461_v60 }
  0x19   :  { %2433 = vmatprep.mubr.bf16.mxu0 %v461_v60  ;;  %2679 = vmatprep.mubr.bf16.mxu1 %v461_v60  ;;  %v3883_v18 = vld [vmem:[%s5751_s1 + $0x220] ss:$16 sps:$4 sm:$0xff]   ;;  %v3886_v19 = vld [vmem:[%s5751_s1 + $0x228] ss:$16 sps:$4 sm:$0xff]   ;;  %v3891_v20 = vld [vmem:[%s5751_s1 + $0x244] ss:$16 sps:$4 sm:$0xff]  }
  0x1a   :  { %v3894_v21 = vld [vmem:[%s5751_s1 + $0x24c] ss:$16 sps:$4 sm:$0xff]   ;;  %v3889_v22 = vld [vmem:[%s5751_s1 + $0x240] ss:$16 sps:$4 sm:$0xff]   ;;  %v3892_v23 = vld [vmem:[%s5751_s1 + $0x248] ss:$16 sps:$4 sm:$0xff]  }
  0x1b   :  { %2414 = vmatpush1.bf16.msra.mxu0 %v3821_v26  ;;  %2660 = vmatpush1.bf16.msra.mxu1 %v3822_v27  ;;  %v3897_v24 = vld [vmem:[%s5751_s1 + $0x264] ss:$16 sps:$4 sm:$0xff]   ;;  %v3900_v25 = vld [vmem:[%s5751_s1 + $0x26c] ss:$16 sps:$4 sm:$0xff]   ;;  %v3895_v26 = vld [vmem:[%s5751_s1 + $0x260] ss:$16 sps:$4 sm:$0xff]  }
  0x1c   :  { %2415 = vmatprep.subr.bf16.mxu0 %v3823_v28  ;;  %2661 = vmatprep.subr.bf16.mxu1 %v3825_v29  ;;  %v3898_v27 = vld [vmem:[%s5751_s1 + $0x268] ss:$16 sps:$4 sm:$0xff]   ;;  %v3903_v28 = vld [vmem:[%s5751_s1 + $0x284] ss:$16 sps:$4 sm:$0xff]   ;;  %v3906_v29 = vld [vmem:[%s5751_s1 + $0x28c] ss:$16 sps:$4 sm:$0xff]  }
  0x1d   :  { %v3915_v37 = vld [vmem:[%s5751_s1 + $0x2c4] ss:$16 sps:$4 sm:$0xff]   ;;  %v3918_v38 = vld [vmem:[%s5751_s1 + $0x2cc] ss:$16 sps:$4 sm:$0xff]   ;;  %v3931_v54 = vld [vmem:[%s5751_s1 + $0x320] ss:$16 sps:$4 sm:$0xff]  }
  0x1e   :  { %v3924_v43 = vld [vmem:[%s5751_s1 + $0x2ec] ss:$16 sps:$4 sm:$0xff]   ;;  %v3937_v58 = vld [vmem:[%s5751_s1 + $0x340] ss:$16 sps:$4 sm:$0xff]   ;;  %v3945_v60 = vld [vmem:[%s5751_s1 + $0x364] ss:$16 sps:$4 sm:$0xff]  }
  0x1f   :  { %2416 = vmatpush1.bf16.msra.mxu0 %v3827_v30  ;;  %2662 = vmatpush1.bf16.msra.mxu1 %v3828_v31  ;;  %v3901_v30 = vld [vmem:[%s5751_s1 + $0x280] ss:$16 sps:$4 sm:$0xff]   ;;  %v3904_v31 = vld [vmem:[%s5751_s1 + $0x288] ss:$16 sps:$4 sm:$0xff]  }
  0x20   :  { %2417 = vmatprep.subr.bf16.mxu0 %v3829_v32  ;;  %2663 = vmatprep.subr.bf16.mxu1 %v3831_v33  ;;  %v3909_v32 = vld [vmem:[%s5751_s1 + $0x2a4] ss:$16 sps:$4 sm:$0xff]   ;;  %v3912_v33 = vld [vmem:[%s5751_s1 + $0x2ac] ss:$16 sps:$4 sm:$0xff]  }
  0x23   :  { %2418 = vmatpush1.bf16.msra.mxu0 %v3833_v34  ;;  %2664 = vmatpush1.bf16.msra.mxu1 %v3834_v35  ;;  %v3907_v34 = vld [vmem:[%s5751_s1 + $0x2a0] ss:$16 sps:$4 sm:$0xff]   ;;  %v3910_v35 = vld [vmem:[%s5751_s1 + $0x2a8] ss:$16 sps:$4 sm:$0xff]  }
  0x24   :  { %2419 = vmatprep.subr.bf16.mxu0 %v3835_v39  ;;  %2665 = vmatprep.subr.bf16.mxu1 %v3837_v40  ;;  %v3913_v39 = vld [vmem:[%s5751_s1 + $0x2c0] ss:$16 sps:$4 sm:$0xff]   ;;  %v3916_v40 = vld [vmem:[%s5751_s1 + $0x2c8] ss:$16 sps:$4 sm:$0xff]  }
  0x27   :  { %2420 = vmatpush1.bf16.msra.mxu0 %v3839_v41  ;;  %2666 = vmatpush1.bf16.msra.mxu1 %v3840_v44  ;;  %v3921_v41 = vld [vmem:[%s5751_s1 + $0x2e4] ss:$16 sps:$4 sm:$0xff]   ;;  %v3919_v44 = vld [vmem:[%s5751_s1 + $0x2e0] ss:$16 sps:$4 sm:$0xff]  }
  0x28   :  { %2421 = vmatprep.subr.bf16.mxu0 %v3841_v45  ;;  %2667 = vmatprep.subr.bf16.mxu1 %v3843_v46  ;;  %v3922_v45 = vld [vmem:[%s5751_s1 + $0x2e8] ss:$16 sps:$4 sm:$0xff]   ;;  %v3927_v46 = vld [vmem:[%s5751_s1 + $0x304] ss:$16 sps:$4 sm:$0xff]  }
  0x2b   :  { %2422 = vmatpush1.bf16.msra.mxu0 %v3845_v47  ;;  %2668 = vmatpush1.bf16.msra.mxu1 %v3846_v48  ;;  %v3930_v47 = vld [vmem:[%s5751_s1 + $0x30c] ss:$16 sps:$4 sm:$0xff]   ;;  %v3925_v48 = vld [vmem:[%s5751_s1 + $0x300] ss:$16 sps:$4 sm:$0xff]  }
  0x2c   :  { %2423 = vmatprep.subr.bf16.mxu0 %v3847_v50  ;;  %2669 = vmatprep.subr.bf16.mxu1 %v3849_v51  ;;  %v3928_v50 = vld [vmem:[%s5751_s1 + $0x308] ss:$16 sps:$4 sm:$0xff]   ;;  %v3933_v51 = vld [vmem:[%s5751_s1 + $0x324] ss:$16 sps:$4 sm:$0xff]  }
  0x2f   :  { %2424 = vmatpush1.bf16.msra.mxu0 %v3851_v53  ;;  %2670 = vmatpush1.bf16.msra.mxu1 %v3852_v55  ;;  %v3936_v53 = vld [vmem:[%s5751_s1 + $0x32c] ss:$16 sps:$4 sm:$0xff]   ;;  %v3934_v55 = vld [vmem:[%s5751_s1 + $0x328] ss:$16 sps:$4 sm:$0xff]  }
  0x30   :  { %2425 = vmatprep.subr.bf16.mxu0 %v3853_v56  ;;  %2671 = vmatprep.subr.bf16.mxu1 %v3855_v57  ;;  %v3939_v56 = vld [vmem:[%s5751_s1 + $0x344] ss:$16 sps:$4 sm:$0xff]   ;;  %v3942_v57 = vld [vmem:[%s5751_s1 + $0x34c] ss:$16 sps:$4 sm:$0xff]  }
  0x33   :  { %2426 = vmatpush1.bf16.msra.mxu0 %v3857_v59  ;;  %2672 = vmatpush1.bf16.msra.mxu1 %v3858_v61  ;;  %v3940_v59 = vld [vmem:[%s5751_s1 + $0x348] ss:$16 sps:$4 sm:$0xff]   ;;  %v3948_v61 = vld [vmem:[%s5751_s1 + $0x36c] ss:$16 sps:$4 sm:$0xff]  }
  0x34   :  { %2427 = vmatprep.subr.bf16.mxu0 %v3859_v62  ;;  %2673 = vmatprep.subr.bf16.mxu1 %v3861_v63  ;;  %v3943_v62 = vld [vmem:[%s5751_s1 + $0x360] ss:$16 sps:$4 sm:$0xff]   ;;  %v3946_v63 = vld [vmem:[%s5751_s1 + $0x368] ss:$16 sps:$4 sm:$0xff]  }
  0x37   :  { %2428 = vmatpush1.bf16.msra.mxu0 %v3863_v0  ;;  %2674 = vmatpush1.bf16.msra.mxu1 %v3864_v1  ;;  %v3951_v0 = vld [vmem:[%s5751_s1 + $0x384] ss:$16 sps:$4 sm:$0xff]   ;;  %v3954_v1 = vld [vmem:[%s5751_s1 + $0x38c] ss:$16 sps:$4 sm:$0xff]  }
  0x38   :  { %2429 = vmatprep.subr.bf16.mxu0 %v3865_v2  ;;  %2675 = vmatprep.subr.bf16.mxu1 %v3867_v3  ;;  %v3949_v2 = vld [vmem:[%s5751_s1 + $0x380] ss:$16 sps:$4 sm:$0xff]   ;;  %v3952_v3 = vld [vmem:[%s5751_s1 + $0x388] ss:$16 sps:$4 sm:$0xff]  }
  0x3b   :  { %2430 = vmatpush1.bf16.msra.mxu0 %v3869_v4  ;;  %2676 = vmatpush1.bf16.msra.mxu1 %v3870_v5  ;;  %v3957_v4 = vld [vmem:[%s5751_s1 + $0x3a4] ss:$16 sps:$4 sm:$0xff]   ;;  %v3960_v5 = vld [vmem:[%s5751_s1 + $0x3ac] ss:$16 sps:$4 sm:$0xff]  }
  0x3c   :  { %2431 = vmatprep.subr.bf16.mxu0 %v3871_v6  ;;  %2677 = vmatprep.subr.bf16.mxu1 %v3873_v7  ;;  %v3955_v6 = vld [vmem:[%s5751_s1 + $0x3a0] ss:$16 sps:$4 sm:$0xff]   ;;  %v3958_v7 = vld [vmem:[%s5751_s1 + $0x3a8] ss:$16 sps:$4 sm:$0xff]  }
  0x3f   :  { %2432 = vmatpush1.bf16.msra.mxu0 %v3875_v8  ;;  %2678 = vmatpush1.bf16.msra.mxu1 %v3876_v9  ;;  %v3963_v8 = vld [vmem:[%s5751_s1 + $0x3c4] ss:$16 sps:$4 sm:$0xff]   ;;  %v3966_v9 = vld [vmem:[%s5751_s1 + $0x3cc] ss:$16 sps:$4 sm:$0xff]  }
  0x40   :  { %2442 = vmatprep.subr.bf16.mxu0 %v3879_v10  ;;  %2688 = vmatprep.subr.bf16.mxu1 %v3882_v11  ;;  %v424_v10 = vcombine.high %v4585_v52, %v4585_v52  ;;  %v3961_v11 = vld [vmem:[%s5751_s1 + $0x3c0] ss:$16 sps:$4 sm:$0xff]   ;;  %v3972_v52 = vld [vmem:[%s5751_s1 + $0x3ec] ss:$16 sps:$4 sm:$0xff]  }
  0x42   :  { %2434 = vmatmul.mubr.bf16.vlgmr.msra.gmra.mrb[0].mxu0 %v4654_v13  ;;  %2680 = vmatmul.mubr.bf16.vlgmr.msra.gmra.mrb[0].mxu1 %v4654_v13 }
  0x43   :  { %2443 = vmatpush1.bf16.msra.mxu0 %v3877_v12  ;;  %2689 = vmatpush1.bf16.msra.mxu1 %v3880_v14  ;;  %v3964_v12 = vld [vmem:[%s5751_s1 + $0x3c8] ss:$16 sps:$4 sm:$0xff]   ;;  %v3969_v14 = vld [vmem:[%s5751_s1 + $0x3e4] ss:$16 sps:$4 sm:$0xff]  }
  0x44   :  { %2444 = vmatprep.subr.bf16.mxu0 %v3885_v15  ;;  %2690 = vmatprep.subr.bf16.mxu1 %v3888_v16  ;;  %v4838_v15 = vrot.slane %v424_v10, %v4574_v49  ;;  %v3967_v16 = vld [vmem:[%s5751_s1 + $0x3e0] ss:$16 sps:$4 sm:$0xff]  }
  0x45   :  { %2474 = vmatprep.mubr.bf16.mxu0 %v471_v17  ;;  %2720 = vmatprep.mubr.bf16.mxu1 %v471_v17  ;;  %v3970_v17 = vld [vmem:[%s5751_s1 + $0x3e8] ss:$16 sps:$4 sm:$0xff]   ;;  %v4045_v10 = vld [vmem:[%s5751_s1 + $0x580] ss:$16 sps:$4 sm:$0xff]  }
  0x47   :  { %2445 = vmatpush1.bf16.msra.mxu0 %v3883_v18  ;;  %2691 = vmatpush1.bf16.msra.mxu1 %v3886_v19  ;;  %v3975_v18 = vld [vmem:[%s5751_s1 + $0x404] ss:$16 sps:$4 sm:$0xff]   ;;  %v3978_v19 = vld [vmem:[%s5751_s1 + $0x40c] ss:$16 sps:$4 sm:$0xff]  }
  0x48   :  { %2446 = vmatprep.subr.bf16.mxu0 %v3891_v20  ;;  %2692 = vmatprep.subr.bf16.mxu1 %v3894_v21  ;;  %v440_v20 = vcombine.high %v4838_v15, %v4838_v15  ;;  %v3973_v21 = vld [vmem:[%s5751_s1 + $0x400] ss:$16 sps:$4 sm:$0xff]  }
  0x4b   :  { %2447 = vmatpush1.bf16.msra.mxu0 %v3889_v22  ;;  %2693 = vmatpush1.bf16.msra.mxu1 %v3892_v23  ;;  %v469_v22 = vcombine.high %v4654_v13, %v4654_v13  ;;  %v3976_v23 = vld [vmem:[%s5751_s1 + $0x408] ss:$16 sps:$4 sm:$0xff]   ;;  %v3979_v13 = vld [vmem:[%s5751_s1 + $0x420] ss:$16 sps:$4 sm:$0xff]  }
  0x4c   :  { %2448 = vmatprep.subr.bf16.mxu0 %v3897_v24  ;;  %2694 = vmatprep.subr.bf16.mxu1 %v3900_v25  ;;  %v3981_v24 = vld [vmem:[%s5751_s1 + $0x424] ss:$16 sps:$4 sm:$0xff]   ;;  %v3984_v25 = vld [vmem:[%s5751_s1 + $0x42c] ss:$16 sps:$4 sm:$0xff]  }
  0x4f   :  { %2449 = vmatpush1.bf16.msra.mxu0 %v3895_v26  ;;  %2695 = vmatpush1.bf16.msra.mxu1 %v3898_v27  ;;  %v4869_v26 = vrot.slane %v440_v20, %v4574_v49  ;;  %v3982_v27 = vld [vmem:[%s5751_s1 + $0x428] ss:$16 sps:$4 sm:$0xff]  }
  0x50   :  { %2450 = vmatprep.subr.bf16.mxu0 %v3903_v28  ;;  %2696 = vmatprep.subr.bf16.mxu1 %v3906_v29  ;;  %v3987_v28 = vld [vmem:[%s5751_s1 + $0x444] ss:$16 sps:$4 sm:$0xff]   ;;  %v3990_v29 = vld [vmem:[%s5751_s1 + $0x44c] ss:$16 sps:$4 sm:$0xff]   ;;  %v4060_v20 = vld [vmem:[%s5751_s1 + $0x5c8] ss:$16 sps:$4 sm:$0xff]  }
  0x53   :  { %2451 = vmatpush1.bf16.msra.mxu0 %v3901_v30  ;;  %2697 = vmatpush1.bf16.msra.mxu1 %v3904_v31  ;;  %v3985_v30 = vld [vmem:[%s5751_s1 + $0x440] ss:$16 sps:$4 sm:$0xff]   ;;  %v3988_v31 = vld [vmem:[%s5751_s1 + $0x448] ss:$16 sps:$4 sm:$0xff]  }
  0x54   :  { %2452 = vmatprep.subr.bf16.mxu0 %v3909_v32  ;;  %2698 = vmatprep.subr.bf16.mxu1 %v3912_v33  ;;  %v3993_v32 = vld [vmem:[%s5751_s1 + $0x464] ss:$16 sps:$4 sm:$0xff]   ;;  %v3996_v33 = vld [vmem:[%s5751_s1 + $0x46c] ss:$16 sps:$4 sm:$0xff]  }
  0x57   :  { %2453 = vmatpush1.bf16.msra.mxu0 %v3907_v34  ;;  %2699 = vmatpush1.bf16.msra.mxu1 %v3910_v35  ;;  %v3991_v34 = vld [vmem:[%s5751_s1 + $0x460] ss:$16 sps:$4 sm:$0xff]   ;;  %v3994_v35 = vld [vmem:[%s5751_s1 + $0x468] ss:$16 sps:$4 sm:$0xff]  }
  0x58   :  { %2454 = vmatprep.subr.bf16.mxu0 %v3915_v37  ;;  %2700 = vmatprep.subr.bf16.mxu1 %v3918_v38  ;;  %v3999_v37 = vld [vmem:[%s5751_s1 + $0x484] ss:$16 sps:$4 sm:$0xff]   ;;  %v4002_v38 = vld [vmem:[%s5751_s1 + $0x48c] ss:$16 sps:$4 sm:$0xff]  }
  0x5b   :  { %2455 = vmatpush1.bf16.msra.mxu0 %v3913_v39  ;;  %2701 = vmatpush1.bf16.msra.mxu1 %v3916_v40  ;;  %v3997_v39 = vld [vmem:[%s5751_s1 + $0x480] ss:$16 sps:$4 sm:$0xff]   ;;  %v4000_v40 = vld [vmem:[%s5751_s1 + $0x488] ss:$16 sps:$4 sm:$0xff]  }
  0x5c   :  { %2456 = vmatprep.subr.bf16.mxu0 %v3921_v41  ;;  %2702 = vmatprep.subr.bf16.mxu1 %v3924_v43  ;;  %v4005_v41 = vld [vmem:[%s5751_s1 + $0x4a4] ss:$16 sps:$4 sm:$0xff]   ;;  %v4008_v43 = vld [vmem:[%s5751_s1 + $0x4ac] ss:$16 sps:$4 sm:$0xff]  }
  0x5f   :  { %2457 = vmatpush1.bf16.msra.mxu0 %v3919_v44  ;;  %2703 = vmatpush1.bf16.msra.mxu1 %v3922_v45  ;;  %v4003_v44 = vld [vmem:[%s5751_s1 + $0x4a0] ss:$16 sps:$4 sm:$0xff]   ;;  %v4006_v45 = vld [vmem:[%s5751_s1 + $0x4a8] ss:$16 sps:$4 sm:$0xff]  }
  0x60   :  { %2458 = vmatprep.subr.bf16.mxu0 %v3927_v46  ;;  %2704 = vmatprep.subr.bf16.mxu1 %v3930_v47  ;;  %v4011_v46 = vld [vmem:[%s5751_s1 + $0x4c4] ss:$16 sps:$4 sm:$0xff]   ;;  %v4014_v47 = vld [vmem:[%s5751_s1 + $0x4cc] ss:$16 sps:$4 sm:$0xff]  }
  0x63   :  { %2459 = vmatpush1.bf16.msra.mxu0 %v3925_v48  ;;  %2705 = vmatpush1.bf16.msra.mxu1 %v3928_v50  ;;  %v4009_v48 = vld [vmem:[%s5751_s1 + $0x4c0] ss:$16 sps:$4 sm:$0xff]   ;;  %v4012_v50 = vld [vmem:[%s5751_s1 + $0x4c8] ss:$16 sps:$4 sm:$0xff]  }
  0x64   :  { %2460 = vmatprep.subr.bf16.mxu0 %v3933_v51  ;;  %2706 = vmatprep.subr.bf16.mxu1 %v3936_v53  ;;  %v4017_v51 = vld [vmem:[%s5751_s1 + $0x4e4] ss:$16 sps:$4 sm:$0xff]   ;;  %v4020_v53 = vld [vmem:[%s5751_s1 + $0x4ec] ss:$16 sps:$4 sm:$0xff]  }
  0x67   :  { %2461 = vmatpush1.bf16.msra.mxu0 %v3931_v54  ;;  %2707 = vmatpush1.bf16.msra.mxu1 %v3934_v55  ;;  %v4015_v54 = vld [vmem:[%s5751_s1 + $0x4e0] ss:$16 sps:$4 sm:$0xff]   ;;  %v4018_v55 = vld [vmem:[%s5751_s1 + $0x4e8] ss:$16 sps:$4 sm:$0xff]  }
  0x68   :  { %2462 = vmatprep.subr.bf16.mxu0 %v3939_v56  ;;  %2708 = vmatprep.subr.bf16.mxu1 %v3942_v57  ;;  %v4023_v56 = vld [vmem:[%s5751_s1 + $0x504] ss:$16 sps:$4 sm:$0xff]   ;;  %v4026_v57 = vld [vmem:[%s5751_s1 + $0x50c] ss:$16 sps:$4 sm:$0xff]  }
  0x6b   :  { %2463 = vmatpush1.bf16.msra.mxu0 %v3937_v58  ;;  %2709 = vmatpush1.bf16.msra.mxu1 %v3940_v59  ;;  %v4021_v58 = vld [vmem:[%s5751_s1 + $0x500] ss:$16 sps:$4 sm:$0xff]   ;;  %v4024_v59 = vld [vmem:[%s5751_s1 + $0x508] ss:$16 sps:$4 sm:$0xff]  }
  0x6c   :  { %2464 = vmatprep.subr.bf16.mxu0 %v3945_v60  ;;  %2710 = vmatprep.subr.bf16.mxu1 %v3948_v61  ;;  %v4029_v60 = vld [vmem:[%s5751_s1 + $0x524] ss:$16 sps:$4 sm:$0xff]   ;;  %v4032_v61 = vld [vmem:[%s5751_s1 + $0x52c] ss:$16 sps:$4 sm:$0xff]  }
  0x6f   :  { %2465 = vmatpush1.bf16.msra.mxu0 %v3943_v62  ;;  %2711 = vmatpush1.bf16.msra.mxu1 %v3946_v63  ;;  %v4027_v62 = vld [vmem:[%s5751_s1 + $0x520] ss:$16 sps:$4 sm:$0xff]   ;;  %v4030_v63 = vld [vmem:[%s5751_s1 + $0x528] ss:$16 sps:$4 sm:$0xff]  }
  0x70   :  { %2466 = vmatprep.subr.bf16.mxu0 %v3951_v0  ;;  %2712 = vmatprep.subr.bf16.mxu1 %v3954_v1  ;;  %v4035_v0 = vld [vmem:[%s5751_s1 + $0x544] ss:$16 sps:$4 sm:$0xff]   ;;  %v4038_v1 = vld [vmem:[%s5751_s1 + $0x54c] ss:$16 sps:$4 sm:$0xff]  }
  0x73   :  { %2467 = vmatpush1.bf16.msra.mxu0 %v3949_v2  ;;  %2713 = vmatpush1.bf16.msra.mxu1 %v3952_v3  ;;  %v4033_v2 = vld [vmem:[%s5751_s1 + $0x540] ss:$16 sps:$4 sm:$0xff]   ;;  %v4036_v3 = vld [vmem:[%s5751_s1 + $0x548] ss:$16 sps:$4 sm:$0xff]  }
  0x74   :  { %2468 = vmatprep.subr.bf16.mxu0 %v3957_v4  ;;  %2714 = vmatprep.subr.bf16.mxu1 %v3960_v5  ;;  %v4041_v4 = vld [vmem:[%s5751_s1 + $0x564] ss:$16 sps:$4 sm:$0xff]   ;;  %v4044_v5 = vld [vmem:[%s5751_s1 + $0x56c] ss:$16 sps:$4 sm:$0xff]  }
  0x77   :  { %2469 = vmatpush1.bf16.msra.mxu0 %v3955_v6  ;;  %2715 = vmatpush1.bf16.msra.mxu1 %v3958_v7  ;;  %v4039_v6 = vld [vmem:[%s5751_s1 + $0x560] ss:$16 sps:$4 sm:$0xff]   ;;  %v4042_v7 = vld [vmem:[%s5751_s1 + $0x568] ss:$16 sps:$4 sm:$0xff]  }
  0x78   :  { %2470 = vmatprep.subr.bf16.mxu0 %v3963_v8  ;;  %2716 = vmatprep.subr.bf16.mxu1 %v3966_v9  ;;  %v4047_v8 = vld [vmem:[%s5751_s1 + $0x584] ss:$16 sps:$4 sm:$0xff]   ;;  %v4050_v9 = vld [vmem:[%s5751_s1 + $0x58c] ss:$16 sps:$4 sm:$0xff]  }
  0x7b   :  { %2471 = vmatpush1.bf16.msra.mxu0 %v3961_v11  ;;  %2717 = vmatpush1.bf16.msra.mxu1 %v3964_v12  ;;  %v4048_v11 = vld [vmem:[%s5751_s1 + $0x588] ss:$16 sps:$4 sm:$0xff]   ;;  %v4053_v12 = vld [vmem:[%s5751_s1 + $0x5a4] ss:$16 sps:$4 sm:$0xff]  }
  0x7c   :  { %2472 = vmatprep.subr.bf16.mxu0 %v3969_v14  ;;  %2718 = vmatprep.subr.bf16.mxu1 %v3972_v52  ;;  %v4056_v14 = vld [vmem:[%s5751_s1 + $0x5ac] ss:$16 sps:$4 sm:$0xff]   ;;  %v4051_v52 = vld [vmem:[%s5751_s1 + $0x5a0] ss:$16 sps:$4 sm:$0xff]  }
  0x7f   :  { %2473 = vmatpush1.bf16.msra.mxu0 %v3967_v16  ;;  %2719 = vmatpush1.bf16.msra.mxu1 %v3970_v17  ;;  %v4054_v16 = vld [vmem:[%s5751_s1 + $0x5a8] ss:$16 sps:$4 sm:$0xff]   ;;  %v4059_v17 = vld [vmem:[%s5751_s1 + $0x5c4] ss:$16 sps:$4 sm:$0xff]  }
  0x80   :  { %2483 = vmatprep.subr.bf16.mxu0 %v3975_v18  ;;  %2729 = vmatprep.subr.bf16.mxu1 %v3978_v19  ;;  %v4062_v18 = vld [vmem:[%s5751_s1 + $0x5cc] ss:$16 sps:$4 sm:$0xff]   ;;  %v4057_v19 = vld [vmem:[%s5751_s1 + $0x5c0] ss:$16 sps:$4 sm:$0xff]  }
  0x82   :  { %2475 = vmatmul.mubr.bf16.vlgmr.msra.gmra.mrb[0].mxu0 %v469_v22  ;;  %2721 = vmatmul.mubr.bf16.vlgmr.msra.gmra.mrb[0].mxu1 %v469_v22  ;;  %v4068_v22 = vld [vmem:[%s5751_s1 + $0x5ec] ss:$16 sps:$4 sm:$0xff]  }
  0x83   :  { %2484 = vmatpush1.bf16.msra.mxu0 %v3973_v21  ;;  %2730 = vmatpush1.bf16.msra.mxu1 %v3976_v23  ;;  %v4065_v21 = vld [vmem:[%s5751_s1 + $0x5e4] ss:$16 sps:$4 sm:$0xff]   ;;  %v4063_v23 = vld [vmem:[%s5751_s1 + $0x5e0] ss:$16 sps:$4 sm:$0xff]  }
  0x84   :  { %2485 = vmatprep.subr.bf16.mxu0 %v3981_v24  ;;  %2731 = vmatprep.subr.bf16.mxu1 %v3984_v25  ;;  %v4066_v24 = vld [vmem:[%s5751_s1 + $0x5e8] ss:$16 sps:$4 sm:$0xff]   ;;  %v4072_v25 = vld [vmem:[%s5751_s1 + $0x604] ss:$16 sps:$4 sm:$0xff]  }
  0x85   :  { %2515 = vmatprep.mubr.bf16.mxu0 %v4869_v26  ;;  %2761 = vmatprep.mubr.bf16.mxu1 %v4869_v26 }
  0x87   :  { %2486 = vmatpush1.bf16.msra.mxu0 %v3979_v13  ;;  %2732 = vmatpush1.bf16.msra.mxu1 %v3982_v27  ;;  %v4075_v13 = vld [vmem:[%s5751_s1 + $0x60c] ss:$16 sps:$4 sm:$0xff]   ;;  %v4070_v27 = vld [vmem:[%s5751_s1 + $0x600] ss:$16 sps:$4 sm:$0xff]  }
  0x88   :  { %2487 = vmatprep.subr.bf16.mxu0 %v3987_v28  ;;  %2733 = vmatprep.subr.bf16.mxu1 %v3990_v29  ;;  %v5058_v28 = vrot.slane %v4838_v15, %v4574_v49  ;;  %v4073_v29 = vld [vmem:[%s5751_s1 + $0x608] ss:$16 sps:$4 sm:$0xff]   ;;  %v472_v15 = vcombine.high %v4869_v26, %v4869_v26  ;;  %v4084_v26 = vld [vmem:[%s5751_s1 + $0x644] ss:$16 sps:$4 sm:$0xff]  }
  0x8b   :  { %2488 = vmatpush1.bf16.msra.mxu0 %v3985_v30  ;;  %2734 = vmatpush1.bf16.msra.mxu1 %v3988_v31  ;;  %v4078_v30 = vld [vmem:[%s5751_s1 + $0x624] ss:$16 sps:$4 sm:$0xff]   ;;  %v4081_v31 = vld [vmem:[%s5751_s1 + $0x62c] ss:$16 sps:$4 sm:$0xff]  }
  0x8c   :  { %2489 = vmatprep.subr.bf16.mxu0 %v3993_v32  ;;  %2735 = vmatprep.subr.bf16.mxu1 %v3996_v33  ;;  %v4076_v32 = vld [vmem:[%s5751_s1 + $0x620] ss:$16 sps:$4 sm:$0xff]   ;;  %v4079_v33 = vld [vmem:[%s5751_s1 + $0x628] ss:$16 sps:$4 sm:$0xff]  }
  0x8f   :  { %2490 = vmatpush1.bf16.msra.mxu0 %v3991_v34  ;;  %2736 = vmatpush1.bf16.msra.mxu1 %v3994_v35  ;;  %v4087_v34 = vld [vmem:[%s5751_s1 + $0x64c] ss:$16 sps:$4 sm:$0xff]   ;;  %v4082_v35 = vld [vmem:[%s5751_s1 + $0x640] ss:$16 sps:$4 sm:$0xff]  }
  0x90   :  { %2491 = vmatprep.subr.bf16.mxu0 %v3999_v37  ;;  %2737 = vmatprep.subr.bf16.mxu1 %v4002_v38  ;;  %v4085_v37 = vld [vmem:[%s5751_s1 + $0x648] ss:$16 sps:$4 sm:$0xff]   ;;  %v4090_v38 = vld [vmem:[%s5751_s1 + $0x664] ss:$16 sps:$4 sm:$0xff]  }
  0x93   :  { %2492 = vmatpush1.bf16.msra.mxu0 %v3997_v39  ;;  %2738 = vmatpush1.bf16.msra.mxu1 %v4000_v40  ;;  %v4093_v39 = vld [vmem:[%s5751_s1 + $0x66c] ss:$16 sps:$4 sm:$0xff]   ;;  %v4088_v40 = vld [vmem:[%s5751_s1 + $0x660] ss:$16 sps:$4 sm:$0xff]  }
  0x94   :  { %2493 = vmatprep.subr.bf16.mxu0 %v4005_v41  ;;  %2739 = vmatprep.subr.bf16.mxu1 %v4008_v43  ;;  %v4091_v41 = vld [vmem:[%s5751_s1 + $0x668] ss:$16 sps:$4 sm:$0xff]   ;;  %v4096_v43 = vld [vmem:[%s5751_s1 + $0x684] ss:$16 sps:$4 sm:$0xff]  }
  0x97   :  { %2494 = vmatpush1.bf16.msra.mxu0 %v4003_v44  ;;  %2740 = vmatpush1.bf16.msra.mxu1 %v4006_v45  ;;  %v4099_v44 = vld [vmem:[%s5751_s1 + $0x68c] ss:$16 sps:$4 sm:$0xff]   ;;  %v4094_v45 = vld [vmem:[%s5751_s1 + $0x680] ss:$16 sps:$4 sm:$0xff]  }
  0x98   :  { %2495 = vmatprep.subr.bf16.mxu0 %v4011_v46  ;;  %2741 = vmatprep.subr.bf16.mxu1 %v4014_v47  ;;  %v4097_v46 = vld [vmem:[%s5751_s1 + $0x688] ss:$16 sps:$4 sm:$0xff]   ;;  %v4102_v47 = vld [vmem:[%s5751_s1 + $0x6a4] ss:$16 sps:$4 sm:$0xff]  }
  0x9b   :  { %2496 = vmatpush1.bf16.msra.mxu0 %v4009_v48  ;;  %2742 = vmatpush1.bf16.msra.mxu1 %v4012_v50  ;;  %v4105_v48 = vld [vmem:[%s5751_s1 + $0x6ac] ss:$16 sps:$4 sm:$0xff]   ;;  %v4100_v50 = vld [vmem:[%s5751_s1 + $0x6a0] ss:$16 sps:$4 sm:$0xff]  }
  0x9c   :  { %2497 = vmatprep.subr.bf16.mxu0 %v4017_v51  ;;  %2743 = vmatprep.subr.bf16.mxu1 %v4020_v53  ;;  %v4103_v51 = vld [vmem:[%s5751_s1 + $0x6a8] ss:$16 sps:$4 sm:$0xff]   ;;  %v4108_v53 = vld [vmem:[%s5751_s1 + $0x6c4] ss:$16 sps:$4 sm:$0xff]  }
  0x9f   :  { %2498 = vmatpush1.bf16.msra.mxu0 %v4015_v54  ;;  %2744 = vmatpush1.bf16.msra.mxu1 %v4018_v55  ;;  %v4111_v54 = vld [vmem:[%s5751_s1 + $0x6cc] ss:$16 sps:$4 sm:$0xff]   ;;  %v4106_v55 = vld [vmem:[%s5751_s1 + $0x6c0] ss:$16 sps:$4 sm:$0xff]  }
  0xa0   :  { %2499 = vmatprep.subr.bf16.mxu0 %v4023_v56  ;;  %2745 = vmatprep.subr.bf16.mxu1 %v4026_v57  ;;  %v4109_v56 = vld [vmem:[%s5751_s1 + $0x6c8] ss:$16 sps:$4 sm:$0xff]   ;;  %v4114_v57 = vld [vmem:[%s5751_s1 + $0x6e4] ss:$16 sps:$4 sm:$0xff]  }
  0xa3   :  { %2500 = vmatpush1.bf16.msra.mxu0 %v4021_v58  ;;  %2746 = vmatpush1.bf16.msra.mxu1 %v4024_v59  ;;  %v4117_v58 = vld [vmem:[%s5751_s1 + $0x6ec] ss:$16 sps:$4 sm:$0xff]   ;;  %v4112_v59 = vld [vmem:[%s5751_s1 + $0x6e0] ss:$16 sps:$4 sm:$0xff]  }
  0xa4   :  { %2501 = vmatprep.subr.bf16.mxu0 %v4029_v60  ;;  %2747 = vmatprep.subr.bf16.mxu1 %v4032_v61  ;;  %v4115_v60 = vld [vmem:[%s5751_s1 + $0x6e8] ss:$16 sps:$4 sm:$0xff]   ;;  %v4120_v61 = vld [vmem:[%s5751_s1 + $0x704] ss:$16 sps:$4 sm:$0xff]  }
  0xa7   :  { %2502 = vmatpush1.bf16.msra.mxu0 %v4027_v62  ;;  %2748 = vmatpush1.bf16.msra.mxu1 %v4030_v63  ;;  %v4123_v62 = vld [vmem:[%s5751_s1 + $0x70c] ss:$16 sps:$4 sm:$0xff]   ;;  %v4118_v63 = vld [vmem:[%s5751_s1 + $0x700] ss:$16 sps:$4 sm:$0xff]  }
  0xa8   :  { %2503 = vmatprep.subr.bf16.mxu0 %v4035_v0  ;;  %2749 = vmatprep.subr.bf16.mxu1 %v4038_v1  ;;  %v4121_v0 = vld [vmem:[%s5751_s1 + $0x708] ss:$16 sps:$4 sm:$0xff]   ;;  %v4126_v1 = vld [vmem:[%s5751_s1 + $0x724] ss:$16 sps:$4 sm:$0xff]  }
  0xab   :  { %2504 = vmatpush1.bf16.msra.mxu0 %v4033_v2  ;;  %2750 = vmatpush1.bf16.msra.mxu1 %v4036_v3  ;;  %v4129_v2 = vld [vmem:[%s5751_s1 + $0x72c] ss:$16 sps:$4 sm:$0xff]   ;;  %v4124_v3 = vld [vmem:[%s5751_s1 + $0x720] ss:$16 sps:$4 sm:$0xff]  }
  0xac   :  { %2505 = vmatprep.subr.bf16.mxu0 %v4041_v4  ;;  %2751 = vmatprep.subr.bf16.mxu1 %v4044_v5  ;;  %v4127_v4 = vld [vmem:[%s5751_s1 + $0x728] ss:$16 sps:$4 sm:$0xff]   ;;  %v4132_v5 = vld [vmem:[%s5751_s1 + $0x744] ss:$16 sps:$4 sm:$0xff]  }
  0xaf   :  { %2506 = vmatpush1.bf16.msra.mxu0 %v4039_v6  ;;  %2752 = vmatpush1.bf16.msra.mxu1 %v4042_v7  ;;  %v4135_v6 = vld [vmem:[%s5751_s1 + $0x74c] ss:$16 sps:$4 sm:$0xff]   ;;  %v4130_v7 = vld [vmem:[%s5751_s1 + $0x740] ss:$16 sps:$4 sm:$0xff]  }
  0xb0   :  { %2507 = vmatprep.subr.bf16.mxu0 %v4047_v8  ;;  %2753 = vmatprep.subr.bf16.mxu1 %v4050_v9  ;;  %v4133_v8 = vld [vmem:[%s5751_s1 + $0x748] ss:$16 sps:$4 sm:$0xff]   ;;  %v4138_v9 = vld [vmem:[%s5751_s1 + $0x764] ss:$16 sps:$4 sm:$0xff]  }
  0xb3   :  { %2508 = vmatpush1.bf16.msra.mxu0 %v4045_v10  ;;  %2754 = vmatpush1.bf16.msra.mxu1 %v4048_v11  ;;  %v4141_v10 = vld [vmem:[%s5751_s1 + $0x76c] ss:$16 sps:$4 sm:$0xff]   ;;  %v4136_v11 = vld [vmem:[%s5751_s1 + $0x760] ss:$16 sps:$4 sm:$0xff]  }
  0xb4   :  { %2509 = vmatprep.subr.bf16.mxu0 %v4053_v12  ;;  %2755 = vmatprep.subr.bf16.mxu1 %v4056_v14  ;;  %v4139_v12 = vld [vmem:[%s5751_s1 + $0x768] ss:$16 sps:$4 sm:$0xff]   ;;  %v4144_v14 = vld [vmem:[%s5751_s1 + $0x784] ss:$16 sps:$4 sm:$0xff]  }
  0xb7   :  { %2510 = vmatpush1.bf16.msra.mxu0 %v4051_v52  ;;  %2756 = vmatpush1.bf16.msra.mxu1 %v4054_v16  ;;  %v4147_v52 = vld [vmem:[%s5751_s1 + $0x78c] ss:$16 sps:$4 sm:$0xff]   ;;  %v4142_v16 = vld [vmem:[%s5751_s1 + $0x780] ss:$16 sps:$4 sm:$0xff]  }
  0xb8   :  { %2511 = vmatprep.subr.bf16.mxu0 %v4059_v17  ;;  %2757 = vmatprep.subr.bf16.mxu1 %v4062_v18  ;;  %v4145_v17 = vld [vmem:[%s5751_s1 + $0x788] ss:$16 sps:$4 sm:$0xff]   ;;  %v4150_v18 = vld [vmem:[%s5751_s1 + $0x7a4] ss:$16 sps:$4 sm:$0xff]  }
  0xbb   :  { %2512 = vmatpush1.bf16.msra.mxu0 %v4057_v19  ;;  %2758 = vmatpush1.bf16.msra.mxu1 %v4060_v20  ;;  %v4153_v19 = vld [vmem:[%s5751_s1 + $0x7ac] ss:$16 sps:$4 sm:$0xff]   ;;  %v4148_v20 = vld [vmem:[%s5751_s1 + $0x7a0] ss:$16 sps:$4 sm:$0xff]  }
  0xbc   :  { %2513 = vmatprep.subr.bf16.mxu0 %v4065_v21  ;;  %2759 = vmatprep.subr.bf16.mxu1 %v4068_v22  ;;  %v4151_v21 = vld [vmem:[%s5751_s1 + $0x7a8] ss:$16 sps:$4 sm:$0xff]   ;;  %v4156_v22 = vld [vmem:[%s5751_s1 + $0x7c4] ss:$16 sps:$4 sm:$0xff]  }
  0xbf   :  { %2514 = vmatpush1.bf16.msra.mxu0 %v4063_v23  ;;  %2760 = vmatpush1.bf16.msra.mxu1 %v4066_v24  ;;  %v4159_v23 = vld [vmem:[%s5751_s1 + $0x7cc] ss:$16 sps:$4 sm:$0xff]   ;;  %v4154_v24 = vld [vmem:[%s5751_s1 + $0x7c0] ss:$16 sps:$4 sm:$0xff]  }
  0xc0   :  { %2524 = vmatprep.subr.bf16.mxu0 %v4072_v25  ;;  %2770 = vmatprep.subr.bf16.mxu1 %v4075_v13  ;;  %v4157_v25 = vld [vmem:[%s5751_s1 + $0x7c8] ss:$16 sps:$4 sm:$0xff]   ;;  %v4162_v13 = vld [vmem:[%s5751_s1 + $0x7e4] ss:$16 sps:$4 sm:$0xff]  }
  0xc2   :  { %2516 = vmatmul.mubr.bf16.vlgmr.msra.gmra.mrb[0].mxu0 %v5058_v28  ;;  %2762 = vmatmul.mubr.bf16.vlgmr.msra.gmra.mrb[0].mxu1 %v5058_v28 }
  0xc3   :  { %2525 = vmatpush1.bf16.msra.mxu0 %v4070_v27  ;;  %2771 = vmatpush1.bf16.msra.mxu1 %v4073_v29  ;;  %v4165_v27 = vld [vmem:[%s5751_s1 + $0x7ec] ss:$16 sps:$4 sm:$0xff]   ;;  %v4160_v29 = vld [vmem:[%s5751_s1 + $0x7e0] ss:$16 sps:$4 sm:$0xff]  }
  0xc4   :  { %2526 = vmatprep.subr.bf16.mxu0 %v4078_v30  ;;  %2772 = vmatprep.subr.bf16.mxu1 %v4081_v31  ;;  %v4163_v30 = vld [vmem:[%s5751_s1 + $0x7e8] ss:$16 sps:$4 sm:$0xff]  }
  0xc5   :  { %2556 = vmatprep.mubr.bf16.mxu0 %v472_v15  ;;  %2802 = vmatprep.mubr.bf16.mxu1 %v472_v15  ;;  %v5250_v31 = vld.sshfl [vmem:[%s5750_s0 + $0x8] sm:$0x33 pattern:$0x75316420]  ;;  %v4168_v15 = vld [vmem:[%s5751_s1 + $0x804] ss:$16 sps:$4 sm:$0xff]  }
  0xc7   :  { %2527 = vmatpush1.bf16.msra.mxu0 %v4076_v32  ;;  %2773 = vmatpush1.bf16.msra.mxu1 %v4079_v33  ;;  %v4171_v32 = vld [vmem:[%s5751_s1 + $0x80c] ss:$16 sps:$4 sm:$0xff]   ;;  %v4166_v33 = vld [vmem:[%s5751_s1 + $0x800] ss:$16 sps:$4 sm:$0xff]  }
  0xc8   :  { %2528 = vmatprep.subr.bf16.mxu0 %v4084_v26  ;;  %2774 = vmatprep.subr.bf16.mxu1 %v4087_v34  ;;  %v480_v26 = vcombine.high %v5250_v31, %v5250_v31  ;;  %v4169_v34 = vld [vmem:[%s5751_s1 + $0x808] ss:$16 sps:$4 sm:$0xff]  }
  0xcb   :  { %2529 = vmatpush1.bf16.msra.mxu0 %v4082_v35  ;;  %2775 = vmatpush1.bf16.msra.mxu1 %v4085_v37  ;;  %v470_v35 = vcombine.high %v5058_v28, %v5058_v28  ;;  %v4174_v37 = vld [vmem:[%s5751_s1 + $0x824] ss:$16 sps:$4 sm:$0xff]   ;;  %v4175_v28 = vld [vmem:[%s5751_s1 + $0x828] ss:$16 sps:$4 sm:$0xff]  }
  0xcc   :  { %2530 = vmatprep.subr.bf16.mxu0 %v4090_v38  ;;  %2776 = vmatprep.subr.bf16.mxu1 %v4093_v39  ;;  %v4177_v38 = vld [vmem:[%s5751_s1 + $0x82c] ss:$16 sps:$4 sm:$0xff]   ;;  %v4172_v39 = vld [vmem:[%s5751_s1 + $0x820] ss:$16 sps:$4 sm:$0xff]  }
  0xcf   :  { %2531 = vmatpush1.bf16.msra.mxu0 %v4088_v40  ;;  %2777 = vmatpush1.bf16.msra.mxu1 %v4091_v41  ;;  %v5278_v40 = vrot.slane %v480_v26, %v4574_v49  ;;  %v4180_v41 = vld [vmem:[%s5751_s1 + $0x844] ss:$16 sps:$4 sm:$0xff]  }
  0xd0   :  { %2532 = vmatprep.subr.bf16.mxu0 %v4096_v43  ;;  %2778 = vmatprep.subr.bf16.mxu1 %v4099_v44  ;;  %v4183_v43 = vld [vmem:[%s5751_s1 + $0x84c] ss:$16 sps:$4 sm:$0xff]   ;;  %v4178_v44 = vld [vmem:[%s5751_s1 + $0x840] ss:$16 sps:$4 sm:$0xff]  }
  0xd3   :  { %2533 = vmatpush1.bf16.msra.mxu0 %v4094_v45  ;;  %2779 = vmatpush1.bf16.msra.mxu1 %v4097_v46  ;;  %v4181_v45 = vld [vmem:[%s5751_s1 + $0x848] ss:$16 sps:$4 sm:$0xff]   ;;  %v4186_v46 = vld [vmem:[%s5751_s1 + $0x864] ss:$16 sps:$4 sm:$0xff]  }
  0xd4   :  { %2534 = vmatprep.subr.bf16.mxu0 %v4102_v47  ;;  %2780 = vmatprep.subr.bf16.mxu1 %v4105_v48  ;;  %v4189_v47 = vld [vmem:[%s5751_s1 + $0x86c] ss:$16 sps:$4 sm:$0xff]   ;;  %v4184_v48 = vld [vmem:[%s5751_s1 + $0x860] ss:$16 sps:$4 sm:$0xff]  }
  0xd7   :  { %2535 = vmatpush1.bf16.msra.mxu0 %v4100_v50  ;;  %2781 = vmatpush1.bf16.msra.mxu1 %v4103_v51  ;;  %v4187_v50 = vld [vmem:[%s5751_s1 + $0x868] ss:$16 sps:$4 sm:$0xff]   ;;  %v4192_v51 = vld [vmem:[%s5751_s1 + $0x884] ss:$16 sps:$4 sm:$0xff]  }
  0xd8   :  { %2536 = vmatprep.subr.bf16.mxu0 %v4108_v53  ;;  %2782 = vmatprep.subr.bf16.mxu1 %v4111_v54  ;;  %v4195_v53 = vld [vmem:[%s5751_s1 + $0x88c] ss:$16 sps:$4 sm:$0xff]   ;;  %v4190_v54 = vld [vmem:[%s5751_s1 + $0x880] ss:$16 sps:$4 sm:$0xff]  }
  0xdb   :  { %2537 = vmatpush1.bf16.msra.mxu0 %v4106_v55  ;;  %2783 = vmatpush1.bf16.msra.mxu1 %v4109_v56  ;;  %v4193_v55 = vld [vmem:[%s5751_s1 + $0x888] ss:$16 sps:$4 sm:$0xff]   ;;  %v4198_v56 = vld [vmem:[%s5751_s1 + $0x8a4] ss:$16 sps:$4 sm:$0xff]  }
  0xdc   :  { %2538 = vmatprep.subr.bf16.mxu0 %v4114_v57  ;;  %2784 = vmatprep.subr.bf16.mxu1 %v4117_v58  ;;  %v4201_v57 = vld [vmem:[%s5751_s1 + $0x8ac] ss:$16 sps:$4 sm:$0xff]   ;;  %v4196_v58 = vld [vmem:[%s5751_s1 + $0x8a0] ss:$16 sps:$4 sm:$0xff]  }
  0xdf   :  { %2539 = vmatpush1.bf16.msra.mxu0 %v4112_v59  ;;  %2785 = vmatpush1.bf16.msra.mxu1 %v4115_v60  ;;  %v4199_v59 = vld [vmem:[%s5751_s1 + $0x8a8] ss:$16 sps:$4 sm:$0xff]   ;;  %v4204_v60 = vld [vmem:[%s5751_s1 + $0x8c4] ss:$16 sps:$4 sm:$0xff]  }
  0xe0   :  { %2540 = vmatprep.subr.bf16.mxu0 %v4120_v61  ;;  %2786 = vmatprep.subr.bf16.mxu1 %v4123_v62  ;;  %v4207_v61 = vld [vmem:[%s5751_s1 + $0x8cc] ss:$16 sps:$4 sm:$0xff]   ;;  %v4202_v62 = vld [vmem:[%s5751_s1 + $0x8c0] ss:$16 sps:$4 sm:$0xff]  }
  0xe3   :  { %2541 = vmatpush1.bf16.msra.mxu0 %v4118_v63  ;;  %2787 = vmatpush1.bf16.msra.mxu1 %v4121_v0  ;;  %v4205_v63 = vld [vmem:[%s5751_s1 + $0x8c8] ss:$16 sps:$4 sm:$0xff]   ;;  %v4210_v0 = vld [vmem:[%s5751_s1 + $0x8e4] ss:$16 sps:$4 sm:$0xff]  }
  0xe4   :  { %2542 = vmatprep.subr.bf16.mxu0 %v4126_v1  ;;  %2788 = vmatprep.subr.bf16.mxu1 %v4129_v2  ;;  %v4213_v1 = vld [vmem:[%s5751_s1 + $0x8ec] ss:$16 sps:$4 sm:$0xff]  }
  0xe7   :  { %2543 = vmatpush1.bf16.msra.mxu0 %v4124_v3  ;;  %2789 = vmatpush1.bf16.msra.mxu1 %v4127_v4 }
  0xe8   :  { %2544 = vmatprep.subr.bf16.mxu0 %v4132_v5  ;;  %2790 = vmatprep.subr.bf16.mxu1 %v4135_v6 }
  0xeb   :  { %2545 = vmatpush1.bf16.msra.mxu0 %v4130_v7  ;;  %2791 = vmatpush1.bf16.msra.mxu1 %v4133_v8 }
  0xec   :  { %2546 = vmatprep.subr.bf16.mxu0 %v4138_v9  ;;  %2792 = vmatprep.subr.bf16.mxu1 %v4141_v10 }
  0xef   :  { %2547 = vmatpush1.bf16.msra.mxu0 %v4136_v11  ;;  %2793 = vmatpush1.bf16.msra.mxu1 %v4139_v12 }
  0xf0   :  { %2548 = vmatprep.subr.bf16.mxu0 %v4144_v14  ;;  %2794 = vmatprep.subr.bf16.mxu1 %v4147_v52 }
  0xf3   :  { %2549 = vmatpush1.bf16.msra.mxu0 %v4142_v16  ;;  %2795 = vmatpush1.bf16.msra.mxu1 %v4145_v17 }
  0xf4   :  { %2550 = vmatprep.subr.bf16.mxu0 %v4150_v18  ;;  %2796 = vmatprep.subr.bf16.mxu1 %v4153_v19 }
  0xf7   :  { %2551 = vmatpush1.bf16.msra.mxu0 %v4148_v20  ;;  %2797 = vmatpush1.bf16.msra.mxu1 %v4151_v21 }
  0xf8   :  { %2552 = vmatprep.subr.bf16.mxu0 %v4156_v22  ;;  %2798 = vmatprep.subr.bf16.mxu1 %v4159_v23 }
  0xfb   :  { %2553 = vmatpush1.bf16.msra.mxu0 %v4154_v24  ;;  %2799 = vmatpush1.bf16.msra.mxu1 %v4157_v25 }
  0xfc   :  { %2554 = vmatprep.subr.bf16.mxu0 %v4162_v13  ;;  %2800 = vmatprep.subr.bf16.mxu1 %v4165_v27 }
  0xff   :  { %2555 = vmatpush1.bf16.msra.mxu0 %v4160_v29  ;;  %2801 = vmatpush1.bf16.msra.mxu1 %v4163_v30 }
 0x100   :  { %2565 = vmatprep.subr.bf16.mxu0 %v4168_v15  ;;  %2811 = vmatprep.subr.bf16.mxu1 %v4171_v32 }
 0x102   :  { %2557 = vmatmul.mubr.bf16.vlgmr.msra.gmra.mrb[0].mxu0 %v470_v35  ;;  %2803 = vmatmul.mubr.bf16.vlgmr.msra.gmra.mrb[0].mxu1 %v470_v35 }
 0x103   :  { %2566 = vmatpush1.bf16.msra.mxu0 %v4166_v33  ;;  %2812 = vmatpush1.bf16.msra.mxu1 %v4169_v34 }
 0x104   :  { %2567 = vmatprep.subr.bf16.mxu0 %v4174_v37  ;;  %2813 = vmatprep.subr.bf16.mxu1 %v4177_v38 }
 0x105   :  { %2597 = vmatprep.mubr.bf16.mxu0 %v5278_v40  ;;  %2843 = vmatprep.mubr.bf16.mxu1 %v5278_v40 }
 0x107   :  { %2568 = vmatpush1.bf16.msra.mxu0 %v4172_v39  ;;  %2814 = vmatpush1.bf16.msra.mxu1 %v4175_v28 }
 0x108   :  { %2569 = vmatprep.subr.bf16.mxu0 %v4180_v41  ;;  %2815 = vmatprep.subr.bf16.mxu1 %v4183_v43 }
 0x10b   :  { %2570 = vmatpush1.bf16.msra.mxu0 %v4178_v44  ;;  %2816 = vmatpush1.bf16.msra.mxu1 %v4181_v45 }
 0x10c   :  { %2571 = vmatprep.subr.bf16.mxu0 %v4186_v46  ;;  %2817 = vmatprep.subr.bf16.mxu1 %v4189_v47 }
 0x10f   :  { %2572 = vmatpush1.bf16.msra.mxu0 %v4184_v48  ;;  %2818 = vmatpush1.bf16.msra.mxu1 %v4187_v50 }
 0x110   :  { %2573 = vmatprep.subr.bf16.mxu0 %v4192_v51  ;;  %2819 = vmatprep.subr.bf16.mxu1 %v4195_v53 }
 0x113   :  { %2574 = vmatpush1.bf16.msra.mxu0 %v4190_v54  ;;  %2820 = vmatpush1.bf16.msra.mxu1 %v4193_v55 }
 0x114   :  { %2575 = vmatprep.subr.bf16.mxu0 %v4198_v56  ;;  %2821 = vmatprep.subr.bf16.mxu1 %v4201_v57 }
 0x117   :  { %2576 = vmatpush1.bf16.msra.mxu0 %v4196_v58  ;;  %2822 = vmatpush1.bf16.msra.mxu1 %v4199_v59 }
 0x118   :  { %2577 = vmatprep.subr.bf16.mxu0 %v4204_v60  ;;  %2823 = vmatprep.subr.bf16.mxu1 %v4207_v61 }
 0x119   :  { %10 = vsyncpa [#allocation3], 0  ;;  %v4208_v2 = vld [vmem:[%s5751_s1 + $0x8e0] ss:$16 sps:$4 sm:$0xff]   ;;  %v4211_v3 = vld [vmem:[%s5751_s1 + $0x8e8] ss:$16 sps:$4 sm:$0xff]   ;;  %v5461_v28 = vrot.slane %v5250_v31, %v4574_v49  ;;  %v496_v31 = vcombine.high %v5278_v40, %v5278_v40 }
 0x11a   :  { %v4216_v4 = vld [vmem:[%s5751_s1 + $0x904] ss:$16 sps:$4 sm:$0xff]   ;;  %v4219_v5 = vld [vmem:[%s5751_s1 + $0x90c] ss:$16 sps:$4 sm:$0xff]   ;;  %v4214_v6 = vld [vmem:[%s5751_s1 + $0x900] ss:$16 sps:$4 sm:$0xff]  }
 0x11b   :  { %2578 = vmatpush1.bf16.msra.mxu0 %v4202_v62  ;;  %2824 = vmatpush1.bf16.msra.mxu1 %v4205_v63  ;;  %v4217_v7 = vld [vmem:[%s5751_s1 + $0x908] ss:$16 sps:$4 sm:$0xff]   ;;  %v4222_v8 = vld [vmem:[%s5751_s1 + $0x924] ss:$16 sps:$4 sm:$0xff]   ;;  %v4225_v9 = vld [vmem:[%s5751_s1 + $0x92c] ss:$16 sps:$4 sm:$0xff]  }
 0x11c   :  { %2579 = vmatprep.subr.bf16.mxu0 %v4210_v0  ;;  %2825 = vmatprep.subr.bf16.mxu1 %v4213_v1  ;;  %v4220_v10 = vld [vmem:[%s5751_s1 + $0x920] ss:$16 sps:$4 sm:$0xff]   ;;  %v4223_v11 = vld [vmem:[%s5751_s1 + $0x928] ss:$16 sps:$4 sm:$0xff]   ;;  %v4228_v12 = vld [vmem:[%s5751_s1 + $0x944] ss:$16 sps:$4 sm:$0xff]  }
 0x11d   :  { %v4231_v14 = vld [vmem:[%s5751_s1 + $0x94c] ss:$16 sps:$4 sm:$0xff]   ;;  %v4226_v52 = vld [vmem:[%s5751_s1 + $0x940] ss:$16 sps:$4 sm:$0xff]   ;;  %v4229_v16 = vld [vmem:[%s5751_s1 + $0x948] ss:$16 sps:$4 sm:$0xff]  }
 0x11e   :  { %v4234_v17 = vld [vmem:[%s5751_s1 + $0x964] ss:$16 sps:$4 sm:$0xff]   ;;  %v4237_v18 = vld [vmem:[%s5751_s1 + $0x96c] ss:$16 sps:$4 sm:$0xff]   ;;  %v4232_v19 = vld [vmem:[%s5751_s1 + $0x960] ss:$16 sps:$4 sm:$0xff]  }
 0x11f   :  { %2580 = vmatpush1.bf16.msra.mxu0 %v4208_v2  ;;  %2826 = vmatpush1.bf16.msra.mxu1 %v4211_v3  ;;  %v4235_v20 = vld [vmem:[%s5751_s1 + $0x968] ss:$16 sps:$4 sm:$0xff]   ;;  %v4240_v21 = vld [vmem:[%s5751_s1 + $0x984] ss:$16 sps:$4 sm:$0xff]   ;;  %v4243_v22 = vld [vmem:[%s5751_s1 + $0x98c] ss:$16 sps:$4 sm:$0xff]  }
 0x120   :  { %2581 = vmatprep.subr.bf16.mxu0 %v4216_v4  ;;  %2827 = vmatprep.subr.bf16.mxu1 %v4219_v5  ;;  %v4238_v23 = vld [vmem:[%s5751_s1 + $0x980] ss:$16 sps:$4 sm:$0xff]   ;;  %v4241_v24 = vld [vmem:[%s5751_s1 + $0x988] ss:$16 sps:$4 sm:$0xff]   ;;  %v4246_v25 = vld [vmem:[%s5751_s1 + $0x9a4] ss:$16 sps:$4 sm:$0xff]  }
 0x121   :  { %v4249_v13 = vld [vmem:[%s5751_s1 + $0x9ac] ss:$16 sps:$4 sm:$0xff]   ;;  %v4244_v27 = vld [vmem:[%s5751_s1 + $0x9a0] ss:$16 sps:$4 sm:$0xff]   ;;  %v4247_v29 = vld [vmem:[%s5751_s1 + $0x9a8] ss:$16 sps:$4 sm:$0xff]  }
 0x122   :  { %v4252_v30 = vld [vmem:[%s5751_s1 + $0x9c4] ss:$16 sps:$4 sm:$0xff]   ;;  %v4255_v15 = vld [vmem:[%s5751_s1 + $0x9cc] ss:$16 sps:$4 sm:$0xff]   ;;  %v4250_v32 = vld [vmem:[%s5751_s1 + $0x9c0] ss:$16 sps:$4 sm:$0xff]  }
 0x123   :  { %2582 = vmatpush1.bf16.msra.mxu0 %v4214_v6  ;;  %2828 = vmatpush1.bf16.msra.mxu1 %v4217_v7  ;;  %v4253_v33 = vld [vmem:[%s5751_s1 + $0x9c8] ss:$16 sps:$4 sm:$0xff]   ;;  %v4258_v26 = vld [vmem:[%s5751_s1 + $0x9e4] ss:$16 sps:$4 sm:$0xff]   ;;  %v4261_v34 = vld [vmem:[%s5751_s1 + $0x9ec] ss:$16 sps:$4 sm:$0xff]  }
 0x124   :  { %2583 = vmatprep.subr.bf16.mxu0 %v4222_v8  ;;  %2829 = vmatprep.subr.bf16.mxu1 %v4225_v9  ;;  %v4256_v35 = vld [vmem:[%s5751_s1 + $0x9e0] ss:$16 sps:$4 sm:$0xff]   ;;  %v4259_v37 = vld [vmem:[%s5751_s1 + $0x9e8] ss:$16 sps:$4 sm:$0xff]   ;;  %v4264_v38 = vld [vmem:[%s5751_s1 + $0xa04] ss:$16 sps:$4 sm:$0xff]  }
 0x125   :  { %v4267_v39 = vld [vmem:[%s5751_s1 + $0xa0c] ss:$16 sps:$4 sm:$0xff]   ;;  %v4262_v41 = vld [vmem:[%s5751_s1 + $0xa00] ss:$16 sps:$4 sm:$0xff]   ;;  %v4265_v43 = vld [vmem:[%s5751_s1 + $0xa08] ss:$16 sps:$4 sm:$0xff]  }
 0x126   :  { %v4270_v44 = vld [vmem:[%s5751_s1 + $0xa24] ss:$16 sps:$4 sm:$0xff]   ;;  %v4273_v49 = vld [vmem:[%s5751_s1 + $0xa2c] ss:$16 sps:$4 sm:$0xff]   ;;  %vm2384_vm0 = vcmask 752640   ;;  %vm2388_vm1 = vcmask 1045504  }
 0x127   :  { %2584 = vmatpush1.bf16.msra.mxu0 %v4220_v10  ;;  %2830 = vmatpush1.bf16.msra.mxu1 %v4223_v11  ;;  %v4268_v45 = vld [vmem:[%s5751_s1 + $0xa20] ss:$16 sps:$4 sm:$0xff]   ;;  %v4271_v46 = vld [vmem:[%s5751_s1 + $0xa28] ss:$16 sps:$4 sm:$0xff]   ;;  %v4276_v40 = vld [vmem:[%s5751_s1 + $0xa44] ss:$16 sps:$4 sm:$0xff]  }
 0x128   :  { %2585 = vmatprep.subr.bf16.mxu0 %v4228_v12  ;;  %2831 = vmatprep.subr.bf16.mxu1 %v4231_v14  ;;  %v4279_v47 = vld [vmem:[%s5751_s1 + $0xa4c] ss:$16 sps:$4 sm:$0xff]   ;;  %v4274_v48 = vld [vmem:[%s5751_s1 + $0xa40] ss:$16 sps:$4 sm:$0xff]   ;;  %v4277_v50 = vld [vmem:[%s5751_s1 + $0xa48] ss:$16 sps:$4 sm:$0xff]  }
 0x129   :  { %v4282_v51 = vld [vmem:[%s5751_s1 + $0xa64] ss:$16 sps:$4 sm:$0xff]   ;;  %v4285_v53 = vld [vmem:[%s5751_s1 + $0xa6c] ss:$16 sps:$4 sm:$0xff]   ;;  %v4280_v54 = vld [vmem:[%s5751_s1 + $0xa60] ss:$16 sps:$4 sm:$0xff]  }
 0x12a   :  { %v4283_v55 = vld [vmem:[%s5751_s1 + $0xa68] ss:$16 sps:$4 sm:$0xff]   ;;  %v4288_v56 = vld [vmem:[%s5751_s1 + $0xa84] ss:$16 sps:$4 sm:$0xff]   ;;  %v4291_v57 = vld [vmem:[%s5751_s1 + $0xa8c] ss:$16 sps:$4 sm:$0xff]  }
 0x12b   :  { %2586 = vmatpush1.bf16.msra.mxu0 %v4226_v52  ;;  %2832 = vmatpush1.bf16.msra.mxu1 %v4229_v16  ;;  %v4286_v58 = vld [vmem:[%s5751_s1 + $0xa80] ss:$16 sps:$4 sm:$0xff]   ;;  %v4289_v59 = vld [vmem:[%s5751_s1 + $0xa88] ss:$16 sps:$4 sm:$0xff]   ;;  %v4294_v60 = vld [vmem:[%s5751_s1 + $0xaa4] ss:$16 sps:$4 sm:$0xff]  }
 0x12c   :  { %2587 = vmatprep.subr.bf16.mxu0 %v4234_v17  ;;  %2833 = vmatprep.subr.bf16.mxu1 %v4237_v18  ;;  %v4297_v61 = vld [vmem:[%s5751_s1 + $0xaac] ss:$16 sps:$4 sm:$0xff]   ;;  %v4292_v62 = vld [vmem:[%s5751_s1 + $0xaa0] ss:$16 sps:$4 sm:$0xff]   ;;  %v4295_v63 = vld [vmem:[%s5751_s1 + $0xaa8] ss:$16 sps:$4 sm:$0xff]  }
 0x12d   :  { %v4300_v0 = vld [vmem:[%s5751_s1 + $0xac4] ss:$16 sps:$4 sm:$0xff]   ;;  %v4303_v1 = vld [vmem:[%s5751_s1 + $0xacc] ss:$16 sps:$4 sm:$0xff]   ;;  %v4298_v2 = vld [vmem:[%s5751_s1 + $0xac0] ss:$16 sps:$4 sm:$0xff]  }
 0x12e   :  { %v4301_v3 = vld [vmem:[%s5751_s1 + $0xac8] ss:$16 sps:$4 sm:$0xff]   ;;  %v4306_v4 = vld [vmem:[%s5751_s1 + $0xae4] ss:$16 sps:$4 sm:$0xff]   ;;  %v4309_v5 = vld [vmem:[%s5751_s1 + $0xaec] ss:$16 sps:$4 sm:$0xff]  }
 0x12f   :  { %2588 = vmatpush1.bf16.msra.mxu0 %v4232_v19  ;;  %2834 = vmatpush1.bf16.msra.mxu1 %v4235_v20  ;;  %v4304_v6 = vld [vmem:[%s5751_s1 + $0xae0] ss:$16 sps:$4 sm:$0xff]   ;;  %v4307_v7 = vld [vmem:[%s5751_s1 + $0xae8] ss:$16 sps:$4 sm:$0xff]   ;;  %v4312_v8 = vld [vmem:[%s5751_s1 + $0xb04] ss:$16 sps:$4 sm:$0xff]  }
 0x130   :  { %2589 = vmatprep.subr.bf16.mxu0 %v4240_v21  ;;  %2835 = vmatprep.subr.bf16.mxu1 %v4243_v22  ;;  %v4315_v9 = vld [vmem:[%s5751_s1 + $0xb0c] ss:$16 sps:$4 sm:$0xff]   ;;  %v4310_v10 = vld [vmem:[%s5751_s1 + $0xb00] ss:$16 sps:$4 sm:$0xff]   ;;  %v4313_v11 = vld [vmem:[%s5751_s1 + $0xb08] ss:$16 sps:$4 sm:$0xff]  }
 0x131   :  { %v4318_v12 = vld [vmem:[%s5751_s1 + $0xb24] ss:$16 sps:$4 sm:$0xff]   ;;  %v4321_v14 = vld [vmem:[%s5751_s1 + $0xb2c] ss:$16 sps:$4 sm:$0xff]   ;;  %v4316_v52 = vld [vmem:[%s5751_s1 + $0xb20] ss:$16 sps:$4 sm:$0xff]  }
 0x132   :  { %v4319_v16 = vld [vmem:[%s5751_s1 + $0xb28] ss:$16 sps:$4 sm:$0xff]   ;;  %v4324_v17 = vld [vmem:[%s5751_s1 + $0xb44] ss:$16 sps:$4 sm:$0xff]   ;;  %v4327_v18 = vld [vmem:[%s5751_s1 + $0xb4c] ss:$16 sps:$4 sm:$0xff]  }
 0x133   :  { %2590 = vmatpush1.bf16.msra.mxu0 %v4238_v23  ;;  %2836 = vmatpush1.bf16.msra.mxu1 %v4241_v24  ;;  %v4322_v19 = vld [vmem:[%s5751_s1 + $0xb40] ss:$16 sps:$4 sm:$0xff]   ;;  %v4325_v20 = vld [vmem:[%s5751_s1 + $0xb48] ss:$16 sps:$4 sm:$0xff]   ;;  %v4330_v21 = vld [vmem:[%s5751_s1 + $0xb64] ss:$16 sps:$4 sm:$0xff]  }
 0x134   :  { %2591 = vmatprep.subr.bf16.mxu0 %v4246_v25  ;;  %2837 = vmatprep.subr.bf16.mxu1 %v4249_v13  ;;  %v4333_v22 = vld [vmem:[%s5751_s1 + $0xb6c] ss:$16 sps:$4 sm:$0xff]   ;;  %v4328_v23 = vld [vmem:[%s5751_s1 + $0xb60] ss:$16 sps:$4 sm:$0xff]   ;;  %v4331_v24 = vld [vmem:[%s5751_s1 + $0xb68] ss:$16 sps:$4 sm:$0xff]  }
 0x135   :  { %v4336_v25 = vld [vmem:[%s5751_s1 + $0xb84] ss:$16 sps:$4 sm:$0xff]   ;;  %v4339_v13 = vld [vmem:[%s5751_s1 + $0xb8c] ss:$16 sps:$4 sm:$0xff]   ;;  %vm3248_vm3 = vcmask 1041408  }
 0x137   :  { %2592 = vmatpush1.bf16.msra.mxu0 %v4244_v27  ;;  %2838 = vmatpush1.bf16.msra.mxu1 %v4247_v29  ;;  %v4334_v27 = vld [vmem:[%s5751_s1 + $0xb80] ss:$16 sps:$4 sm:$0xff]   ;;  %v4337_v29 = vld [vmem:[%s5751_s1 + $0xb88] ss:$16 sps:$4 sm:$0xff]  }
 0x138   :  { %2593 = vmatprep.subr.bf16.mxu0 %v4252_v30  ;;  %2839 = vmatprep.subr.bf16.mxu1 %v4255_v15  ;;  %v4340_v30 = vld [vmem:[%s5751_s1 + $0xba4] ss:$16 sps:$4 sm:$0x3f]   ;;  %v4342_v15 = vld [vmem:[%s5751_s1 + $0xbac] ss:$16 sps:$4 sm:$0x3f]  }
 0x13b   :  { %2594 = vmatpush1.bf16.msra.mxu0 %v4250_v32  ;;  %2840 = vmatpush1.bf16.msra.mxu1 %v4253_v33  ;;  %v4344_v32 = vld [vmem:[%s5751_s1 + $0xba0] ss:$16 sps:$4 sm:$0x3f]   ;;  %v4345_v33 = vld [vmem:[%s5751_s1 + $0xba8] ss:$16 sps:$4 sm:$0x3f]  }
 0x13c   :  { %2595 = vmatprep.subr.bf16.mxu0 %v4258_v26  ;;  %2841 = vmatprep.subr.bf16.mxu1 %v4261_v34  ;;  %v2390_v26 = vsel %vm2388_vm1, %v4344_v32, 0  ;;  %v2396_v34 = vsel %vm2388_vm1, %v4345_v33, 0 }
 0x13f   :  { %2596 = vmatpush1.bf16.msra.mxu0 %v4256_v35  ;;  %2842 = vmatpush1.bf16.msra.mxu1 %v4259_v37  ;;  %v4346_v35 = vld [vmem:[%s5753_s3 + $0x40] sm:$0xff]  }
 0x140   :  { %2606 = vmatprep.subr.bf16.mxu0 %v4264_v38  ;;  %2852 = vmatprep.subr.bf16.mxu1 %v4267_v39  ;;  %v4347_v37 = vld [vmem:[%s5753_s3 + $0xc0] sm:$0xff]   ;;  %v495_v38 = vcombine.high %v5461_v28, %v5461_v28 }
 0x141   :  { %v4348_v39 = vld [vmem:[%s5753_s3] sm:$0xff]  }
 0x142   :  { %2598 = vmatmul.mubr.bf16.vlgmr.msra.gmra.mrb[0].mxu0 %v5461_v28  ;;  %2844 = vmatmul.mubr.bf16.vlgmr.msra.gmra.mrb[0].mxu1 %v5461_v28  ;;  %v4351_v28 = vld [vmem:[%s5753_s3 + $0xc8] sm:$0xff]  }
 0x143   :  { %2607 = vmatpush1.bf16.msra.mxu0 %v4262_v41  ;;  %2853 = vmatpush1.bf16.msra.mxu1 %v4265_v43  ;;  %v4349_v41 = vld [vmem:[%s5753_s3 + $0x80] sm:$0xff]   ;;  %v4350_v43 = vld [vmem:[%s5753_s3 + $0x48] sm:$0xff]  }
 0x144   :  { %2608 = vmatprep.subr.bf16.mxu0 %v4270_v44  ;;  %2854 = vmatprep.subr.bf16.mxu1 %v4273_v49  ;;  %v4352_v44 = vld [vmem:[%s5753_s3 + $0x8] sm:$0xff]  }
 0x145   :  { %3655 = vmatprep.mubr.msk.bf16.mxu0 %vm2384_vm0, %v496_v31  ;;  %3657 = vmatprep.mubr.msk.bf16.mxu1 %vm2384_vm0, %v496_v31  ;;  %v4353_v49 = vld [vmem:[%s5753_s3 + $0x88] sm:$0xff]   ;;  %v4354_v31 = vld [vmem:[%s5753_s3 + $0x50] sm:$0xff]  }
 0x147   :  { %2609 = vmatpush1.bf16.msra.mxu0 %v4268_v45  ;;  %2855 = vmatpush1.bf16.msra.mxu1 %v4271_v46  ;;  %v4355_v45 = vld [vmem:[%s5753_s3 + $0xd0] sm:$0xff]  }
 0x148   :  { %2610 = vmatprep.subr.bf16.mxu0 %v4276_v40  ;;  %2856 = vmatprep.subr.bf16.mxu1 %v4279_v47  ;;  %v4356_v46 = vld [vmem:[%s5753_s3 + $0x10] sm:$0xff]   ;;  %v4358_v47 = vld [vmem:[%s5753_s3 + $0x58] sm:$0xff]  }
 0x149   :  { %v4357_v40 = vld [vmem:[%s5753_s3 + $0x90] sm:$0xff]  }
 0x14b   :  { %2611 = vmatpush1.bf16.msra.mxu0 %v4274_v48  ;;  %2857 = vmatpush1.bf16.msra.mxu1 %v4277_v50  ;;  %v4359_v48 = vld [vmem:[%s5753_s3 + $0xd8] sm:$0xff]  }
 0x14c   :  { %2612 = vmatprep.subr.bf16.mxu0 %v4282_v51  ;;  %2858 = vmatprep.subr.bf16.mxu1 %v4285_v53  ;;  %v4360_v50 = vld [vmem:[%s5753_s3 + $0x18] sm:$0xff]   ;;  %v4362_v53 = vld [vmem:[%s5753_s3 + $0x60] sm:$0xff]  }
 0x14d   :  { %v4361_v51 = vld [vmem:[%s5753_s3 + $0x98] sm:$0xff]  }
 0x14f   :  { %2613 = vmatpush1.bf16.msra.mxu0 %v4280_v54  ;;  %2859 = vmatpush1.bf16.msra.mxu1 %v4283_v55  ;;  %v4363_v54 = vld [vmem:[%s5753_s3 + $0xe0] sm:$0xff]  }
 0x150   :  { %2614 = vmatprep.subr.bf16.mxu0 %v4288_v56  ;;  %2860 = vmatprep.subr.bf16.mxu1 %v4291_v57  ;;  %v4364_v55 = vld [vmem:[%s5753_s3 + $0x20] sm:$0xff]   ;;  %v4366_v57 = vld [vmem:[%s5753_s3 + $0x68] sm:$0xff]  }
 0x151   :  { %v4365_v56 = vld [vmem:[%s5753_s3 + $0xa0] sm:$0xff]  }
 0x153   :  { %2615 = vmatpush1.bf16.msra.mxu0 %v4286_v58  ;;  %2861 = vmatpush1.bf16.msra.mxu1 %v4289_v59  ;;  %v4367_v58 = vld [vmem:[%s5753_s3 + $0xe8] sm:$0xff]  }
 0x154   :  { %2616 = vmatprep.subr.bf16.mxu0 %v4294_v60  ;;  %2862 = vmatprep.subr.bf16.mxu1 %v4297_v61  ;;  %v4368_v59 = vld [vmem:[%s5753_s3 + $0x28] sm:$0xff]   ;;  %v4370_v61 = vld [vmem:[%s5753_s3 + $0x70] sm:$0xff]  }
 0x155   :  { %v4369_v60 = vld [vmem:[%s5753_s3 + $0xa8] sm:$0xff]  }
 0x157   :  { %2617 = vmatpush1.bf16.msra.mxu0 %v4292_v62  ;;  %2863 = vmatpush1.bf16.msra.mxu1 %v4295_v63  ;;  %v4371_v62 = vld [vmem:[%s5753_s3 + $0xf0] sm:$0xff]  }
 0x158   :  { %2618 = vmatprep.subr.bf16.mxu0 %v4300_v0  ;;  %2864 = vmatprep.subr.bf16.mxu1 %v4303_v1  ;;  %v4372_v63 = vld [vmem:[%s5753_s3 + $0x30] sm:$0xff]   ;;  %v4374_v1 = vld [vmem:[%s5753_s3 + $0x78] sm:$0xff]  }
 0x159   :  { %v4373_v0 = vld [vmem:[%s5753_s3 + $0xb0] sm:$0xff]  }
 0x15b   :  { %2619 = vmatpush1.bf16.msra.mxu0 %v4298_v2  ;;  %2865 = vmatpush1.bf16.msra.mxu1 %v4301_v3  ;;  %v4375_v2 = vld [vmem:[%s5753_s3 + $0xf8] sm:$0xff]  }
 0x15c   :  { %2620 = vmatprep.subr.bf16.mxu0 %v4306_v4  ;;  %2866 = vmatprep.subr.bf16.mxu1 %v4309_v5  ;;  %v4376_v3 = vld [vmem:[%s5753_s3 + $0x38] sm:$0xff]   ;;  %v404_v5 = vsub.s32 0, %v4556_v42 }
 0x15d   :  { %v4377_v4 = vld [vmem:[%s5753_s3 + $0xb8] sm:$0xff]  }
 0x15f   :  { %2621 = vmatpush1.bf16.msra.mxu0 %v4304_v6  ;;  %2867 = vmatpush1.bf16.msra.mxu1 %v4307_v7  ;;  %v412_v6 = vsub.s32 2, %v4556_v42  ;;  %v400_v7 = vld [vmem:[%s5752_s2] sm:$0xf] }
 0x160   :  { %2622 = vmatprep.subr.bf16.mxu0 %v4312_v8  ;;  %2868 = vmatprep.subr.bf16.mxu1 %v4315_v9  ;;  %v408_v8 = vsub.s32 1, %v4556_v42  ;;  %v416_v9 = vsub.s32 3, %v4556_v42 }
 0x163   :  { %2623 = vmatpush1.bf16.msra.mxu0 %v4310_v10  ;;  %2869 = vmatpush1.bf16.msra.mxu1 %v4313_v11  ;;  %v405_v10 = vrot.slane %v400_v7, %v404_v5  ;;  %v413_v11 = vrot.slane %v400_v7, %v412_v6 }
 0x164   :  { %2624 = vmatprep.subr.bf16.mxu0 %v4318_v12  ;;  %2870 = vmatprep.subr.bf16.mxu1 %v4321_v14  ;;  %v409_v12 = vrot.slane %v400_v7, %v408_v8  ;;  %v417_v14 = vrot.slane %v400_v7, %v416_v9 }
 0x167   :  { %2625 = vmatpush1.bf16.msra.mxu0 %v4316_v52  ;;  %2871 = vmatpush1.bf16.msra.mxu1 %v4319_v16 }
 0x168   :  { %2626 = vmatprep.subr.bf16.mxu0 %v4324_v17  ;;  %2872 = vmatprep.subr.bf16.mxu1 %v4327_v18 }
 0x16b   :  { %2627 = vmatpush1.bf16.msra.mxu0 %v4322_v19  ;;  %2873 = vmatpush1.bf16.msra.mxu1 %v4325_v20 }
 0x16c   :  { %2628 = vmatprep.subr.bf16.mxu0 %v4330_v21  ;;  %2874 = vmatprep.subr.bf16.mxu1 %v4333_v22 }
 0x16f   :  { %2629 = vmatpush1.bf16.msra.mxu0 %v4328_v23  ;;  %2875 = vmatpush1.bf16.msra.mxu1 %v4331_v24 }
 0x170   :  { %2630 = vmatprep.subr.bf16.mxu0 %v4336_v25  ;;  %2876 = vmatprep.subr.bf16.mxu1 %v4339_v13 }
 0x173   :  { %2631 = vmatpush1.bf16.msra.mxu0 %v4334_v27  ;;  %2877 = vmatpush1.bf16.msra.mxu1 %v4337_v29 }
 0x174   :  { %3654 = vmatprep.subr.msk.bf16.mxu0 %vm2388_vm1, %v4340_v30  ;;  %3656 = vmatprep.subr.msk.bf16.mxu1 %vm2388_vm1, %v4342_v15 }
 0x177   :  { %2633 = vmatpush1.bf16.msra.mxu0 %v2390_v26  ;;  %2879 = vmatpush1.bf16.msra.mxu1 %v2396_v34 }
 0x178   :  { %3691 = vmatprep.subr.bf16.mxu0 %v4346_v35  ;;  %3713 = vmatprep.subr.bf16.mxu1 %v4347_v37  ;;  %v3658_v37 = vld [vmem:[%s5754_s4] ss:$0 sm:$0xff]  ;;  %s4407_s4 = smov [#allocation2]  }
 0x179   :  { %s3269_s25 = sshll.u32 %s4407_s4, 4  ;;  %s3270_s25 = int_to_ptr.vmem [resolvable:$true] %s3269_s25 }
 0x17a   :  { %2639 = vmatmul.mubr.bf16.vlgmr.msra.gmra.mrb[0].mxu0 %v495_v38  ;;  %2885 = vmatmul.mubr.bf16.vlgmr.msra.gmra.mrb[0].mxu1 %v495_v38  ;;  %s4382_s26 = scalar_lea.vmem %s3270_s25, 32  ;;  %p4387_p1 = scmp.lt.s32.totalorder %s3270_s25, %s3270_s25 }
 0x17b   :  { %3692 = vmatpush3.bf16.msra.mxu0 %v4348_v39  ;;  %3714 = vmatpush3.bf16.msra.mxu1 %v4349_v41  ;;  %v3245_v41 = vand.u32 127, %v402_v36  ;;  %p4383_p0 = scmp.ne.s32.totalorder %s3270_s25, %s4382_s26  ;;  %p4388_p2 = scmp.lt.s32.totalorder %s4382_s26, %s4382_s26 }
 0x17c   :  { %3693 = vmatprep.subr.bf16.mxu0 %v4350_v43  ;;  %3715 = vmatprep.subr.bf16.mxu1 %v4351_v28 }
 0x17d   :  { %vm3246_vm2 = vcmp.lt.s32.totalorder %v3245_v41, 10  ;;  %p4389_p3 = por %p4388_p2, %p4387_p1 }
 0x17f   :  { %3694 = vmatpush3.bf16.msra.mxu0 %v4352_v44  ;;  %3716 = vmatpush3.bf16.msra.mxu1 %v4353_v49  ;;  %p4390_p4 = pnand %p4389_p3, %p4383_p0 }
 0x180   :  { %3695 = vmatprep.subr.bf16.mxu0 %v4354_v31  ;;  %3717 = vmatprep.subr.bf16.mxu1 %v4355_v45 }
 0x183   :  { %3696 = vmatpush3.bf16.msra.mxu0 %v4356_v46  ;;  %3718 = vmatpush3.bf16.msra.mxu1 %v4357_v40 }
 0x184   :  { %3697 = vmatprep.subr.bf16.mxu0 %v4358_v47  ;;  %3719 = vmatprep.subr.bf16.mxu1 %v4359_v48 }
 0x187   :  { %3698 = vmatpush3.bf16.msra.mxu0 %v4360_v50  ;;  %3720 = vmatpush3.bf16.msra.mxu1 %v4361_v51 }
 0x188   :  { %3699 = vmatprep.subr.bf16.mxu0 %v4362_v53  ;;  %3721 = vmatprep.subr.bf16.mxu1 %v4363_v54 }
 0x18b   :  { %3700 = vmatpush3.bf16.msra.mxu0 %v4364_v55  ;;  %3722 = vmatpush3.bf16.msra.mxu1 %v4365_v56 }
 0x18c   :  { %3701 = vmatprep.subr.bf16.mxu0 %v4366_v57  ;;  %3723 = vmatprep.subr.bf16.mxu1 %v4367_v58 }
 0x18f   :  { %3702 = vmatpush3.bf16.msra.mxu0 %v4368_v59  ;;  %3724 = vmatpush3.bf16.msra.mxu1 %v4369_v60 }
 0x190   :  { %3703 = vmatprep.subr.bf16.mxu0 %v4370_v61  ;;  %3725 = vmatprep.subr.bf16.mxu1 %v4371_v62 }
 0x193   :  { %3704 = vmatpush3.bf16.msra.mxu0 %v4372_v63  ;;  %3726 = vmatpush3.bf16.msra.mxu1 %v4373_v0 }
 0x194   :  { %3705 = vmatprep.subr.bf16.mxu0 %v4374_v1  ;;  %3727 = vmatprep.subr.bf16.mxu1 %v4375_v2 }
 0x197   :  { %3706 = vmatpush3.bf16.msra.mxu0 %v4376_v3  ;;  %3728 = vmatpush3.bf16.msra.mxu1 %v4377_v4 }
 0x24d   :  { %v2640_v52 = vpop.f32.mrb[0].mxu0  ;;  %v2886_v16 = vpop.f32.mrb[0].mxu1 }
 0x24e   :  { %v3735_v17 = vadd.f32 %v2640_v52, %v405_v10  ;;  %v3737_v18 = vadd.f32 %v2886_v16, %v413_v11  ;;  %v2642_v19 = vpop.f32.mrb[1].mxu0  ;;  %v2888_v20 = vpop.f32.mrb[1].mxu1 }
 0x24f   :  { %v3736_v21 = vadd.f32 %v2642_v19, %v409_v12  ;;  %v3738_v22 = vadd.f32 %v2888_v20, %v417_v14  ;;  %v2644_v23 = vpop.f32.mrb[2].mxu0  ;;  %v2890_v24 = vpop.f32.mrb[2].mxu1 }
 0x250   :  { %v2893_v25 = vmax.f32 %v3735_v17, 0.0  ;;  %v2895_v13 = vmax.f32 %v3737_v18, 0.0  ;;  %v2645_v27 = vpop.f32.mrb[3].mxu0  ;;  %v2891_v29 = vpop.f32.mrb[3].mxu1 }
 0x251   :  { %v2894_v30 = vmax.f32 %v3736_v21, 0.0  ;;  %v2896_v42 = vmax.f32 %v3738_v22, 0.0 }
 0x252   :  { %v2897_v33 = vpack.c.bf16 %v2893_v25, %v2893_v25  ;;  %v2899_v26 = vpack.c.bf16 %v2895_v13, %v2895_v13 }
 0x253   :  { %v2898_v15 = vpack.c.bf16 %v2894_v30, %v2894_v30  ;;  %v2900_v32 = vpack.c.bf16 %v2896_v42, %v2896_v42 }
 0x255   :  { %3196 = vmatprep.mubr.bf16.mxu0 %v2898_v15  ;;  %3236 = vmatprep.mubr.bf16.mxu1 %v2900_v32 }
 0x256   :  { %3197 = vmatmul.mubr.bf16.vlgmr.msra.gmra.mrb[4].mxu0 %v2897_v33  ;;  %3237 = vmatmul.mubr.bf16.vlgmr.msra.gmra.mrb[4].mxu1 %v2899_v26 }
 0x329   :  { %v3707_v34 = vpop.f32.mrb[4].mxu0  ;;  %v3729_v35 = vpop.f32.mrb[4].mxu1 }
 0x32a   :  { %v3708_v38 = vpop.f32.mrb[5].mxu0  ;;  %v3730_v39 = vpop.f32.mrb[5].mxu1 }
 0x32b   :  { %v3709_v43 = vadd.f32 %v3708_v38, %v3707_v34  ;;  %v3731_v28 = vadd.f32 %v3730_v39, %v3729_v35  ;;  %v3710_v44 = vpop.f32.mrb[6].mxu0  ;;  %v3732_v49 = vpop.f32.mrb[6].mxu1 }
 0x32c   :  { %v3711_v31 = vpop.f32.mrb[7].mxu0  ;;  %v3733_v45 = vpop.f32.mrb[7].mxu1 }
 0x32d   :  { %v3199_v46 = vadd.f32 %v3709_v43, %v3658_v37 }
 0x32f   :  { %v3239_v40 = vadd.f32 %v3731_v28, %v3199_v46 }
 0x331   :  { %v3247_v47 = vsel %vm3246_vm2, %v3239_v40, -1e+30 }
 0x332   :  { %v3249_v48 = vsel %vm3248_vm3, %v3247_v47, -inf }
 0x333   :  { %3250 = vmax.xlane.f32.xlu0 %v3249_v48 }
 0x3c0   :  { %v3251_v50 = vpop.xlane.xlu0 %3250 }
 0x3c1   :  { %v3252_v51 = vsub.f32 %v3247_v47, %v3251_v50 }
 0x3c3   :  { %v3253_v53 = vmul.f32 1.442695, %v3252_v51 }
 0x3c5   :  { %4378 = vpow2.f32 %v3253_v53 }
 0x3cf   :  { %v4379_v54 = vpop.eup %4378 }
 0x3d0   :  { %v3255_v55 = vsel %vm3248_vm3, %v4379_v54, 0.0 }
 0x3d1   :  { %3256 = vadd.xlane.f32.xlu0 %v3255_v55 }
 0x45e   :  { %v3257_v36 = vpop.xlane.xlu0 %3256 }
 0x45f   :  { %4380 = vlog2.f32 %v3257_v36 }
 0x469   :  { %v4381_v56 = vpop.eup %4380 }
 0x46a   :  { %v3259_v57 = vmul.f32 0.6931472, %v4381_v56 }
 0x46c   :  { %v3260_v58 = vadd.f32 %v3259_v57, %v3251_v50 }
 0x46e   :  { %v3261_v59 = vsub.f32 %v3247_v47, %v3260_v58 }
 0x470   :  { %3262 = vst [vmem:[#allocation2] sm:$0x3] %v3261_v59 }
 0x471   :  { %4393 = shalt.err (!%p4390_p4)
}
 0x472   :  { %s4394_s29 = scalar_lea.hbm %s5755_s5, 32 }
 0x473   :  { %p4395_p5 = scmp.ne.s32.totalorder %s5755_s5, %s4394_s29  ;;  %p4398_p6 = scmp.lt.u32.totalorder %s4394_s29, %s5755_s5 }
 0x475   :  { %p4400_p7 = pnand %p4398_p6, %p4395_p5 }
 0x477   :  { %4403 = shalt.err (!%p4400_p7)
}
 0x478   :  { %3272 = dma.vmem_to_hbm [thread:$0]  %s3270_s25, 32, %s5755_s5, [#allocation3]  }
 0x479   :  { %4404 = dma.done.wait [#allocation3], 32  }
 0x47a   :  { %4405 = vsyncadd [#allocation3], 4294967264 }
 0x47b   :  { %3276 = vsyncpa [#allocation3], 1 }

</bundles_post_ra>
